<compile_context>
chip_gen: v5e
topology: v5e:2x2
jax: 0.10.0
libtpu: 0.0.40
codegen_flags: <defaults>
</compile_context>

<pallas_src>
import jax
import jax.numpy as jnp
from jax import lax
from jax.experimental import pallas as pl
from jax.experimental.pallas import tpu as pltpu

MXU_DTYPE = jnp.bfloat16   # MXU operand dtype; accumulation is always f32.


# --------------------------------------------------------------------------
# Fused kernel: all three sepConv4d blocks + outer ReLUs for one batch element
# --------------------------------------------------------------------------
def _build_conv4ds_kernel(hw, uv):
    """Returns the fused 3-block kernel (closed over the spatial sizes)."""

    def sep_block(x, wuv_ref, buv_ref, whw_ref, bhw_ref, buf_b, buf_a):
        # x: (hw, cin*uv) f32, columns = (channel-major, uv)
        cmid = wuv_ref.shape[1] // uv
        cout = whw_ref.shape[0] // hw

        # conv2: 3x3 over (u,v) + BN + ReLU -- one (hw,cin*uv)@(cin*uv,cmid*uv)
        y = jnp.dot(x.astype(MXU_DTYPE), wuv_ref[...],
                    preferred_element_type=jnp.float32)
        y = jnp.maximum(y + buv_ref[...], 0.0)                  # (hw, cmid*uv)

        # relayout (hw, c*uv) -> (c*hw, uv): per-channel block moves (no
        # transpose op needed -- the (36,36) tiles are copied as-is).
        for i in range(cmid):
            buf_b[i * hw:(i + 1) * hw, :] = y[:, i * uv:(i + 1) * uv]
        yb = buf_b[:cmid * hw, :]                               # (cmid*hw, uv)

        # conv1: 3x3 over (h,w) + BN (+ folded 1x1 proj + BN) + outer ReLU
        #   -- one (cout*hw, cmid*hw)@(cmid*hw, uv) matmul
        z = jnp.dot(whw_ref[...], yb.astype(MXU_DTYPE),
                    preferred_element_type=jnp.float32)         # (cout*hw, uv)
        z = jnp.maximum(z + bhw_ref[...], 0.0)

        # relayout back (c*hw, uv) -> (hw, c*uv) for the next block / output
        for i in range(cout):
            buf_a[:, i * uv:(i + 1) * uv] = z[i * hw:(i + 1) * hw, :]
        return buf_a[:, :cout * uv]

    def kernel(x_ref,
               wuv1, buv1, whw1, bhw1,
               wuv2, buv2, whw2, bhw2,
               wuv3, buv3, whw3, bhw3,
               o_ref, buf_b, buf_a):
        x = x_ref[0]                                            # (hw, cin*uv)
        x = sep_block(x, wuv1, buv1, whw1, bhw1, buf_b, buf_a)
        x = sep_block(x, wuv2, buv2, whw2, bhw2, buf_b, buf_a)
        x = sep_block(x, wuv3, buv3, whw3, bhw3, buf_b, buf_a)
        o_ref[0] = x.astype(o_ref.dtype)                        # one dense store

    return kernel


# --------------------------------------------------------------------------
# Module forward: one pallas_call, one layout change at each module boundary
# --------------------------------------------------------------------------
def conv4ds_forward(x, blocks):
    """x: (b, c, u, v, h, w) -> (b, c_out, u, v, h, w)."""
    b, c, u, v, h, w = x.shape
    hw, uv = h * w, u * v

    # Single layout change at the module boundary: (b, HW, C*UV); the lane
    # dimension is C*UV = 144/288 (>=128) throughout the kernel.
    xa = jnp.transpose(x, (0, 4, 5, 1, 2, 3)).reshape(b, hw, c * uv)

    flat = [xa]
    in_specs = [pl.BlockSpec((1, hw, c * uv), lambda i: (i, 0, 0))]
    for blk in blocks:
        for name in ("wuv", "buv", "whw", "bhw"):
            a = blk[name]
            flat.append(a)
            in_specs.append(pl.BlockSpec(a.shape,
                                         lambda i, nd=a.ndim: (0,) * nd))

    c_max = max(max(blk["wuv"].shape[1] // uv, blk["whw"].shape[0] // hw)
                for blk in blocks)
    cout = blocks[-1]["whw"].shape[0] // hw

    out = pl.pallas_call(
        _build_conv4ds_kernel(hw, uv),
        out_shape=jax.ShapeDtypeStruct((b, hw, cout * uv), x.dtype),
        grid=(b,),
        in_specs=in_specs,
        out_specs=pl.BlockSpec((1, hw, cout * uv), lambda i: (i, 0, 0)),
        scratch_shapes=[pltpu.VMEM((c_max * hw, uv), jnp.float32),   # (c,hw)xUV
                        pltpu.VMEM((hw, c_max * uv), jnp.float32)],  # HWx(c,uv)
        compiler_params=pltpu.CompilerParams(
            dimension_semantics=("parallel",)),   # batch shards across TCs
    )(*flat)

    out = out.reshape(b, h, w, cout, u, v)
    return jnp.transpose(out, (0, 3, 4, 5, 1, 2))


# --------------------------------------------------------------------------
# Trace-time parameter preparation (BN / projection folding, dense matrices)
# --------------------------------------------------------------------------
def _conv3x3_dense(w_hwio, H, W):
    """Dense matrix D[co, ci, pos_in, pos_out] of a stride-1, pad-1, 3x3
    cross-correlation; zero padding at the border is baked in."""
    cin, cout = w_hwio.shape[2], w_hwio.shape[3]
    yy = jnp.arange(H)
    xx = jnp.arange(W)
    dy = yy[:, None] - yy[None, :] + 1                       # [y_in, y_out]
    dx = xx[:, None] - xx[None, :] + 1                       # [x_in, x_out]
    ok = (((dy >= 0) & (dy <= 2))[:, :, None, None]
          & ((dx >= 0) & (dx <= 2))[None, None, :, :])       # (H, H, W, W)
    taps = w_hwio[jnp.clip(dy, 0, 2)[:, :, None, None],
                  jnp.clip(dx, 0, 2)[None, None, :, :]]      # (H,H,W,W,Ci,Co)
    taps = jnp.where(ok[..., None, None], taps, 0.0)
    d = jnp.transpose(taps, (5, 4, 0, 2, 1, 3))              # (Co,Ci,Hi,Wi,Ho,Wo)
    return d.reshape(cout, cin, H * W, H * W)


def prepare_sep_conv4d(raw, u, v, h, w):
    """Fold eval-mode BN and the optional 1x1 projection into the conv weights
    and build the dense matrices / bias vectors consumed by the fused kernel."""
    uv, hw = u * v, h * w
    s2, t2 = raw["bn2"]
    s1, t1 = raw["bn1"]
    w2f = raw["w2"] * s2[None, None, None, :]
    if "wp" in raw:
        # conv1 -> bn1 -> 1x1 proj -> bnp is a linear chain (no ReLU between),
        # so it folds exactly into a single 3x3 conv + shift.
        sp, tp = raw["bnp"]
        w1f = jnp.einsum("yxio,o,oc,c->yxic", raw["w1"], s1, raw["wp"], sp)
        shift_hw = jnp.einsum("o,oc,c->c", t1, raw["wp"], sp) + tp
    else:
        w1f = raw["w1"] * s1[None, None, None, :]
        shift_hw = t1
    cin, cmid = w2f.shape[2], w2f.shape[3]
    cout = w1f.shape[3]

    duv = _conv3x3_dense(w2f, u, v)                          # (Cmid,Cin,UVi,UVo)
    wuv = jnp.transpose(duv, (1, 2, 0, 3)).reshape(cin * uv, cmid * uv)
    dhw = _conv3x3_dense(w1f, h, w)                          # (Cout,Cmid,HWi,HWo)
    whw = jnp.transpose(dhw, (0, 3, 1, 2)).reshape(cout * hw, cmid * hw)
    return {
        "wuv": wuv.astype(MXU_DTYPE),                        # right-mult matrix
        "buv": jnp.repeat(t2, uv)[None, :].astype(jnp.float32),
        "whw": whw.astype(MXU_DTYPE),                        # left-mult matrix
        "bhw": jnp.repeat(shift_hw, hw)[:, None].astype(jnp.float32),
    }


def prepare_conv4ds_params(raw_params, u, v, h, w):
    return tuple(prepare_sep_conv4d(raw_params[name], u, v, h, w)
                 for name in ("block1", "block2", "block3"))


# --------------------------------------------------------------------------
# Deterministic parameter initialization (eval-mode BN statistics)
# --------------------------------------------------------------------------
def _fold_bn(gamma, beta, mean, var, eps=1e-5):
    scale = gamma / jnp.sqrt(var + eps)
    shift = beta - mean * scale
    return scale.astype(jnp.float32), shift.astype(jnp.float32)


def _rand_bn(key, c):
    kg, kb, km, kv = jax.random.split(key, 4)
    gamma = 1.0 + 0.1 * jax.random.normal(kg, (c,), jnp.float32)
    beta = 0.1 * jax.random.normal(kb, (c,), jnp.float32)
    mean = 0.1 * jax.random.normal(km, (c,), jnp.float32)
    var = 1.0 + 0.1 * jnp.abs(jax.random.normal(kv, (c,), jnp.float32))
    return _fold_bn(gamma, beta, mean, var)


def init_sep_conv4d(key, cin, cout):
    k = jax.random.split(key, 6)
    p = {}
    std3 = (2.0 / (9.0 * cin)) ** 0.5
    # conv2 / conv1: Conv2d(cin, cin, 3x3), stored HWIO
    p["w2"] = std3 * jax.random.normal(k[0], (3, 3, cin, cin), jnp.float32)
    p["bn2"] = _rand_bn(k[1], cin)
    p["w1"] = std3 * jax.random.normal(k[2], (3, 3, cin, cin), jnp.float32)
    p["bn1"] = _rand_bn(k[3], cin)
    if cin != cout:                 # 1x1 projection + BN
        p["wp"] = ((2.0 / cin) ** 0.5
                   * jax.random.normal(k[4], (cin, cout), jnp.float32))
        p["bnp"] = _rand_bn(k[5], cout)
    return p


# --------------------------------------------------------------------------
# Pure-JAX reference (mirrors the torch forward, eval-mode BN, f32)
# --------------------------------------------------------------------------
def _ref_sep_block(x6, raw):
    b, c, u, v, h, w = x6.shape
    s2, t2 = raw["bn2"]
    s1, t1 = raw["bn1"]
    dn = ("NHWC", "HWIO", "NHWC")
    hp = lax.Precision.HIGHEST
    y = jnp.transpose(x6, (0, 4, 5, 2, 3, 1)).reshape(b * h * w, u, v, c)
    y = lax.conv_general_dilated(y, raw["w2"], (1, 1), "SAME",
                                 dimension_numbers=dn, precision=hp)
    y = jnp.maximum(y * s2 + t2, 0.0)
    y = y.reshape(b, h, w, u, v, c).transpose(0, 3, 4, 1, 2, 5)
    y = y.reshape(b * u * v, h, w, c)
    z = lax.conv_general_dilated(y, raw["w1"], (1, 1), "SAME",
                                 dimension_numbers=dn, precision=hp)
    z = z * s1 + t1
    if "wp" in raw:
        sp, tp = raw["bnp"]
        z = jnp.einsum("nhwc,cd->nhwd", z, raw["wp"], precision=hp) * sp + tp
    z = jnp.maximum(z, 0.0)                         # outer Conv4Ds ReLU
    cout = z.shape[-1]
    z = z.reshape(b, u, v, h, w, cout)
    return jnp.transpose(z, (0, 5, 1, 2, 3, 4))


def reference_forward(x, raw_params):
    y = x
    for name in ("block1", "block2", "block3"):
        y = _ref_sep_block(y, raw_params[name])
    return y


# --------------------------------------------------------------------------
if __name__ == "__main__":
    key = jax.random.PRNGKey(0)
    kx, k1, k2, k3 = jax.random.split(key, 4)

    inplanes = 4
    b, u, v, h, w = 2, 6, 6, 6, 6          # b=2 -> both v7x TensorCores used
    x = jax.random.normal(kx, (b, inplanes, u, v, h, w), jnp.float32)

    raw_params = {
        "block1": init_sep_conv4d(k1, inplanes, inplanes * 2),      # C -> 2C (proj)
        "block2": init_sep_conv4d(k2, inplanes * 2, inplanes * 2),  # 2C -> 2C
        "block3": init_sep_conv4d(k3, inplanes * 2, inplanes),      # 2C -> C (proj)
    }
    blocks = prepare_conv4ds_params(raw_params, u, v, h, w)

    out = jax.jit(conv4ds_forward)(x, blocks)
    jax.block_until_ready(out)
    assert out.shape == (b, inplanes, u, v, h, w), out.shape
    assert out.dtype == jnp.float32

    # Correctness check against a pure-f32 JAX reference.  bf16 MXU operands
    # across 3 stacked blocks (f32 accumulation) need slightly more headroom
    # than a pure-f32 kernel would.
    ref = jax.jit(reference_forward)(x, raw_params)
    err = float(jnp.max(jnp.abs(out - ref)))
    scale = float(jnp.max(jnp.abs(ref)))
    assert err <= 7e-2 * (1.0 + scale), (err, scale)

    print("KERNEL_OK")
</pallas_src>

<mosaic_0001>
module attributes {stable_mosaic.version = 11 : i64} {
  func.func @kernel(%arg0: i32, %arg1: memref<1x36x144xf32, #tpu.memory_space<vmem>>, %arg2: memref<144x144xbf16, #tpu.memory_space<vmem>>, %arg3: memref<1x144xf32, #tpu.memory_space<vmem>>, %arg4: memref<288x144xbf16, #tpu.memory_space<vmem>>, %arg5: memref<288x1xf32, #tpu.memory_space<vmem>>, %arg6: memref<288x288xbf16, #tpu.memory_space<vmem>>, %arg7: memref<1x288xf32, #tpu.memory_space<vmem>>, %arg8: memref<288x288xbf16, #tpu.memory_space<vmem>>, %arg9: memref<288x1xf32, #tpu.memory_space<vmem>>, %arg10: memref<288x288xbf16, #tpu.memory_space<vmem>>, %arg11: memref<1x288xf32, #tpu.memory_space<vmem>>, %arg12: memref<144x288xbf16, #tpu.memory_space<vmem>>, %arg13: memref<144x1xf32, #tpu.memory_space<vmem>>, %arg14: memref<1x36x144xf32, #tpu.memory_space<vmem>>, %arg15: memref<288x36xf32, #tpu.memory_space<vmem>>, %arg16: memref<36x288xf32, #tpu.memory_space<vmem>>) attributes {dimension_semantics = [#tpu.dimension_semantics<parallel>], iteration_bounds = array<i64: 2>, scalar_prefetch = 0 : i64, scratch_operands = 2 : i64, tpu.core_type = #tpu.core_type<tc>, window_params = [{transform_indices = @transform_0, window_bounds = array<i64: 1, 36, 144>}, {pipeline_mode = #tpu.pipeline_mode<synchronous>, transform_indices = @transform_1, window_bounds = array<i64: 144, 144>}, {pipeline_mode = #tpu.pipeline_mode<synchronous>, transform_indices = @transform_2, window_bounds = array<i64: 1, 144>}, {pipeline_mode = #tpu.pipeline_mode<synchronous>, transform_indices = @transform_3, window_bounds = array<i64: 288, 144>}, {pipeline_mode = #tpu.pipeline_mode<synchronous>, transform_indices = @transform_4, window_bounds = array<i64: 288, 1>}, {pipeline_mode = #tpu.pipeline_mode<synchronous>, transform_indices = @transform_5, window_bounds = array<i64: 288, 288>}, {pipeline_mode = #tpu.pipeline_mode<synchronous>, transform_indices = @transform_6, window_bounds = array<i64: 1, 288>}, {pipeline_mode = #tpu.pipeline_mode<synchronous>, transform_indices = @transform_7, window_bounds = array<i64: 288, 288>}, {pipeline_mode = #tpu.pipeline_mode<synchronous>, transform_indices = @transform_8, window_bounds = array<i64: 288, 1>}, {pipeline_mode = #tpu.pipeline_mode<synchronous>, transform_indices = @transform_9, window_bounds = array<i64: 288, 288>}, {pipeline_mode = #tpu.pipeline_mode<synchronous>, transform_indices = @transform_10, window_bounds = array<i64: 1, 288>}, {pipeline_mode = #tpu.pipeline_mode<synchronous>, transform_indices = @transform_11, window_bounds = array<i64: 144, 288>}, {pipeline_mode = #tpu.pipeline_mode<synchronous>, transform_indices = @transform_12, window_bounds = array<i64: 144, 1>}, {transform_indices = @transform_13, window_bounds = array<i64: 1, 36, 144>}]} {
    %c0 = arith.constant 0 : index
    %c0_0 = arith.constant 0 : index
    %c0_1 = arith.constant 0 : index
    %0 = vector.load %arg1[%c0, %c0_0, %c0_1] : memref<1x36x144xf32, #tpu.memory_space<vmem>>, vector<1x36x144xf32>
    %1 = vector.shape_cast %0 : vector<1x36x144xf32> to vector<36x144xf32>
    %2 = arith.truncf %1 : vector<36x144xf32> to vector<36x144xbf16>
    %c0_2 = arith.constant 0 : index
    %c0_3 = arith.constant 0 : index
    %3 = vector.load %arg2[%c0_2, %c0_3] : memref<144x144xbf16, #tpu.memory_space<vmem>>, vector<144x144xbf16>
    %cst = arith.constant dense<0.000000e+00> : vector<36x144xf32>
    %4 = tpu.matmul %2, %3, %cst {dimension_numbers = #tpu.dot_dimension_numbers<[1], [0], [0], [1], [0, 0, 1, 1], [], []>} : vector<36x144xbf16>, vector<144x144xbf16>, vector<36x144xf32> -> vector<36x144xf32>
    %c0_4 = arith.constant 0 : index
    %c0_5 = arith.constant 0 : index
    %5 = vector.load %arg3[%c0_4, %c0_5] : memref<1x144xf32, #tpu.memory_space<vmem>>, vector<1x144xf32>
    %6 = vector.broadcast %5 : vector<1x144xf32> to vector<36x144xf32>
    %7 = arith.addf %4, %6 : vector<36x144xf32>
    %cst_6 = arith.constant 0.000000e+00 : f32
    %8 = vector.broadcast %cst_6 : f32 to vector<36x144xf32>
    %9 = arith.maximumf %7, %8 : vector<36x144xf32>
    %10 = vector.extract_strided_slice %9 {offsets = [0, 0], sizes = [36, 36], strides = [1, 1]} : vector<36x144xf32> to vector<36x36xf32>
    %c0_7 = arith.constant 0 : index
    %c0_8 = arith.constant 0 : index
    %11 = vector.load %arg15[%c0_7, %c0_8] : memref<288x36xf32, #tpu.memory_space<vmem>>, vector<36x36xf32>
    tpu.vector_store %arg15[%c0_7, %c0_8], %10 {strides = array<i32>} : memref<288x36xf32, #tpu.memory_space<vmem>>, vector<36x36xf32>,
    %12 = vector.extract_strided_slice %9 {offsets = [0, 36], sizes = [36, 36], strides = [1, 1]} : vector<36x144xf32> to vector<36x36xf32>
    %c36 = arith.constant 36 : index
    %c0_9 = arith.constant 0 : index
    %13 = vector.load %arg15[%c36, %c0_9] : memref<288x36xf32, #tpu.memory_space<vmem>>, vector<36x36xf32>
    tpu.vector_store %arg15[%c36, %c0_9], %12 {strides = array<i32>} : memref<288x36xf32, #tpu.memory_space<vmem>>, vector<36x36xf32>,
    %14 = vector.extract_strided_slice %9 {offsets = [0, 72], sizes = [36, 36], strides = [1, 1]} : vector<36x144xf32> to vector<36x36xf32>
    %c72 = arith.constant 72 : index
    %c0_10 = arith.constant 0 : index
    %15 = vector.load %arg15[%c72, %c0_10] : memref<288x36xf32, #tpu.memory_space<vmem>>, vector<36x36xf32>
    tpu.vector_store %arg15[%c72, %c0_10], %14 {strides = array<i32>} : memref<288x36xf32, #tpu.memory_space<vmem>>, vector<36x36xf32>,
    %16 = vector.extract_strided_slice %9 {offsets = [0, 108], sizes = [36, 36], strides = [1, 1]} : vector<36x144xf32> to vector<36x36xf32>
    %c108 = arith.constant 108 : index
    %c0_11 = arith.constant 0 : index
    %17 = vector.load %arg15[%c108, %c0_11] : memref<288x36xf32, #tpu.memory_space<vmem>>, vector<36x36xf32>
    tpu.vector_store %arg15[%c108, %c0_11], %16 {strides = array<i32>} : memref<288x36xf32, #tpu.memory_space<vmem>>, vector<36x36xf32>,
    %c0_12 = arith.constant 0 : index
    %c0_13 = arith.constant 0 : index
    %18 = vector.load %arg15[%c0_12, %c0_13] : memref<288x36xf32, #tpu.memory_space<vmem>>, vector<144x36xf32>
    %c0_14 = arith.constant 0 : index
    %c0_15 = arith.constant 0 : index
    %19 = vector.load %arg4[%c0_14, %c0_15] : memref<288x144xbf16, #tpu.memory_space<vmem>>, vector<288x144xbf16>
    %20 = arith.truncf %18 : vector<144x36xf32> to vector<144x36xbf16>
    %cst_16 = arith.constant dense<0.000000e+00> : vector<288x36xf32>
    %21 = tpu.matmul %19, %20, %cst_16 {dimension_numbers = #tpu.dot_dimension_numbers<[1], [0], [0], [1], [0, 0, 1, 1], [], []>} : vector<288x144xbf16>, vector<144x36xbf16>, vector<288x36xf32> -> vector<288x36xf32>
    %c0_17 = arith.constant 0 : index
    %c0_18 = arith.constant 0 : index
    %22 = vector.load %arg5[%c0_17, %c0_18] : memref<288x1xf32, #tpu.memory_space<vmem>>, vector<288x1xf32>
    %23 = vector.broadcast %22 : vector<288x1xf32> to vector<288x36xf32>
    %24 = arith.addf %21, %23 : vector<288x36xf32>
    %cst_19 = arith.constant 0.000000e+00 : f32
    %25 = vector.broadcast %cst_19 : f32 to vector<288x36xf32>
    %26 = arith.maximumf %24, %25 : vector<288x36xf32>
    %27 = vector.extract_strided_slice %26 {offsets = [0, 0], sizes = [36, 36], strides = [1, 1]} : vector<288x36xf32> to vector<36x36xf32>
    %c0_20 = arith.constant 0 : index
    %c0_21 = arith.constant 0 : index
    %28 = vector.load %arg16[%c0_20, %c0_21] : memref<36x288xf32, #tpu.memory_space<vmem>>, vector<36x36xf32>
    tpu.vector_store %arg16[%c0_20, %c0_21], %27 {strides = array<i32>} : memref<36x288xf32, #tpu.memory_space<vmem>>, vector<36x36xf32>,
    %29 = vector.extract_strided_slice %26 {offsets = [36, 0], sizes = [36, 36], strides = [1, 1]} : vector<288x36xf32> to vector<36x36xf32>
    %c0_22 = arith.constant 0 : index
    %c36_23 = arith.constant 36 : index
    %30 = vector.load %arg16[%c0_22, %c36_23] : memref<36x288xf32, #tpu.memory_space<vmem>>, vector<36x36xf32>
    tpu.vector_store %arg16[%c0_22, %c36_23], %29 {strides = array<i32>} : memref<36x288xf32, #tpu.memory_space<vmem>>, vector<36x36xf32>,
    %31 = vector.extract_strided_slice %26 {offsets = [72, 0], sizes = [36, 36], strides = [1, 1]} : vector<288x36xf32> to vector<36x36xf32>
    %c0_24 = arith.constant 0 : index
    %c72_25 = arith.constant 72 : index
    %32 = vector.load %arg16[%c0_24, %c72_25] : memref<36x288xf32, #tpu.memory_space<vmem>>, vector<36x36xf32>
    tpu.vector_store %arg16[%c0_24, %c72_25], %31 {strides = array<i32>} : memref<36x288xf32, #tpu.memory_space<vmem>>, vector<36x36xf32>,
    %33 = vector.extract_strided_slice %26 {offsets = [108, 0], sizes = [36, 36], strides = [1, 1]} : vector<288x36xf32> to vector<36x36xf32>
    %c0_26 = arith.constant 0 : index
    %c108_27 = arith.constant 108 : index
    %34 = vector.load %arg16[%c0_26, %c108_27] : memref<36x288xf32, #tpu.memory_space<vmem>>, vector<36x36xf32>
    tpu.vector_store %arg16[%c0_26, %c108_27], %33 {strides = array<i32>} : memref<36x288xf32, #tpu.memory_space<vmem>>, vector<36x36xf32>,
    %35 = vector.extract_strided_slice %26 {offsets = [144, 0], sizes = [36, 36], strides = [1, 1]} : vector<288x36xf32> to vector<36x36xf32>
    %c0_28 = arith.constant 0 : index
    %c144 = arith.constant 144 : index
    %36 = vector.load %arg16[%c0_28, %c144] : memref<36x288xf32, #tpu.memory_space<vmem>>, vector<36x36xf32>
    tpu.vector_store %arg16[%c0_28, %c144], %35 {strides = array<i32>} : memref<36x288xf32, #tpu.memory_space<vmem>>, vector<36x36xf32>,
    %37 = vector.extract_strided_slice %26 {offsets = [180, 0], sizes = [36, 36], strides = [1, 1]} : vector<288x36xf32> to vector<36x36xf32>
    %c0_29 = arith.constant 0 : index
    %c180 = arith.constant 180 : index
    %38 = vector.load %arg16[%c0_29, %c180] : memref<36x288xf32, #tpu.memory_space<vmem>>, vector<36x36xf32>
    tpu.vector_store %arg16[%c0_29, %c180], %37 {strides = array<i32>} : memref<36x288xf32, #tpu.memory_space<vmem>>, vector<36x36xf32>,
    %39 = vector.extract_strided_slice %26 {offsets = [216, 0], sizes = [36, 36], strides = [1, 1]} : vector<288x36xf32> to vector<36x36xf32>
    %c0_30 = arith.constant 0 : index
    %c216 = arith.constant 216 : index
    %40 = vector.load %arg16[%c0_30, %c216] : memref<36x288xf32, #tpu.memory_space<vmem>>, vector<36x36xf32>
    tpu.vector_store %arg16[%c0_30, %c216], %39 {strides = array<i32>} : memref<36x288xf32, #tpu.memory_space<vmem>>, vector<36x36xf32>,
    %41 = vector.extract_strided_slice %26 {offsets = [252, 0], sizes = [36, 36], strides = [1, 1]} : vector<288x36xf32> to vector<36x36xf32>
    %c0_31 = arith.constant 0 : index
    %c252 = arith.constant 252 : index
    %42 = vector.load %arg16[%c0_31, %c252] : memref<36x288xf32, #tpu.memory_space<vmem>>, vector<36x36xf32>
    tpu.vector_store %arg16[%c0_31, %c252], %41 {strides = array<i32>} : memref<36x288xf32, #tpu.memory_space<vmem>>, vector<36x36xf32>,
    %c0_32 = arith.constant 0 : index
    %c0_33 = arith.constant 0 : index
    %43 = vector.load %arg16[%c0_32, %c0_33] : memref<36x288xf32, #tpu.memory_space<vmem>>, vector<36x288xf32>
    %44 = arith.truncf %43 : vector<36x288xf32> to vector<36x288xbf16>
    %c0_34 = arith.constant 0 : index
    %c0_35 = arith.constant 0 : index
    %45 = vector.load %arg6[%c0_34, %c0_35] : memref<288x288xbf16, #tpu.memory_space<vmem>>, vector<288x288xbf16>
    %cst_36 = arith.constant dense<0.000000e+00> : vector<36x288xf32>
    %46 = tpu.matmul %44, %45, %cst_36 {dimension_numbers = #tpu.dot_dimension_numbers<[1], [0], [0], [1], [0, 0, 1, 1], [], []>} : vector<36x288xbf16>, vector<288x288xbf16>, vector<36x288xf32> -> vector<36x288xf32>
    %c0_37 = arith.constant 0 : index
    %c0_38 = arith.constant 0 : index
    %47 = vector.load %arg7[%c0_37, %c0_38] : memref<1x288xf32, #tpu.memory_space<vmem>>, vector<1x288xf32>
    %48 = vector.broadcast %47 : vector<1x288xf32> to vector<36x288xf32>
    %49 = arith.addf %46, %48 : vector<36x288xf32>
    %cst_39 = arith.constant 0.000000e+00 : f32
    %50 = vector.broadcast %cst_39 : f32 to vector<36x288xf32>
    %51 = arith.maximumf %49, %50 : vector<36x288xf32>
    %52 = vector.extract_strided_slice %51 {offsets = [0, 0], sizes = [36, 36], strides = [1, 1]} : vector<36x288xf32> to vector<36x36xf32>
    %c0_40 = arith.constant 0 : index
    %c0_41 = arith.constant 0 : index
    %53 = vector.load %arg15[%c0_40, %c0_41] : memref<288x36xf32, #tpu.memory_space<vmem>>, vector<36x36xf32>
    tpu.vector_store %arg15[%c0_40, %c0_41], %52 {strides = array<i32>} : memref<288x36xf32, #tpu.memory_space<vmem>>, vector<36x36xf32>,
    %54 = vector.extract_strided_slice %51 {offsets = [0, 36], sizes = [36, 36], strides = [1, 1]} : vector<36x288xf32> to vector<36x36xf32>
    %c36_42 = arith.constant 36 : index
    %c0_43 = arith.constant 0 : index
    %55 = vector.load %arg15[%c36_42, %c0_43] : memref<288x36xf32, #tpu.memory_space<vmem>>, vector<36x36xf32>
    tpu.vector_store %arg15[%c36_42, %c0_43], %54 {strides = array<i32>} : memref<288x36xf32, #tpu.memory_space<vmem>>, vector<36x36xf32>,
    %56 = vector.extract_strided_slice %51 {offsets = [0, 72], sizes = [36, 36], strides = [1, 1]} : vector<36x288xf32> to vector<36x36xf32>
    %c72_44 = arith.constant 72 : index
    %c0_45 = arith.constant 0 : index
    %57 = vector.load %arg15[%c72_44, %c0_45] : memref<288x36xf32, #tpu.memory_space<vmem>>, vector<36x36xf32>
    tpu.vector_store %arg15[%c72_44, %c0_45], %56 {strides = array<i32>} : memref<288x36xf32, #tpu.memory_space<vmem>>, vector<36x36xf32>,
    %58 = vector.extract_strided_slice %51 {offsets = [0, 108], sizes = [36, 36], strides = [1, 1]} : vector<36x288xf32> to vector<36x36xf32>
    %c108_46 = arith.constant 108 : index
    %c0_47 = arith.constant 0 : index
    %59 = vector.load %arg15[%c108_46, %c0_47] : memref<288x36xf32, #tpu.memory_space<vmem>>, vector<36x36xf32>
    tpu.vector_store %arg15[%c108_46, %c0_47], %58 {strides = array<i32>} : memref<288x36xf32, #tpu.memory_space<vmem>>, vector<36x36xf32>,
    %60 = vector.extract_strided_slice %51 {offsets = [0, 144], sizes = [36, 36], strides = [1, 1]} : vector<36x288xf32> to vector<36x36xf32>
    %c144_48 = arith.constant 144 : index
    %c0_49 = arith.constant 0 : index
    %61 = vector.load %arg15[%c144_48, %c0_49] : memref<288x36xf32, #tpu.memory_space<vmem>>, vector<36x36xf32>
    tpu.vector_store %arg15[%c144_48, %c0_49], %60 {strides = array<i32>} : memref<288x36xf32, #tpu.memory_space<vmem>>, vector<36x36xf32>,
    %62 = vector.extract_strided_slice %51 {offsets = [0, 180], sizes = [36, 36], strides = [1, 1]} : vector<36x288xf32> to vector<36x36xf32>
    %c180_50 = arith.constant 180 : index
    %c0_51 = arith.constant 0 : index
    %63 = vector.load %arg15[%c180_50, %c0_51] : memref<288x36xf32, #tpu.memory_space<vmem>>, vector<36x36xf32>
    tpu.vector_store %arg15[%c180_50, %c0_51], %62 {strides = array<i32>} : memref<288x36xf32, #tpu.memory_space<vmem>>, vector<36x36xf32>,
    %64 = vector.extract_strided_slice %51 {offsets = [0, 216], sizes = [36, 36], strides = [1, 1]} : vector<36x288xf32> to vector<36x36xf32>
    %c216_52 = arith.constant 216 : index
    %c0_53 = arith.constant 0 : index
    %65 = vector.load %arg15[%c216_52, %c0_53] : memref<288x36xf32, #tpu.memory_space<vmem>>, vector<36x36xf32>
    tpu.vector_store %arg15[%c216_52, %c0_53], %64 {strides = array<i32>} : memref<288x36xf32, #tpu.memory_space<vmem>>, vector<36x36xf32>,
    %66 = vector.extract_strided_slice %51 {offsets = [0, 252], sizes = [36, 36], strides = [1, 1]} : vector<36x288xf32> to vector<36x36xf32>
    %c252_54 = arith.constant 252 : index
    %c0_55 = arith.constant 0 : index
    %67 = vector.load %arg15[%c252_54, %c0_55] : memref<288x36xf32, #tpu.memory_space<vmem>>, vector<36x36xf32>
    tpu.vector_store %arg15[%c252_54, %c0_55], %66 {strides = array<i32>} : memref<288x36xf32, #tpu.memory_space<vmem>>, vector<36x36xf32>,
    %c0_56 = arith.constant 0 : index
    %c0_57 = arith.constant 0 : index
    %68 = vector.load %arg15[%c0_56, %c0_57] : memref<288x36xf32, #tpu.memory_space<vmem>>, vector<288x36xf32>
    %c0_58 = arith.constant 0 : index
    %c0_59 = arith.constant 0 : index
    %69 = vector.load %arg8[%c0_58, %c0_59] : memref<288x288xbf16, #tpu.memory_space<vmem>>, vector<288x288xbf16>
    %70 = arith.truncf %68 : vector<288x36xf32> to vector<288x36xbf16>
    %cst_60 = arith.constant dense<0.000000e+00> : vector<288x36xf32>
    %71 = tpu.matmul %69, %70, %cst_60 {dimension_numbers = #tpu.dot_dimension_numbers<[1], [0], [0], [1], [0, 0, 1, 1], [], []>} : vector<288x288xbf16>, vector<288x36xbf16>, vector<288x36xf32> -> vector<288x36xf32>
    %c0_61 = arith.constant 0 : index
    %c0_62 = arith.constant 0 : index
    %72 = vector.load %arg9[%c0_61, %c0_62] : memref<288x1xf32, #tpu.memory_space<vmem>>, vector<288x1xf32>
    %73 = vector.broadcast %72 : vector<288x1xf32> to vector<288x36xf32>
    %74 = arith.addf %71, %73 : vector<288x36xf32>
    %cst_63 = arith.constant 0.000000e+00 : f32
    %75 = vector.broadcast %cst_63 : f32 to vector<288x36xf32>
    %76 = arith.maximumf %74, %75 : vector<288x36xf32>
    %77 = vector.extract_strided_slice %76 {offsets = [0, 0], sizes = [36, 36], strides = [1, 1]} : vector<288x36xf32> to vector<36x36xf32>
    %c0_64 = arith.constant 0 : index
    %c0_65 = arith.constant 0 : index
    %78 = vector.load %arg16[%c0_64, %c0_65] : memref<36x288xf32, #tpu.memory_space<vmem>>, vector<36x36xf32>
    tpu.vector_store %arg16[%c0_64, %c0_65], %77 {strides = array<i32>} : memref<36x288xf32, #tpu.memory_space<vmem>>, vector<36x36xf32>,
    %79 = vector.extract_strided_slice %76 {offsets = [36, 0], sizes = [36, 36], strides = [1, 1]} : vector<288x36xf32> to vector<36x36xf32>
    %c0_66 = arith.constant 0 : index
    %c36_67 = arith.constant 36 : index
    %80 = vector.load %arg16[%c0_66, %c36_67] : memref<36x288xf32, #tpu.memory_space<vmem>>, vector<36x36xf32>
    tpu.vector_store %arg16[%c0_66, %c36_67], %79 {strides = array<i32>} : memref<36x288xf32, #tpu.memory_space<vmem>>, vector<36x36xf32>,
    %81 = vector.extract_strided_slice %76 {offsets = [72, 0], sizes = [36, 36], strides = [1, 1]} : vector<288x36xf32> to vector<36x36xf32>
    %c0_68 = arith.constant 0 : index
    %c72_69 = arith.constant 72 : index
    %82 = vector.load %arg16[%c0_68, %c72_69] : memref<36x288xf32, #tpu.memory_space<vmem>>, vector<36x36xf32>
    tpu.vector_store %arg16[%c0_68, %c72_69], %81 {strides = array<i32>} : memref<36x288xf32, #tpu.memory_space<vmem>>, vector<36x36xf32>,
    %83 = vector.extract_strided_slice %76 {offsets = [108, 0], sizes = [36, 36], strides = [1, 1]} : vector<288x36xf32> to vector<36x36xf32>
    %c0_70 = arith.constant 0 : index
    %c108_71 = arith.constant 108 : index
    %84 = vector.load %arg16[%c0_70, %c108_71] : memref<36x288xf32, #tpu.memory_space<vmem>>, vector<36x36xf32>
    tpu.vector_store %arg16[%c0_70, %c108_71], %83 {strides = array<i32>} : memref<36x288xf32, #tpu.memory_space<vmem>>, vector<36x36xf32>,
    %85 = vector.extract_strided_slice %76 {offsets = [144, 0], sizes = [36, 36], strides = [1, 1]} : vector<288x36xf32> to vector<36x36xf32>
    %c0_72 = arith.constant 0 : index
    %c144_73 = arith.constant 144 : index
    %86 = vector.load %arg16[%c0_72, %c144_73] : memref<36x288xf32, #tpu.memory_space<vmem>>, vector<36x36xf32>
    tpu.vector_store %arg16[%c0_72, %c144_73], %85 {strides = array<i32>} : memref<36x288xf32, #tpu.memory_space<vmem>>, vector<36x36xf32>,
    %87 = vector.extract_strided_slice %76 {offsets = [180, 0], sizes = [36, 36], strides = [1, 1]} : vector<288x36xf32> to vector<36x36xf32>
    %c0_74 = arith.constant 0 : index
    %c180_75 = arith.constant 180 : index
    %88 = vector.load %arg16[%c0_74, %c180_75] : memref<36x288xf32, #tpu.memory_space<vmem>>, vector<36x36xf32>
    tpu.vector_store %arg16[%c0_74, %c180_75], %87 {strides = array<i32>} : memref<36x288xf32, #tpu.memory_space<vmem>>, vector<36x36xf32>,
    %89 = vector.extract_strided_slice %76 {offsets = [216, 0], sizes = [36, 36], strides = [1, 1]} : vector<288x36xf32> to vector<36x36xf32>
    %c0_76 = arith.constant 0 : index
    %c216_77 = arith.constant 216 : index
    %90 = vector.load %arg16[%c0_76, %c216_77] : memref<36x288xf32, #tpu.memory_space<vmem>>, vector<36x36xf32>
    tpu.vector_store %arg16[%c0_76, %c216_77], %89 {strides = array<i32>} : memref<36x288xf32, #tpu.memory_space<vmem>>, vector<36x36xf32>,
    %91 = vector.extract_strided_slice %76 {offsets = [252, 0], sizes = [36, 36], strides = [1, 1]} : vector<288x36xf32> to vector<36x36xf32>
    %c0_78 = arith.constant 0 : index
    %c252_79 = arith.constant 252 : index
    %92 = vector.load %arg16[%c0_78, %c252_79] : memref<36x288xf32, #tpu.memory_space<vmem>>, vector<36x36xf32>
    tpu.vector_store %arg16[%c0_78, %c252_79], %91 {strides = array<i32>} : memref<36x288xf32, #tpu.memory_space<vmem>>, vector<36x36xf32>,
    %c0_80 = arith.constant 0 : index
    %c0_81 = arith.constant 0 : index
    %93 = vector.load %arg16[%c0_80, %c0_81] : memref<36x288xf32, #tpu.memory_space<vmem>>, vector<36x288xf32>
    %94 = arith.truncf %93 : vector<36x288xf32> to vector<36x288xbf16>
    %c0_82 = arith.constant 0 : index
    %c0_83 = arith.constant 0 : index
    %95 = vector.load %arg10[%c0_82, %c0_83] : memref<288x288xbf16, #tpu.memory_space<vmem>>, vector<288x288xbf16>
    %cst_84 = arith.constant dense<0.000000e+00> : vector<36x288xf32>
    %96 = tpu.matmul %94, %95, %cst_84 {dimension_numbers = #tpu.dot_dimension_numbers<[1], [0], [0], [1], [0, 0, 1, 1], [], []>} : vector<36x288xbf16>, vector<288x288xbf16>, vector<36x288xf32> -> vector<36x288xf32>
    %c0_85 = arith.constant 0 : index
    %c0_86 = arith.constant 0 : index
    %97 = vector.load %arg11[%c0_85, %c0_86] : memref<1x288xf32, #tpu.memory_space<vmem>>, vector<1x288xf32>
    %98 = vector.broadcast %97 : vector<1x288xf32> to vector<36x288xf32>
    %99 = arith.addf %96, %98 : vector<36x288xf32>
    %cst_87 = arith.constant 0.000000e+00 : f32
    %100 = vector.broadcast %cst_87 : f32 to vector<36x288xf32>
    %101 = arith.maximumf %99, %100 : vector<36x288xf32>
    %102 = vector.extract_strided_slice %101 {offsets = [0, 0], sizes = [36, 36], strides = [1, 1]} : vector<36x288xf32> to vector<36x36xf32>
    %c0_88 = arith.constant 0 : index
    %c0_89 = arith.constant 0 : index
    %103 = vector.load %arg15[%c0_88, %c0_89] : memref<288x36xf32, #tpu.memory_space<vmem>>, vector<36x36xf32>
    tpu.vector_store %arg15[%c0_88, %c0_89], %102 {strides = array<i32>} : memref<288x36xf32, #tpu.memory_space<vmem>>, vector<36x36xf32>,
    %104 = vector.extract_strided_slice %101 {offsets = [0, 36], sizes = [36, 36], strides = [1, 1]} : vector<36x288xf32> to vector<36x36xf32>
    %c36_90 = arith.constant 36 : index
    %c0_91 = arith.constant 0 : index
    %105 = vector.load %arg15[%c36_90, %c0_91] : memref<288x36xf32, #tpu.memory_space<vmem>>, vector<36x36xf32>
    tpu.vector_store %arg15[%c36_90, %c0_91], %104 {strides = array<i32>} : memref<288x36xf32, #tpu.memory_space<vmem>>, vector<36x36xf32>,
    %106 = vector.extract_strided_slice %101 {offsets = [0, 72], sizes = [36, 36], strides = [1, 1]} : vector<36x288xf32> to vector<36x36xf32>
    %c72_92 = arith.constant 72 : index
    %c0_93 = arith.constant 0 : index
    %107 = vector.load %arg15[%c72_92, %c0_93] : memref<288x36xf32, #tpu.memory_space<vmem>>, vector<36x36xf32>
    tpu.vector_store %arg15[%c72_92, %c0_93], %106 {strides = array<i32>} : memref<288x36xf32, #tpu.memory_space<vmem>>, vector<36x36xf32>,
    %108 = vector.extract_strided_slice %101 {offsets = [0, 108], sizes = [36, 36], strides = [1, 1]} : vector<36x288xf32> to vector<36x36xf32>
    %c108_94 = arith.constant 108 : index
    %c0_95 = arith.constant 0 : index
    %109 = vector.load %arg15[%c108_94, %c0_95] : memref<288x36xf32, #tpu.memory_space<vmem>>, vector<36x36xf32>
    tpu.vector_store %arg15[%c108_94, %c0_95], %108 {strides = array<i32>} : memref<288x36xf32, #tpu.memory_space<vmem>>, vector<36x36xf32>,
    %110 = vector.extract_strided_slice %101 {offsets = [0, 144], sizes = [36, 36], strides = [1, 1]} : vector<36x288xf32> to vector<36x36xf32>
    %c144_96 = arith.constant 144 : index
    %c0_97 = arith.constant 0 : index
    %111 = vector.load %arg15[%c144_96, %c0_97] : memref<288x36xf32, #tpu.memory_space<vmem>>, vector<36x36xf32>
    tpu.vector_store %arg15[%c144_96, %c0_97], %110 {strides = array<i32>} : memref<288x36xf32, #tpu.memory_space<vmem>>, vector<36x36xf32>,
    %112 = vector.extract_strided_slice %101 {offsets = [0, 180], sizes = [36, 36], strides = [1, 1]} : vector<36x288xf32> to vector<36x36xf32>
    %c180_98 = arith.constant 180 : index
    %c0_99 = arith.constant 0 : index
    %113 = vector.load %arg15[%c180_98, %c0_99] : memref<288x36xf32, #tpu.memory_space<vmem>>, vector<36x36xf32>
    tpu.vector_store %arg15[%c180_98, %c0_99], %112 {strides = array<i32>} : memref<288x36xf32, #tpu.memory_space<vmem>>, vector<36x36xf32>,
    %114 = vector.extract_strided_slice %101 {offsets = [0, 216], sizes = [36, 36], strides = [1, 1]} : vector<36x288xf32> to vector<36x36xf32>
    %c216_100 = arith.constant 216 : index
    %c0_101 = arith.constant 0 : index
    %115 = vector.load %arg15[%c216_100, %c0_101] : memref<288x36xf32, #tpu.memory_space<vmem>>, vector<36x36xf32>
    tpu.vector_store %arg15[%c216_100, %c0_101], %114 {strides = array<i32>} : memref<288x36xf32, #tpu.memory_space<vmem>>, vector<36x36xf32>,
    %116 = vector.extract_strided_slice %101 {offsets = [0, 252], sizes = [36, 36], strides = [1, 1]} : vector<36x288xf32> to vector<36x36xf32>
    %c252_102 = arith.constant 252 : index
    %c0_103 = arith.constant 0 : index
    %117 = vector.load %arg15[%c252_102, %c0_103] : memref<288x36xf32, #tpu.memory_space<vmem>>, vector<36x36xf32>
    tpu.vector_store %arg15[%c252_102, %c0_103], %116 {strides = array<i32>} : memref<288x36xf32, #tpu.memory_space<vmem>>, vector<36x36xf32>,
    %c0_104 = arith.constant 0 : index
    %c0_105 = arith.constant 0 : index
    %118 = vector.load %arg15[%c0_104, %c0_105] : memref<288x36xf32, #tpu.memory_space<vmem>>, vector<288x36xf32>
    %c0_106 = arith.constant 0 : index
    %c0_107 = arith.constant 0 : index
    %119 = vector.load %arg12[%c0_106, %c0_107] : memref<144x288xbf16, #tpu.memory_space<vmem>>, vector<144x288xbf16>
    %120 = arith.truncf %118 : vector<288x36xf32> to vector<288x36xbf16>
    %cst_108 = arith.constant dense<0.000000e+00> : vector<144x36xf32>
    %121 = tpu.matmul %119, %120, %cst_108 {dimension_numbers = #tpu.dot_dimension_numbers<[1], [0], [0], [1], [0, 0, 1, 1], [], []>} : vector<144x288xbf16>, vector<288x36xbf16>, vector<144x36xf32> -> vector<144x36xf32>
    %c0_109 = arith.constant 0 : index
    %c0_110 = arith.constant 0 : index
    %122 = vector.load %arg13[%c0_109, %c0_110] : memref<144x1xf32, #tpu.memory_space<vmem>>, vector<144x1xf32>
    %123 = vector.broadcast %122 : vector<144x1xf32> to vector<144x36xf32>
    %124 = arith.addf %121, %123 : vector<144x36xf32>
    %cst_111 = arith.constant 0.000000e+00 : f32
    %125 = vector.broadcast %cst_111 : f32 to vector<144x36xf32>
    %126 = arith.maximumf %124, %125 : vector<144x36xf32>
    %127 = vector.extract_strided_slice %126 {offsets = [0, 0], sizes = [36, 36], strides = [1, 1]} : vector<144x36xf32> to vector<36x36xf32>
    %c0_112 = arith.constant 0 : index
    %c0_113 = arith.constant 0 : index
    %128 = vector.load %arg16[%c0_112, %c0_113] : memref<36x288xf32, #tpu.memory_space<vmem>>, vector<36x36xf32>
    tpu.vector_store %arg16[%c0_112, %c0_113], %127 {strides = array<i32>} : memref<36x288xf32, #tpu.memory_space<vmem>>, vector<36x36xf32>,
    %129 = vector.extract_strided_slice %126 {offsets = [36, 0], sizes = [36, 36], strides = [1, 1]} : vector<144x36xf32> to vector<36x36xf32>
    %c0_114 = arith.constant 0 : index
    %c36_115 = arith.constant 36 : index
    %130 = vector.load %arg16[%c0_114, %c36_115] : memref<36x288xf32, #tpu.memory_space<vmem>>, vector<36x36xf32>
    tpu.vector_store %arg16[%c0_114, %c36_115], %129 {strides = array<i32>} : memref<36x288xf32, #tpu.memory_space<vmem>>, vector<36x36xf32>,
    %131 = vector.extract_strided_slice %126 {offsets = [72, 0], sizes = [36, 36], strides = [1, 1]} : vector<144x36xf32> to vector<36x36xf32>
    %c0_116 = arith.constant 0 : index
    %c72_117 = arith.constant 72 : index
    %132 = vector.load %arg16[%c0_116, %c72_117] : memref<36x288xf32, #tpu.memory_space<vmem>>, vector<36x36xf32>
    tpu.vector_store %arg16[%c0_116, %c72_117], %131 {strides = array<i32>} : memref<36x288xf32, #tpu.memory_space<vmem>>, vector<36x36xf32>,
    %133 = vector.extract_strided_slice %126 {offsets = [108, 0], sizes = [36, 36], strides = [1, 1]} : vector<144x36xf32> to vector<36x36xf32>
    %c0_118 = arith.constant 0 : index
    %c108_119 = arith.constant 108 : index
    %134 = vector.load %arg16[%c0_118, %c108_119] : memref<36x288xf32, #tpu.memory_space<vmem>>, vector<36x36xf32>
    tpu.vector_store %arg16[%c0_118, %c108_119], %133 {strides = array<i32>} : memref<36x288xf32, #tpu.memory_space<vmem>>, vector<36x36xf32>,
    %c0_120 = arith.constant 0 : index
    %c0_121 = arith.constant 0 : index
    %135 = vector.load %arg16[%c0_120, %c0_121] : memref<36x288xf32, #tpu.memory_space<vmem>>, vector<36x144xf32>
    %c0_122 = arith.constant 0 : index
    %c0_123 = arith.constant 0 : index
    %c0_124 = arith.constant 0 : index
    %136 = vector.load %arg14[%c0_122, %c0_123, %c0_124] : memref<1x36x144xf32, #tpu.memory_space<vmem>>, vector<1x36x144xf32>
    %137 = vector.shape_cast %136 : vector<1x36x144xf32> to vector<36x144xf32>
    %138 = vector.shape_cast %135 : vector<36x144xf32> to vector<1x36x144xf32>
    tpu.vector_store %arg14[%c0_122, %c0_123, %c0_124], %138 {strides = array<i32>} : memref<1x36x144xf32, #tpu.memory_space<vmem>>, vector<1x36x144xf32>,
    return
  }
  func.func @transform_0(%arg0: i32) -> (i32, i32, i32) {
    %c0_i32 = arith.constant 0 : i32
    %c0_i32_0 = arith.constant 0 : i32
    %c0_i32_1 = arith.constant 0 : i32
    return %arg0, %c0_i32, %c0_i32_0 : i32, i32, i32
  }
  func.func @transform_1(%arg0: i32) -> (i32, i32) {
    %c0_i32 = arith.constant 0 : i32
    %c0_i32_0 = arith.constant 0 : i32
    %c0_i32_1 = arith.constant 0 : i32
    return %c0_i32, %c0_i32_0 : i32, i32
  }
  func.func @transform_2(%arg0: i32) -> (i32, i32) {
    %c0_i32 = arith.constant 0 : i32
    %c0_i32_0 = arith.constant 0 : i32
    %c0_i32_1 = arith.constant 0 : i32
    return %c0_i32, %c0_i32_0 : i32, i32
  }
  func.func @transform_3(%arg0: i32) -> (i32, i32) {
    %c0_i32 = arith.constant 0 : i32
    %c0_i32_0 = arith.constant 0 : i32
    %c0_i32_1 = arith.constant 0 : i32
    return %c0_i32, %c0_i32_0 : i32, i32
  }
  func.func @transform_4(%arg0: i32) -> (i32, i32) {
    %c0_i32 = arith.constant 0 : i32
    %c0_i32_0 = arith.constant 0 : i32
    %c0_i32_1 = arith.constant 0 : i32
    return %c0_i32, %c0_i32_0 : i32, i32
  }
  func.func @transform_5(%arg0: i32) -> (i32, i32) {
    %c0_i32 = arith.constant 0 : i32
    %c0_i32_0 = arith.constant 0 : i32
    %c0_i32_1 = arith.constant 0 : i32
    return %c0_i32, %c0_i32_0 : i32, i32
  }
  func.func @transform_6(%arg0: i32) -> (i32, i32) {
    %c0_i32 = arith.constant 0 : i32
    %c0_i32_0 = arith.constant 0 : i32
    %c0_i32_1 = arith.constant 0 : i32
    return %c0_i32, %c0_i32_0 : i32, i32
  }
  func.func @transform_7(%arg0: i32) -> (i32, i32) {
    %c0_i32 = arith.constant 0 : i32
    %c0_i32_0 = arith.constant 0 : i32
    %c0_i32_1 = arith.constant 0 : i32
    return %c0_i32, %c0_i32_0 : i32, i32
  }
  func.func @transform_8(%arg0: i32) -> (i32, i32) {
    %c0_i32 = arith.constant 0 : i32
    %c0_i32_0 = arith.constant 0 : i32
    %c0_i32_1 = arith.constant 0 : i32
    return %c0_i32, %c0_i32_0 : i32, i32
  }
  func.func @transform_9(%arg0: i32) -> (i32, i32) {
    %c0_i32 = arith.constant 0 : i32
    %c0_i32_0 = arith.constant 0 : i32
    %c0_i32_1 = arith.constant 0 : i32
    return %c0_i32, %c0_i32_0 : i32, i32
  }
  func.func @transform_10(%arg0: i32) -> (i32, i32) {
    %c0_i32 = arith.constant 0 : i32
    %c0_i32_0 = arith.constant 0 : i32
    %c0_i32_1 = arith.constant 0 : i32
    return %c0_i32, %c0_i32_0 : i32, i32
  }
  func.func @transform_11(%arg0: i32) -> (i32, i32) {
    %c0_i32 = arith.constant 0 : i32
    %c0_i32_0 = arith.constant 0 : i32
    %c0_i32_1 = arith.constant 0 : i32
    return %c0_i32, %c0_i32_0 : i32, i32
  }
  func.func @transform_12(%arg0: i32) -> (i32, i32) {
    %c0_i32 = arith.constant 0 : i32
    %c0_i32_0 = arith.constant 0 : i32
    %c0_i32_1 = arith.constant 0 : i32
    return %c0_i32, %c0_i32_0 : i32, i32
  }
  func.func @transform_13(%arg0: i32) -> (i32, i32, i32) {
    %c0_i32 = arith.constant 0 : i32
    %c0_i32_0 = arith.constant 0 : i32
    %c0_i32_1 = arith.constant 0 : i32
    return %arg0, %c0_i32, %c0_i32_0 : i32, i32, i32
  }
}

</mosaic_0001>

<bundles_post_ra>
// kernel: conv4ds_forward.1
= control target key start
LH: loop header
LB: loop body
LE: loop exit
PB: predicated region body
PF: predicated region fallthrough
CT: control target
= control target key end

     0   :  { %s6727_s25 = smov 0   ;;  %s9621_s0 = inlined_call_operand.vmem [shape: f32[2,36,144], index: 0, kind: input, shape index: {}]   ;;  %s9622_s1 = inlined_call_operand.vmem [shape: bf16[144,144], index: 1, kind: input, shape index: {}]   ;;  %s9623_s2 = inlined_call_operand.vmem [shape: f32[1,144], index: 2, kind: input, shape index: {}]   ;;  %s9624_s3 = inlined_call_operand.vmem [shape: bf16[288,144], index: 3, kind: input, shape index: {}]   ;;  %s9625_s4 = inlined_call_operand.vmem [shape: f32[288,1], index: 4, kind: input, shape index: {}]   ;;  %s9626_s5 = inlined_call_operand.vmem [shape: bf16[288,288], index: 5, kind: input, shape index: {}]   ;;  %s9627_s6 = inlined_call_operand.vmem [shape: f32[1,288], index: 6, kind: input, shape index: {}]   ;;  %s9628_s7 = inlined_call_operand.vmem [shape: bf16[288,288], index: 7, kind: input, shape index: {}]   ;;  %s9629_s8 = inlined_call_operand.vmem [shape: f32[288,1], index: 8, kind: input, shape index: {}]   ;;  %s9630_s9 = inlined_call_operand.vmem [shape: bf16[288,288], index: 9, kind: input, shape index: {}]   ;;  %s9631_s10 = inlined_call_operand.vmem [shape: f32[1,288], index: 10, kind: input, shape index: {}]   ;;  %s9632_s11 = inlined_call_operand.vmem [shape: bf16[144,288], index: 11, kind: input, shape index: {}]   ;;  %s9633_s12 = inlined_call_operand.vmem [shape: f32[144,1], index: 12, kind: input, shape index: {}]   ;;  %s9634_s13 = inlined_call_operand.vmem [shape: f32[2,36,144], index: 13, kind: output, shape index: {}]  }
   0x1 LB: > { %s5313_s26 = sadd.s32 4294967295, %s6640_s25   ;;  %p5317_p0 = scmp.ge.s32.totalorder %s6640_s25, 1  ;;  %s6640_s25 = sphi %s6727_s25, %s23_s25  }
   0x2   : > { %p387_p1 = scmp.lt.s32.totalorder %s6640_s25, 3 }
   0x4   : > { %p388_p2 = pnand %p5317_p0, %p387_p1 }
   0x5   : > { %p431_p3 = scmp.lt.s32.totalorder (!%p388_p2), %s5313_s26, 1  ;;  %s9667_s18 = smov (!%p388_p2), 20  }
   0x6   : > { %391 = sbr.rel (%p388_p2) target bundleno = 2838 (0xb16), region = 72  ;;  %s6643_s19 = smov (!%p388_p2), 56  }
   0x7   : > { %s6644_s20 = smov (!%p388_p2), 92   ;;  %s9661_s27 = smov (!%p388_p2), 36  }
   0x8   : > { %s9640_s17 = smov (!%p388_p2), 72   ;;  %s9636_s24 = smov (!%p388_p2), 108  }
   0x9   : > { %s9646_s16 = smov (!%p388_p2), 16   ;;  %s9638_s29 = smov (!%p388_p2), 52  }
   0xa   : > { %s9663_s28 = smov (!%p388_p2), 4   ;;  %s9659_s30 = smov (!%p388_p2), 40  }
   0xb   : > { %v5378_v0 = vld [vmem:[%s9622_s1 + $0x70] sm:$0xf]  ;;  %v6378_v1 = vld [vmem:[%s9622_s1 + $0x74] sm:$0xf0]  ;;  %v5370_v2 = vld [vmem:[%s9622_s1 + $0x60] sm:$0xf] }
   0xc   : > { %v5379_v3 = vor.u32 %v6378_v1, %v5378_v0  ;;  %v6376_v4 = vld [vmem:[%s9622_s1 + $0x64] sm:$0xf0]  ;;  %v5362_v6 = vld [vmem:[%s9622_s1 + $0x50] sm:$0xf]  ;;  %v6374_v7 = vld [vmem:[%s9622_s1 + $0x54] sm:$0xf0] }
   0xd   : > { %v5371_v5 = vor.u32 %v6376_v4, %v5370_v2  ;;  %v5363_v8 = vor.u32 %v6374_v7, %v5362_v6  ;;  %v5354_v9 = vld [vmem:[%s9622_s1 + $0x40] sm:$0xf]  ;;  %v6372_v10 = vld [vmem:[%s9622_s1 + $0x44] sm:$0xf0]  ;;  %v5346_v12 = vld [vmem:[%s9622_s1 + $0x30] sm:$0xf] }
   0xe   : > { %582 = vmatpush.bf16.msra.mxu2 %v5379_v3  ;;  %v5355_v11 = vor.u32 %v6372_v10, %v5354_v9  ;;  %v6370_v13 = vld [vmem:[%s9622_s1 + $0x34] sm:$0xf0]  ;;  %v5338_v15 = vld [vmem:[%s9622_s1 + $0x20] sm:$0xf]  ;;  %v6368_v16 = vld [vmem:[%s9622_s1 + $0x24] sm:$0xf0] }
   0xf   : > { %v5347_v14 = vor.u32 %v6370_v13, %v5346_v12  ;;  %s9712_s26 = smov (!%p431_p3, %s5313_s26), 1  ;;  %v5339_v17 = vor.u32 %v6368_v16, %v5338_v15  ;;  %v5330_v18 = vld [vmem:[%s9622_s1 + $0x10] sm:$0xf]  ;;  %v6366_v19 = vld [vmem:[%s9622_s1 + $0x14] sm:$0xf0]  ;;  %vm9665_vm0 = vcmask 130048  }
  0x10   : > { %s9635_s23 = smul.u32 80, %s9712_s26  ;;  %v5331_v20 = vor.u32 %v6366_v19, %v5330_v18  ;;  %v5322_v21 = vld [vmem:[%s9622_s1] sm:$0xf]  ;;  %v6364_v22 = vld [vmem:[%s9622_s1 + $0x4] sm:$0xf0]  ;;  %vm684_vm1 = vcmask 293888  }
  0x11   : > { %v5323_v23 = vor.u32 %v6364_v22, %v5322_v21  ;;  %v5386_v27 = vld [vmem:[%s9622_s1 + $0x80] sm:$0xf]  ;;  %v6380_v28 = vld [vmem:[%s9622_s1 + $0x84] sm:$0xf0]  ;;  %v6377_v35 = vld [vmem:[%s9622_s1 + $0x74] sm:$0xf] }
  0x12   : > { %583 = vmatpush.bf16.msra.mxu2 %v5371_v5  ;;  %s6791_s15 = scalar_lea.vmem %s9621_s0, %s9635_s23  ;;  %v5387_v29 = vor.u32 %v6380_v28, %v5386_v27  ;;  %v5380_v36 = vld [vmem:[%s9622_s1 + $0x78] sm:$0xf0]  ;;  %v6375_v38 = vld [vmem:[%s9622_s1 + $0x64] sm:$0xf]  ;;  %v5372_v39 = vld [vmem:[%s9622_s1 + $0x68] sm:$0xf0] }
  0x13   : > { %v442_v24 = vld [vmem:[%s6791_s15] sm:$0xff]  ;;  %v444_v25 = vld [vmem:[%s6791_s15 + $0x10] sm:$0xff]  ;;  %v5383_v37 = vor.u32 %v6377_v35, %v5380_v36  ;;  %v5375_v40 = vor.u32 %v6375_v38, %v5372_v39  ;;  %v5364_v42 = vld [vmem:[%s9622_s1 + $0x58] sm:$0xf0]  ;;  %vm689_vm2 = vcmask 289792   ;;  %vm761_vm3 = vcmask 162816  }
  0x14   : > { %v6795_v26 = vpack.c.bf16 %v444_v25, %v442_v24  ;;  %v446_v30 = vld [vmem:[%s6791_s15 + $0x20] sm:$0xff]  ;;  %v448_v31 = vld [vmem:[%s6791_s15 + $0x30] sm:$0xff]  ;;  %v5356_v45 = vld [vmem:[%s9622_s1 + $0x48] sm:$0xf0]  ;;  %vm1516_vm4 = vcmask 1043456   ;;  %vm1541_vm5 = vcmask 589088  }
  0x15   : > { %v454_v32 = vpack.c.bf16 %v448_v31, %v446_v30  ;;  %v450_v33 = vld [vmem:[%s6791_s15 + $0x40] sm:$0xf]  ;;  %v6373_v41 = vld [vmem:[%s9622_s1 + $0x54] sm:$0xf]  ;;  %v6371_v44 = vld [vmem:[%s9622_s1 + $0x44] sm:$0xf] }
  0x16   : > { %584 = vmatpush.bf16.msra.mxu2 %v5363_v8  ;;  %v456_v34 = vpack.c.bf16 %v450_v33, %v450_v33  ;;  %v5367_v43 = vor.u32 %v6373_v41, %v5364_v42  ;;  %v443_v46 = vld [vmem:[%s6791_s15 + $0x8] sm:$0xff]  ;;  %v445_v47 = vld [vmem:[%s6791_s15 + $0x18] sm:$0xff]  ;;  %v5359_v48 = vor.u32 %v6371_v44, %v5356_v45  ;;  %v6369_v50 = vld [vmem:[%s9622_s1 + $0x34] sm:$0xf]  ;;  %vm1568_vm6 = vcmask 884288   ;;  %s9644_s23 = smov 88  }
  0x17   : > { %v453_v49 = vpack.c.bf16 %v445_v47, %v443_v46  ;;  %v5348_v51 = vld [vmem:[%s9622_s1 + $0x38] sm:$0xf0]  ;;  %v6367_v53 = vld [vmem:[%s9622_s1 + $0x24] sm:$0xf]  ;;  %v5340_v54 = vld [vmem:[%s9622_s1 + $0x28] sm:$0xf0] }
  0x18   : > { %v5351_v52 = vor.u32 %v6369_v50, %v5348_v51  ;;  %v5343_v55 = vor.u32 %v6367_v53, %v5340_v54  ;;  %v6365_v56 = vld [vmem:[%s9622_s1 + $0x14] sm:$0xf]  ;;  %v5332_v57 = vld [vmem:[%s9622_s1 + $0x18] sm:$0xf0]  ;;  %v6379_v58 = vld [vmem:[%s9622_s1 + $0x84] sm:$0xf] }
  0x19   : > { %v5388_v59 = vld [vmem:[%s9622_s1 + $0x88] sm:$0xf0]  ;;  %v451_v61 = vld [vmem:[%s6791_s15 + $0x48] sm:$0xf]  ;;  %v5335_v62 = vor.u32 %v6365_v56, %v5332_v57  ;;  %v6363_v63 = vld [vmem:[%s9622_s1 + $0x4] sm:$0xf] }
  0x1a   : > { %585 = vmatpush.bf16.msra.mxu2 %v5355_v11  ;;  %v5391_v60 = vor.u32 %v6379_v58, %v5388_v59  ;;  %v5324_v0 = vld [vmem:[%s9622_s1 + $0x8] sm:$0xf0]  ;;  %v457_v1 = vpack.c.bf16 %v451_v61, %v451_v61  ;;  %v449_v3 = vld [vmem:[%s6791_s15 + $0x38] sm:$0xff]  ;;  %v476_v11 = vld [vmem:[%s9623_s2] sm:$0x3]  ;;  %vm1614_vm7 = vcmask 125952  }
  0x1b   : > { %v447_v2 = vld [vmem:[%s6791_s15 + $0x28] sm:$0xff]  ;;  %v5327_v4 = vor.u32 %v6363_v63, %v5324_v0  ;;  %v478_v13 = vperm.slane %v476_v11, 0  ;;  %v479_v36 = vperm.slane %v476_v11, 1  ;;  %vm9666_vm8 = vcmask 1048416   ;;  %s9657_s14 = smov 76   ;;  %s9654_s15 = smov 112  }
  0x1c   : > { %658 = vmatpush.bf16.msra.mxu0 %v5391_v60  ;;  %6606 = vmatpush.bf16.msra.mxu3 %v5391_v60  ;;  %v455_v5 = vpack.c.bf16 %v449_v3, %v447_v2  ;;  %v846_v3 = vld [vmem:[%s9625_s4 + $0x30] sm:$0xff]  ;;  %vm1546_vm9 = vcmask 584992   ;;  %vm9653_vm10 = vcmask 880192   ;;  %vm9648_vm11 = vcmask 1044320   ;;  %s9672_s21 = smov 52   ;;  %s9694_s22 = smov 112  }
  0x1d   : > { %vm1636_vm12 = vcmask 425088   ;;  %vm9651_vm13 = vcmask 720288   ;;  %vm9649_vm14 = vcmask 1015488   ;;  %vm1735_vm15 = vcmask 261120  }
  0x1e   : > { %586 = vmatpush.bf16.msra.mxu2 %v5347_v14 }
  0x1f   : > { %5395 = vmatmul.msk.bf16.vlgmr.msra.gmra.mxu0 %vm9665_vm0, %v453_v49  ;;  %5397 = vmatmul.msk.bf16.vlgmr.msra.gmra.mxu3 %vm9665_vm0, %v457_v1 }
  0x22   : > { %587 = vmatpush.bf16.msra.mxu2 %v5339_v17 }
  0x26   : > { %588 = vmatpush.bf16.msra.mxu2 %v5331_v20 }
  0x2a   : > { %589 = vmatpush.bf16.msra.mxu2 %v5323_v23 }
  0x2d   : > { %590 = vmatmul.bf16.vlgmr.msra.gmra.mxu2 %v6795_v26 }
  0x2e   : > { %612 = vmatpush.bf16.msrb.mxu2 %v5387_v29 }
  0x2f   : > { %5396 = vmatmul.msk.bf16.gmra.mxu0 %vm9665_vm0, %v455_v5 }
  0x32   : > { %628 = vmatpush.bf16.msra.mxu2 %v5383_v37 }
  0x36   : > { %629 = vmatpush.bf16.msra.mxu2 %v5375_v40 }
  0x3a   : > { %630 = vmatpush.bf16.msra.mxu2 %v5367_v43 }
  0x3d   : > { %595 = vmatmul.bf16.gmra.mxu2 %v454_v32 }
  0x3e   : > { %631 = vmatpush.bf16.msra.mxu2 %v5359_v48 }
  0x42   : > { %632 = vmatpush.bf16.msra.mxu2 %v5351_v52 }
  0x46   : > { %633 = vmatpush.bf16.msra.mxu2 %v5343_v55 }
  0x4a   : > { %634 = vmatpush.bf16.msra.mxu2 %v5335_v62 }
  0x4d   : > { %600 = vmatmul.bf16.gmra.mxu2 %v456_v34 }
  0x4e   : > { %635 = vmatpush.bf16.msra.mxu2 %v5327_v4  ;;  %v6645_v4 = vmov 0  }
  0x4f   : > { %6633 = vset.pattern.permute.xlu1 %v6645_v4  ;;  %6632 = vset.pattern.permute.xlu0 %v6645_v4 }
  0x50   : > { %6631 = vset.pattern.permute.xlu2 %v6645_v4 }
  0x5d   : > { %5392 = vmatmul.msk.bf16.vlgmr.msrb.gmra.mxu2 %vm9665_vm0, %v453_v49 }
  0x6d   : > { %5393 = vmatmul.msk.bf16.gmra.mxu2 %vm9665_vm0, %v455_v5 }
  0x7d   : > { %5394 = vmatmul.msk.bf16.gmra.mxu2 %vm9665_vm0, %v457_v1 }
  0x8d   : > { %636 = vmatmul.bf16.vlgmr.msra.gmra.mxu2 %v6795_v26 }
  0x9c   : > { %v660_v37 = vpop.f32.mrf.mxu0 }
  0x9d   : > { %641 = vmatmul.bf16.gmra.mxu2 %v454_v32 }
  0xa2   : > { %v670_v35 = vpop.f32.mrf.mxu3 }
  0xa4   : > { %v662_v43 = vpop.f32.mrf.mxu0 }
  0xaa   : > { %v672_v41 = vpop.f32.mrf.mxu3 }
  0xac   : > { %v665_v49 = vpop.f32.mrf.mxu0 }
  0xad   : > { %646 = vmatmul.bf16.gmra.mxu2 %v456_v34 }
  0xb0   : > { %v591_v6 = vpop.f32.mrf.mxu2 }
  0xb1   : > { %v592_v14 = vadd.f32 %v591_v6, %v478_v13 }
  0xb4   : > { %v667_v59 = vpop.f32.mrf.mxu0 }
  0xb8   : > { %v593_v7 = vpop.f32.mrf.mxu2 }
  0xb9   : > { %v594_v18 = vadd.f32 %v593_v7, %v478_v13  ;;  %v854_v7 = vld [vmem:[%s9625_s4 + $0x70] sm:$0xff] }
  0xc0   : > { %v596_v8 = vpop.f32.mrf.mxu2 }
  0xc1   : > { %v597_v22 = vadd.f32 %v596_v8, %v478_v13 }
  0xc8   : > { %v598_v9 = vpop.f32.mrf.mxu2 }
  0xc9   : > { %v599_v26 = vadd.f32 %v598_v9, %v478_v13 }
  0xd0   : > { %v601_v10 = vpop.f32.mrf.mxu2 }
  0xd1   : > { %v602_v30 = vadd.f32 %v601_v10, %v478_v13  ;;  %v850_v10 = vld [vmem:[%s9625_s4 + $0x50] sm:$0xff]  ;;  %v844_v13 = vld [vmem:[%s9625_s4 + $0x20] sm:$0xff] }
  0xd8   : > { %v603_v12 = vpop.f32.mrf.mxu2 }
  0xe0   : > { %v614_v15 = vpop.f32.mrf.mxu2 }
  0xe1   : > { %v615_v16 = vadd.f32 %v614_v15, %v592_v14  ;;  %v856_v14 = vld [vmem:[%s9625_s4 + $0x80] sm:$0xff]  ;;  %v845_v15 = vld [vmem:[%s9625_s4 + $0x28] sm:$0xff] }
  0xe3   : > { %v674_v17 = vmax.f32 %v615_v16, 0.0 }
  0xe5   : > { %685 = vst.msk [vmem:[#allocation2] sm:$0xff] %vm684_vm1, %v674_v17  ;;  %741 = vrot.lane.b32.xlu0 %v674_v17, %s9667_s18 }
  0xe8   : > { %v616_v19 = vpop.f32.mrf.mxu2 }
  0xe9   : > { %v617_v20 = vadd.f32 %v616_v19, %v594_v18  ;;  %v853_v19 = vld [vmem:[%s9625_s4 + $0x68] sm:$0xff] }
  0xeb   : > { %v676_v21 = vmax.f32 %v617_v20, 0.0  ;;  %v852_v20 = vld [vmem:[%s9625_s4 + $0x60] sm:$0xff] }
  0xed   : > { %686 = vst.msk [vmem:[#allocation2 + $0x8] sm:$0xff] %vm684_vm1, %v676_v21  ;;  %718 = vrot.lane.b32.xlu2 %v676_v21, %s6643_s19  ;;  %745 = vrot.lane.b32.xlu1 %v676_v21, %s9667_s18 }
  0xf0   : > { %v619_v23 = vpop.f32.mrf.mxu2 }
  0xf1   : > { %v620_v24 = vadd.f32 %v619_v23, %v597_v22 }
  0xf3   : > { %v678_v25 = vmax.f32 %v620_v24, 0.0 }
  0xf5   : > { %687 = vst.msk [vmem:[#allocation2 + $0x10] sm:$0xff] %vm684_vm1, %v678_v25  ;;  %749 = vrot.lane.b32.xlu2 %v678_v25, %s9667_s18  ;;  %720 = vrot.lane.b32.xlu0 %v678_v25, %s6643_s19 }
  0xf8   : > { %v621_v27 = vpop.f32.mrf.mxu2 }
  0xf9   : > { %v622_v28 = vadd.f32 %v621_v27, %v599_v26  ;;  %v855_v26 = vld [vmem:[%s9625_s4 + $0x78] sm:$0xff]  ;;  %v864_v27 = vld [vmem:[%s9625_s4 + $0xc0] sm:$0xff] }
  0xfb   : > { %v680_v29 = vmax.f32 %v622_v28, 0.0  ;;  %v848_v28 = vld [vmem:[%s9625_s4 + $0x40] sm:$0xff] }
  0xfd   : > { %688 = vst.msk [vmem:[#allocation2 + $0x18] sm:$0xff] %vm684_vm1, %v680_v29  ;;  %702 = vrot.lane.b32.xlu1 %v680_v29, %s6644_s20  ;;  %722 = vrot.lane.b32.xlu0 %v680_v29, %s6643_s19 }
 0x100   : > { %v624_v31 = vpop.f32.mrf.mxu2 }
 0x101   : > { %v625_v32 = vadd.f32 %v624_v31, %v602_v30 }
 0x103   : > { %v682_v33 = vmax.f32 %v625_v32, 0.0 }
 0x105   : > { %690 = vst.msk [vmem:[#allocation2 + $0x20] sm:$0xf] %vm689_vm2, %v682_v33  ;;  %724 = vrot.lane.b32.xlu1 %v682_v33, %s6643_s19 }
 0x108   : > { %v626_v34 = vpop.f32.mrf.mxu2 }
 0x110   : > { %v637_v38 = vpop.f32.mrf.mxu2 }
 0x111   : > { %v638_v39 = vadd.f32 %v637_v38, %v479_v36 }
 0x113   : > { %v661_v40 = vadd.f32 %v660_v37, %v638_v39  ;;  %v851_v37 = vld [vmem:[%s9625_s4 + $0x58] sm:$0xff] }
 0x115   : > { %v675_v42 = vmax.f32 %v661_v40, 0.0 }
 0x117   : > { %743 = vrot.lane.b32.xlu0 %v675_v42, %s9667_s18 }
 0x118   : > { %v639_v44 = vpop.f32.mrf.mxu2 }
 0x119   : > { %v640_v45 = vadd.f32 %v639_v44, %v479_v36 }
 0x11b   : > { %v663_v46 = vadd.f32 %v662_v43, %v640_v45 }
 0x11d   : > { %v677_v47 = vmax.f32 %v663_v46, 0.0  ;;  %v857_v46 = vld [vmem:[%s9625_s4 + $0x88] sm:$0xff] }
 0x11f   : > { %747 = vrot.lane.b32.xlu1 %v677_v47, %s9667_s18  ;;  %716 = vrot.lane.b32.xlu0 %v674_v17, %s6643_s19  ;;  %v872_v47 = vld [vmem:[%s9625_s4 + $0x100] sm:$0xff] }
 0x120   : > { %v642_v48 = vpop.f32.mrf.mxu2 }
 0x121   : > { %v643_v50 = vadd.f32 %v642_v48, %v479_v36 }
 0x123   : > { %v666_v51 = vadd.f32 %v665_v49, %v643_v50  ;;  %v863_v49 = vld [vmem:[%s9625_s4 + $0xb8] sm:$0xff] }
 0x125   : > { %v679_v52 = vmax.f32 %v666_v51, 0.0 }
 0x127   : > { %751 = vrot.lane.b32.xlu2 %v679_v52, %s9667_s18  ;;  %698 = vrot.lane.b32.xlu1 %v676_v21, %s6644_s20  ;;  %v849_v21 = vld [vmem:[%s9625_s4 + $0x48] sm:$0xff] }
 0x128   : > { %696 = vrot.lane.b32.xlu0 %v674_v17, %s6644_s20  ;;  %v644_v53 = vpop.f32.mrf.mxu2 }
 0x129   : > { %v645_v57 = vadd.f32 %v644_v53, %v479_v36 }
 0x12b   : > { %v668_v61 = vadd.f32 %v667_v59, %v645_v57 }
 0x12d   : > { %v681_v62 = vmax.f32 %v668_v61, 0.0  ;;  %v868_v61 = vld [vmem:[%s9625_s4 + $0xe0] sm:$0xff] }
 0x12f   : > { %704 = vrot.lane.b32.xlu2 %v682_v33, %s6644_s20  ;;  %753 = vrot.lane.b32.xlu1 %v680_v29, %s9667_s18 }
 0x130   : > { %757 = vrot.lane.b32.xlu0 %v682_v33, %s9667_s18  ;;  %v647_v54 = vpop.f32.mrf.mxu2 }
 0x131   : > { %v648_v55 = vadd.f32 %v647_v54, %v479_v36  ;;  %v858_v36 = vld [vmem:[%s9625_s4 + $0x90] sm:$0xff] }
 0x133   : > { %v671_v56 = vadd.f32 %v670_v35, %v648_v55  ;;  %v847_v35 = vld [vmem:[%s9625_s4 + $0x38] sm:$0xff] }
 0x135   : > { %v683_v58 = vmax.f32 %v671_v56, 0.0 }
 0x137   : > { %700 = vrot.lane.b32.xlu2 %v678_v25, %s6644_s20  ;;  %759 = vrot.lane.b32.xlu1 %v683_v58, %s9667_s18 }
 0x138   : > { %v649_v60 = vpop.f32.mrf.mxu2  ;;  %903 = vperm.xlu0 %6632, %v845_v15  }
 0x139   : > { %v862_v60 = vld [vmem:[%s9625_s4 + $0xb0] sm:$0xff] }
 0x13f   : > { %755 = vrot.lane.b32.xlu2 %v681_v62, %s9667_s18  ;;  %908 = vperm.xlu1 %6633, %v846_v3   ;;  %v841_v62 = vld [vmem:[%s9625_s4 + $0x8] sm:$0xff]  ;;  %v779_v3 = vld [vmem:[#allocation2 + $0x10] sm:$0xff] }
 0x140   : > { %923 = vperm.xlu0 %6632, %v849_v21  }
 0x147   : > { %v719_v63 = vpop.permute.xlu2 %718  ;;  %948 = vperm.xlu1 %6633, %v854_v7   ;;  %898 = vperm.xlu2 %6631, %v844_v13   ;;  %v6382_v13 = vld [vmem:[%s9624_s3 + $0x4] sm:$0xf0] }
 0x148   : > { %732 = vst.msk [vmem:[#allocation2 + $0x50] sm:$0xff] %vm684_vm1, %v719_v63  ;;  %918 = vperm.xlu0 %6632, %v848_v28   ;;  %v843_v28 = vld [vmem:[%s9625_s4 + $0x18] sm:$0xff] }
 0x14f   : > { %v750_v9 = vpop.permute.xlu2 %749  ;;  %928 = vperm.xlu1 %6633, %v850_v10   ;;  %943 = vperm.xlu2 %6631, %v853_v19   ;;  %v787_v44 = vld [vmem:[#allocation2 + $0x50] sm:$0xff]  ;;  %v5410_v19 = vld [vmem:[%s9624_s3 + $0x18] sm:$0xf0] }
 0x150   : > { %933 = vperm.xlu0 %6632, %v851_v37   ;;  %v6388_v37 = vld [vmem:[%s9624_s3 + $0x34] sm:$0xf0] }
 0x157   : > { %v742_v0 = vpop.permute.xlu0 %741  ;;  %958 = vperm.xlu1 %6633, %v856_v14   ;;  %953 = vperm.xlu2 %6631, %v855_v26   ;;  %v777_v14 = vld [vmem:[#allocation2] sm:$0xff] }
 0x158   : > { %993 = vperm.xlu0 %6632, %v863_v49   ;;  %v6385_v26 = vld [vmem:[%s9624_s3 + $0x24] sm:$0xf] }
 0x15f   : > { %v746_v1 = vpop.permute.xlu1 %745  ;;  %938 = vperm.xlu1 %6633, %v852_v20   ;;  %913 = vperm.xlu2 %6631, %v847_v35   ;;  %v873_v20 = vld [vmem:[%s9625_s4 + $0x108] sm:$0xff] }
 0x160   : > { %883 = vperm.xlu0 %6632, %v841_v62  }
 0x167   : > { %v721_v2 = vpop.permute.xlu0 %720  ;;  %998 = vperm.xlu1 %6633, %v864_v27   ;;  %963 = vperm.xlu2 %6631, %v857_v46   ;;  %v5418_v27 = vld [vmem:[%s9624_s3 + $0x28] sm:$0xf0] }
 0x168   : > { %733 = vst.msk [vmem:[#allocation2 + $0x58] sm:$0xff] %vm684_vm1, %v721_v2  ;;  %v5402_v2 = vld [vmem:[%s9624_s3 + $0x8] sm:$0xf0] }
 0x16f   : > { %v703_v5 = vpop.permute.xlu1 %702  ;;  %v723_v6 = vpop.permute.xlu0 %722  ;;  %968 = vperm.xlu1 %6633, %v858_v36   ;;  %v788_v40 = vld [vmem:[#allocation2 + $0x58] sm:$0xff]  ;;  %988 = vperm.xlu2 %6631, %v862_v60   ;;  %v5424_v36 = vld [vmem:[%s9624_s3 + $0x30] sm:$0xf]  ;;  %v6393_v60 = vld [vmem:[%s9624_s3 + $0x64] sm:$0xf] }
 0x170   : > { %714 = vst.msk [vmem:[#allocation2 + $0x3c] sm:$0xff] %vm684_vm1, %v703_v5  ;;  %v836_v45 = vpack.c.bf16 %v788_v40, %v787_v44  ;;  %v5432_v44 = vld [vmem:[%s9624_s3 + $0x40] sm:$0xf] }
 0x171   : > { %734 = vst.msk [vmem:[#allocation2 + $0x60] sm:$0xff] %vm684_vm1, %v723_v6 }
 0x177   : > { %v725_v8 = vpop.permute.xlu1 %724  ;;  %1038 = vperm.xlu1 %6633, %v872_v47  }
 0x178   : > { %735 = vst.msk [vmem:[#allocation2 + $0x68] sm:$0xf] %vm689_vm2, %v725_v8  ;;  %v789_v38 = vld [vmem:[#allocation2 + $0x60] sm:$0xff] }
 0x179   : > { %v840_v8 = vld [vmem:[%s9625_s4] sm:$0xff] }
 0x17a   : > { %878 = vperm.xlu2 %6631, %v840_v8   ;;  %v5458_v8 = vld [vmem:[%s9624_s3 + $0x78] sm:$0xf0] }
 0x17f   : > { %1018 = vperm.xlu1 %6633, %v868_v61   ;;  %v5450_v61 = vld [vmem:[%s9624_s3 + $0x68] sm:$0xf0] }
 0x181   : > { %v752_v11 = vpop.permute.xlu2 %751 }
 0x182   : > { %v764_v12 = vsel %vm761_vm3, %v750_v9, %v752_v11  ;;  %v842_v9 = vld [vmem:[%s9625_s4 + $0x10] sm:$0xff]  ;;  %v778_v11 = vld [vmem:[#allocation2 + $0x8] sm:$0xff] }
 0x183   : > { %774 = vst.msk [vmem:[#allocation2 + $0x7c] sm:$0xff] %vm684_vm1, %v764_v12  ;;  %v5400_v12 = vld [vmem:[%s9624_s3] sm:$0xf]  ;;  %v831_v15 = vpack.c.bf16 %v778_v11, %v777_v14  ;;  %v5456_v11 = vld [vmem:[%s9624_s3 + $0x70] sm:$0xf] }
 0x187   : > { %888 = vperm.xlu1 %6633, %v842_v9  }
 0x189   : > { %v705_v16 = vpop.permute.xlu2 %704  ;;  %v744_v17 = vpop.permute.xlu0 %743 }
 0x18a   : > { %715 = vst.msk [vmem:[#allocation2 + $0x44] sm:$0xf] %vm689_vm2, %v705_v16  ;;  %v762_v18 = vsel %vm761_vm3, %v742_v0, %v744_v17  ;;  %v780_v0 = vld [vmem:[#allocation2 + $0x18] sm:$0xff]  ;;  %v5401_v16 = vor.u32 %v6382_v13, %v5400_v12 }
 0x18b   : > { %772 = vst.msk [vmem:[#allocation2 + $0x6c] sm:$0xff] %vm684_vm1, %v762_v18  ;;  %v832_v6 = vpack.c.bf16 %v780_v0, %v779_v3  ;;  %v859_v17 = vld [vmem:[%s9625_s4 + $0x98] sm:$0xff]  ;;  %v6383_v18 = vld [vmem:[%s9624_s3 + $0x14] sm:$0xf]  ;;  %v5448_v0 = vld [vmem:[%s9624_s3 + $0x60] sm:$0xf] }
 0x18c   : > { %973 = vperm.xlu2 %6631, %v859_v17   ;;  %v5413_v21 = vor.u32 %v6383_v18, %v5410_v19  ;;  %v6396_v12 = vld [vmem:[%s9624_s3 + $0x74] sm:$0xf0]  ;;  %v6397_v18 = vld [vmem:[%s9624_s3 + $0x84] sm:$0xf]  ;;  %v5466_v19 = vld [vmem:[%s9624_s3 + $0x88] sm:$0xf0] }
 0x18d   : > { %v5457_v14 = vor.u32 %v6396_v12, %v5456_v11  ;;  %v861_v11 = vld [vmem:[%s9625_s4 + $0xa8] sm:$0xff] }
 0x18f   : > { %983 = vperm.xlu1 %6633, %v861_v11  }
 0x191   : > { %v701_v22 = vpop.permute.xlu2 %700  ;;  %v748_v23 = vpop.permute.xlu1 %747  ;;  %v785_v50 = vld [vmem:[#allocation2 + $0x40] sm:$0xff] }
 0x192   : > { %713 = vst.msk [vmem:[#allocation2 + $0x34] sm:$0xff] %vm684_vm1, %v701_v22  ;;  %v763_v24 = vsel %vm761_vm3, %v746_v1, %v748_v23  ;;  %v717_v25 = vpop.permute.xlu0 %716  ;;  %v790_v34 = vld [vmem:[#allocation2 + $0x68] sm:$0xff]  ;;  %v6381_v1 = vld [vmem:[%s9624_s3 + $0x4] sm:$0xf]  ;;  %v5408_v22 = vld [vmem:[%s9624_s3 + $0x10] sm:$0xf] }
 0x193   : > { %773 = vst.msk [vmem:[#allocation2 + $0x74] sm:$0xff] %vm684_vm1, %v763_v24  ;;  %v837_v39 = vpack.c.bf16 %v790_v34, %v789_v38  ;;  %v5405_v10 = vor.u32 %v6381_v1, %v5402_v2  ;;  %v6384_v23 = vld [vmem:[%s9624_s3 + $0x14] sm:$0xf0]  ;;  %v5426_v34 = vld [vmem:[%s9624_s3 + $0x38] sm:$0xf0]  ;;  %v5425_v38 = vor.u32 %v6388_v37, %v5424_v36 }
 0x194   : > { %731 = vst.msk [vmem:[#allocation2 + $0x48] sm:$0xff] %vm684_vm1, %v717_v25  ;;  %1043 = vperm.xlu2 %6631, %v873_v20   ;;  %v5409_v24 = vor.u32 %v6384_v23, %v5408_v22  ;;  %v865_v25 = vld [vmem:[%s9625_s4 + $0xc8] sm:$0xff]  ;;  %v5469_v23 = vor.u32 %v6397_v18, %v5466_v19 }
 0x195   : > { %v6394_v1 = vld [vmem:[%s9624_s3 + $0x64] sm:$0xf0] }
 0x199   : > { %v699_v29 = vpop.permute.xlu1 %698  ;;  %v756_v41 = vpop.permute.xlu2 %755  ;;  %v784_v56 = vld [vmem:[#allocation2 + $0x38] sm:$0xff] }
 0x19a   : > { %712 = vst.msk [vmem:[#allocation2 + $0x2c] sm:$0xff] %vm684_vm1, %v699_v29  ;;  %v697_v30 = vpop.permute.xlu0 %696  ;;  %v791_v31 = vld [vmem:[#allocation2 + $0x70] sm:$0xff]  ;;  %v792_v32 = vld [vmem:[#allocation2 + $0x78] sm:$0xff]  ;;  %v5421_v29 = vor.u32 %v6385_v26, %v5418_v27  ;;  %v6398_v26 = vld [vmem:[%s9624_s3 + $0x84] sm:$0xf0] }
 0x19b   : > { %711 = vst.msk [vmem:[#allocation2 + $0x24] sm:$0xff] %vm684_vm1, %v697_v30  ;;  %v838_v33 = vpack.c.bf16 %v792_v32, %v791_v31  ;;  %v786_v48 = vld [vmem:[#allocation2 + $0x48] sm:$0xff]  ;;  %v5416_v30 = vld [vmem:[%s9624_s3 + $0x20] sm:$0xf] }
 0x19c   : > { %v835_v51 = vpack.c.bf16 %v786_v48, %v785_v50  ;;  %1003 = vperm.xlu2 %6631, %v865_v25   ;;  %v6386_v31 = vld [vmem:[%s9624_s3 + $0x24] sm:$0xf0]  ;;  %v6391_v50 = vld [vmem:[%s9624_s3 + $0x54] sm:$0xf]  ;;  %v5464_v25 = vld [vmem:[%s9624_s3 + $0x80] sm:$0xf] }
 0x19d   : > { %1272 = vmatpush.bf16.msra.mxu1 %v838_v33  ;;  %v5417_v32 = vor.u32 %v6386_v31, %v5416_v30  ;;  %v6387_v33 = vld [vmem:[%s9624_s3 + $0x34] sm:$0xf]  ;;  %v5465_v27 = vor.u32 %v6398_v26, %v5464_v25  ;;  %v6402_v25 = vld [vmem:[%s9624_s3 + $0xa4] sm:$0xf0] }
 0x19e   : > { %v5429_v35 = vor.u32 %v6387_v33, %v5426_v34  ;;  %v874_v30 = vld [vmem:[%s9625_s4 + $0x110] sm:$0xff] }
 0x19f   : > { %v866_v31 = vld [vmem:[%s9625_s4 + $0xd0] sm:$0xff] }
 0x1a1   : > { %v754_v42 = vpop.permute.xlu1 %753  ;;  %1273 = vmatpush.bf16.msra.mxu1 %v837_v39  ;;  %v783_v52 = vld [vmem:[#allocation2 + $0x30] sm:$0xff]  ;;  %v7054_v39 = vpop.permute.xlu2 %898 }
 0x1a2   : > { %v765_v43 = vsel %vm761_vm3, %v754_v42, %v756_v41  ;;  %v758_v53 = vpop.permute.xlu0 %757  ;;  %v834_v57 = vpack.c.bf16 %v784_v56, %v783_v52  ;;  %v781_v58 = vld [vmem:[#allocation2 + $0x20] sm:$0xff]  ;;  %v782_v59 = vld [vmem:[#allocation2 + $0x28] sm:$0xff] }
 0x1a3   : > { %775 = vst.msk [vmem:[#allocation2 + $0x84] sm:$0xff] %vm684_vm1, %v765_v43  ;;  %v833_v63 = vpack.c.bf16 %v782_v59, %v781_v58  ;;  %v6389_v41 = vld [vmem:[%s9624_s3 + $0x44] sm:$0xf]  ;;  %v5434_v42 = vld [vmem:[%s9624_s3 + $0x48] sm:$0xf0] }
 0x1a4   : > { %893 = vperm.xlu2 %6631, %v843_v28   ;;  %v5437_v43 = vor.u32 %v6389_v41, %v5434_v42  ;;  %v6399_v41 = vld [vmem:[%s9624_s3 + $0x94] sm:$0xf]  ;;  %v5474_v42 = vld [vmem:[%s9624_s3 + $0x98] sm:$0xf0] }
 0x1a5   : > { %1274 = vmatpush.bf16.msra.mxu1 %v836_v45  ;;  %v6390_v45 = vld [vmem:[%s9624_s3 + $0x44] sm:$0xf0] }
 0x1a6   : > { %v5433_v48 = vor.u32 %v6390_v45, %v5432_v44  ;;  %v870_v44 = vld [vmem:[%s9625_s4 + $0xf0] sm:$0xff]  ;;  %v860_v45 = vld [vmem:[%s9625_s4 + $0xa0] sm:$0xff] }
 0x1a9   : > { %v760_v54 = vpop.permute.xlu1 %759  ;;  %1275 = vmatpush.bf16.msra.mxu1 %v835_v51  ;;  %v7070_v46 = vpop.permute.xlu2 %943  ;;  %v5442_v51 = vld [vmem:[%s9624_s3 + $0x58] sm:$0xf0] }
 0x1aa   : > { %v766_v55 = vsel %vm761_vm3, %v758_v53, %v760_v54  ;;  %v793_v4 = vld [vmem:[#allocation2 + $0x80] sm:$0xff]  ;;  %v5445_v53 = vor.u32 %v6391_v50, %v5442_v51  ;;  %v5440_v54 = vld [vmem:[%s9624_s3 + $0x50] sm:$0xf]  ;;  %v7096_v59 = vpop.permute.xlu0 %903  ;;  %v5477_v51 = vor.u32 %v6399_v41, %v5474_v42 }
 0x1ab   : > { %776 = vst.msk [vmem:[#allocation2 + $0x8c] sm:$0xf] %vm689_vm2, %v766_v55  ;;  %v6392_v55 = vld [vmem:[%s9624_s3 + $0x54] sm:$0xf0] }
 0x1ac   : > { %v5441_v56 = vor.u32 %v6392_v55, %v5440_v54  ;;  %1048 = vperm.xlu2 %6631, %v874_v30   ;;  %v5472_v54 = vld [vmem:[%s9624_s3 + $0x90] sm:$0xf]  ;;  %v6400_v55 = vld [vmem:[%s9624_s3 + $0x94] sm:$0xf0]  ;;  %v869_v30 = vld [vmem:[%s9625_s4 + $0xe8] sm:$0xff] }
 0x1ad   : > { %1276 = vmatpush.bf16.msra.mxu1 %v834_v57  ;;  %1023 = vperm.xlu1 %6633, %v869_v30   ;;  %v6407_v30 = vld [vmem:[%s9624_s3 + $0xd4] sm:$0xf] }
 0x1b1   : > { %1277 = vmatpush.bf16.msra.mxu1 %v833_v63  ;;  %v7056_v40 = vpop.permute.xlu1 %908  ;;  %v7075_v49 = vpop.permute.xlu2 %953  ;;  %v5453_v63 = vor.u32 %v6393_v60, %v5450_v61  ;;  %v5473_v61 = vor.u32 %v6400_v55, %v5472_v54 }
 0x1b2   : > { %v794_v5 = vld [vmem:[#allocation2 + $0x88] sm:$0xff]  ;;  %v7114_v3 = vpop.permute.xlu0 %923 }
 0x1b3   : > { %v839_v7 = vpack.c.bf16 %v794_v5, %v793_v4  ;;  %v5449_v4 = vor.u32 %v6394_v1, %v5448_v0  ;;  %v875_v1 = vld [vmem:[%s9625_s4 + $0x118] sm:$0xff] }
 0x1b4   : > { %1028 = vperm.xlu2 %6631, %v870_v44   ;;  %v5488_v44 = vld [vmem:[%s9624_s3 + $0xb0] sm:$0xf] }
 0x1b5   : > { %1278 = vmatpush.bf16.msra.mxu1 %v832_v6  ;;  %1378 = vmatpush.bf16.msrb.mxu3 %v839_v7  ;;  %v6395_v7 = vld [vmem:[%s9624_s3 + $0x74] sm:$0xf] }
 0x1b8   : > { %5542 = vmatmul.msk.bf16.vlgmr.msrb.gmra.mxu3 %vm9665_vm0, %v5405_v10  ;;  %v5461_v10 = vor.u32 %v6395_v7, %v5458_v8 }
 0x1b9   : > { %1279 = vmatpush.bf16.msra.mxu1 %v831_v15  ;;  %v7072_v47 = vpop.permute.xlu1 %948  ;;  %v7092_v57 = vpop.permute.xlu2 %913 }
 0x1ba   : > { %v7127_v9 = vpop.permute.xlu0 %918 }
 0x1bc   : > { %1280 = vmatmul.bf16.vlgmr.msra.gmra.mxu1 %v5401_v16  ;;  %v871_v16 = vld [vmem:[%s9625_s4 + $0xf8] sm:$0xff] }
 0x1bd   : > { %1033 = vperm.xlu0 %6632, %v871_v16  }
 0x1c1   : > { %v7083_v52 = vpop.permute.xlu1 %928  ;;  %v7104_v62 = vpop.permute.xlu2 %963 }
 0x1c2   : > { %v7141_v17 = vpop.permute.xlu0 %933 }
 0x1c8   : > { %5543 = vmatmul.msk.bf16.gmra.mxu3 %vm9665_vm0, %v5413_v21  ;;  %v867_v21 = vld [vmem:[%s9625_s4 + $0xd8] sm:$0xff] }
 0x1c9   : > { %v7094_v58 = vpop.permute.xlu1 %958  ;;  %v7117_v5 = vpop.permute.xlu2 %988  ;;  %1013 = vperm.xlu0 %6632, %v867_v21  }
 0x1cc   : > { %1285 = vmatmul.bf16.gmra.mxu1 %v5409_v24  ;;  %v7156_v24 = vpop.permute.xlu0 %993 }
 0x1d1   : > { %v7112_v2 = vpop.permute.xlu1 %938  ;;  %1008 = vperm.xlu0 %6632, %v866_v31  }
 0x1d4   : > { %v879_v13 = vpop.permute.xlu2 %878  ;;  %v884_v37 = vpop.permute.xlu0 %883 }
 0x1d8   : > { %5544 = vmatmul.msk.bf16.gmra.mxu3 %vm9665_vm0, %v5421_v29 }
 0x1d9   : > { %v7119_v6 = vpop.permute.xlu1 %998  ;;  %978 = vperm.xlu0 %6632, %v860_v45   ;;  %v6404_v45 = vld [vmem:[%s9624_s3 + $0xb4] sm:$0xf0] }
 0x1da   : > { %v5489_v54 = vor.u32 %v6404_v45, %v5488_v44 }
 0x1dc   : > { %1290 = vmatmul.bf16.gmra.mxu1 %v5417_v32 }
 0x1e1   : > { %v7136_v15 = vpop.permute.xlu1 %968  ;;  %1053 = vperm.xlu0 %6632, %v875_v1  }
 0x1e6   : > { %v7149_v20 = vpop.permute.xlu2 %973 }
 0x1e8   : > { %5545 = vmatmul.msk.bf16.gmra.mxu3 %vm9665_vm0, %v5429_v35 }
 0x1e9   : > { %v7154_v22 = vpop.permute.xlu1 %1038 }
 0x1ec   : > { %1295 = vmatmul.bf16.gmra.mxu1 %v5425_v38 }
 0x1ee   : > { %v7171_v33 = vpop.permute.xlu2 %1043 }
 0x1f1   : > { %v7173_v35 = vpop.permute.xlu1 %1018 }
 0x1f8   : > { %5546 = vmatmul.msk.bf16.gmra.mxu3 %vm9665_vm0, %v5437_v43 }
 0x1f9   : > { %v889_v60 = vpop.permute.xlu1 %888 }
 0x1fc   : > { %1300 = vmatmul.bf16.gmra.mxu1 %v5433_v48 }
 0x208   : > { %5547 = vmatmul.msk.bf16.gmra.mxu3 %vm9665_vm0, %v5445_v53  ;;  %v7188_v53 = vpop.permute.xlu2 %1003 }
 0x20c   : > { %1305 = vmatmul.bf16.gmra.mxu1 %v5441_v56 }
 0x218   : > { %5548 = vmatmul.msk.bf16.gmra.mxu3 %vm9665_vm0, %v5453_v63 }
 0x21c   : > { %1310 = vmatmul.bf16.gmra.mxu1 %v5449_v4 }
 0x228   : > { %5549 = vmatmul.msk.bf16.gmra.mxu3 %vm9665_vm0, %v5461_v10  ;;  %v894_v10 = vpop.permute.xlu2 %893 }
 0x22c   : > { %1315 = vmatmul.bf16.gmra.mxu1 %v5457_v14  ;;  %v5482_v14 = vld [vmem:[%s9624_s3 + $0xa8] sm:$0xf0] }
 0x238   : > { %5550 = vmatmul.msk.bf16.gmra.mxu3 %vm9665_vm0, %v5469_v23  ;;  %v5480_v23 = vld [vmem:[%s9624_s3 + $0xa0] sm:$0xf] }
 0x239   : > { %v1281_v28 = vpop.f32.mrf.mxu1 }
 0x23a   : > { %v1282_v29 = vadd.f32 %v1281_v28, %v879_v13  ;;  %v6401_v13 = vld [vmem:[%s9624_s3 + $0xa4] sm:$0xf] }
 0x23b   : > { %v1380_v32 = vpop.f32.mrf.mxu3  ;;  %v5485_v21 = vor.u32 %v6401_v13, %v5482_v14  ;;  %v5496_v13 = vld [vmem:[%s9624_s3 + $0xc0] sm:$0xf]  ;;  %v6406_v14 = vld [vmem:[%s9624_s3 + $0xc4] sm:$0xf0] }
 0x23c   : > { %v1381_v34 = vadd.f32 %v1380_v32, %v1282_v29  ;;  %1320 = vmatmul.bf16.gmra.mxu1 %v5465_v27  ;;  %v5481_v27 = vor.u32 %v6402_v25, %v5480_v23 }
 0x23e   : > { %v1470_v36 = vmax.f32 %v1381_v34, 0.0 }
 0x240   : > { %1506 = vst.msk [vmem:[#allocation3] sm:$0xff] %vm684_vm1, %v1470_v36 }
 0x241   : > { %v1283_v38 = vpop.f32.mrf.mxu1 }
 0x242   : > { %v1284_v43 = vadd.f32 %v1283_v38, %v884_v37  ;;  %v6403_v37 = vld [vmem:[%s9624_s3 + $0xb4] sm:$0xf] }
 0x243   : > { %v1382_v48 = vpop.f32.mrf.mxu3 }
 0x244   : > { %v1383_v50 = vadd.f32 %v1382_v48, %v1284_v43 }
 0x246   : > { %v1471_v56 = vmax.f32 %v1383_v50, 0.0 }
 0x248   : > { %1507 = vst.msk [vmem:[#allocation3 + $0x18] sm:$0xff] %vm684_vm1, %v1471_v56  ;;  %5551 = vmatmul.msk.bf16.gmra.mxu3 %vm9665_vm0, %v5477_v51 }
 0x249   : > { %v1286_v63 = vpop.f32.mrf.mxu1 }
 0x24a   : > { %v1287_v0 = vadd.f32 %v1286_v63, %v889_v60 }
 0x24b   : > { %v1385_v4 = vpop.f32.mrf.mxu3 }
 0x24c   : > { %v1386_v7 = vadd.f32 %v1385_v4, %v1287_v0  ;;  %1325 = vmatmul.bf16.gmra.mxu1 %v5473_v61  ;;  %v6405_v4 = vld [vmem:[%s9624_s3 + $0xc4] sm:$0xf] }
 0x24e   : > { %v1472_v8 = vmax.f32 %v1386_v7, 0.0  ;;  %v5498_v7 = vld [vmem:[%s9624_s3 + $0xc8] sm:$0xf0] }
 0x250   : > { %1508 = vst.msk [vmem:[#allocation3 + $0x30] sm:$0xff] %vm684_vm1, %v1472_v8 }
 0x251   : > { %v1288_v12 = vpop.f32.mrf.mxu1 }
 0x252   : > { %v1289_v16 = vadd.f32 %v1288_v12, %v894_v10  ;;  %v5501_v12 = vor.u32 %v6405_v4, %v5498_v7 }
 0x253   : > { %v1387_v18 = vpop.f32.mrf.mxu3 }
 0x254   : > { %v1388_v19 = vadd.f32 %v1387_v18, %v1289_v16 }
 0x256   : > { %v1473_v26 = vmax.f32 %v1388_v19, 0.0 }
 0x258   : > { %1509 = vst.msk [vmem:[#allocation3 + $0x48] sm:$0xff] %vm684_vm1, %v1473_v26  ;;  %5552 = vmatmul.msk.bf16.gmra.mxu3 %vm9665_vm0, %v5485_v21 }
 0x259   : > { %v1291_v28 = vpop.f32.mrf.mxu1 }
 0x25a   : > { %v1292_v29 = vadd.f32 %v1291_v28, %v7054_v39  ;;  %v5490_v39 = vld [vmem:[%s9624_s3 + $0xb8] sm:$0xf0] }
 0x25b   : > { %v1390_v31 = vpop.f32.mrf.mxu3  ;;  %v5493_v43 = vor.u32 %v6403_v37, %v5490_v39  ;;  %v5504_v39 = vld [vmem:[%s9624_s3 + $0xd0] sm:$0xf] }
 0x25c   : > { %v1391_v32 = vadd.f32 %v1390_v31, %v1292_v29  ;;  %1330 = vmatmul.bf16.gmra.mxu1 %v5481_v27  ;;  %v5506_v31 = vld [vmem:[%s9624_s3 + $0xd8] sm:$0xf0] }
 0x25e   : > { %v1474_v34 = vmax.f32 %v1391_v32, 0.0 }
 0x260   : > { %1510 = vst.msk [vmem:[#allocation3 + $0x60] sm:$0xf] %vm689_vm2, %v1474_v34  ;;  %v1517_v50 = vrot.slane %v1474_v34, 4 }
 0x261   : > { %v1293_v36 = vpop.f32.mrf.mxu1 }
 0x262   : > { %v1294_v38 = vadd.f32 %v1293_v36, %v7096_v59  ;;  %v5509_v36 = vor.u32 %v6407_v30, %v5506_v31  ;;  %v7314_v31 = vpop.permute.xlu2 %1048 }
 0x263   : > { %v1392_v41 = vpop.f32.mrf.mxu3 }
 0x264   : > { %v1393_v42 = vadd.f32 %v1392_v41, %v1294_v38  ;;  %v6408_v38 = vld [vmem:[%s9624_s3 + $0xd4] sm:$0xf0] }
 0x265   : > { %v5505_v41 = vor.u32 %v6408_v38, %v5504_v39 }
 0x266   : > { %v1475_v48 = vmax.f32 %v1393_v42, 0.0 }
 0x268   : > { %v1518_v51 = vrot.slane %v1475_v48, 4  ;;  %5553 = vmatmul.msk.bf16.gmra.mxu3 %vm9665_vm0, %v5493_v43 }
 0x269   : > { %v1296_v55 = vpop.f32.mrf.mxu1 }
 0x26a   : > { %v1297_v59 = vadd.f32 %v1296_v55, %v7056_v40  ;;  %v1519_v56 = vsel %vm1516_vm4, %v1517_v50, %v1518_v51 }
 0x26b   : > { %v1395_v60 = vpop.f32.mrf.mxu3  ;;  %1526 = vrot.lane.b32.xlu2 %v1519_v56, %s9661_s27 }
 0x26c   : > { %v1396_v61 = vadd.f32 %v1395_v60, %v1297_v59  ;;  %1335 = vmatmul.bf16.gmra.mxu1 %v5489_v54  ;;  %v5514_v54 = vld [vmem:[%s9624_s3 + $0xe8] sm:$0xf0]  ;;  %v5512_v60 = vld [vmem:[%s9624_s3 + $0xe0] sm:$0xf] }
 0x26e   : > { %v1476_v63 = vmax.f32 %v1396_v61, 0.0  ;;  %v6410_v61 = vld [vmem:[%s9624_s3 + $0xe4] sm:$0xf0] }
 0x270   : > { %v1520_v0 = vrot.slane %v1476_v63, 4 }
 0x271   : > { %v1298_v1 = vpop.f32.mrf.mxu1 }
 0x272   : > { %v1299_v40 = vadd.f32 %v1298_v1, %v7092_v57  ;;  %v1521_v8 = vsel %vm1516_vm4, %v1518_v51, %v1520_v0  ;;  %v5497_v57 = vor.u32 %v6406_v14, %v5496_v13  ;;  %v6409_v51 = vld [vmem:[%s9624_s3 + $0xe4] sm:$0xf] }
 0x273   : > { %v1397_v10 = vpop.f32.mrf.mxu3  ;;  %1528 = vrot.lane.b32.xlu0 %v1521_v8, %s9661_s27  ;;  %v5517_v56 = vor.u32 %v6409_v51, %v5514_v54  ;;  %v7339_v51 = vpop.permute.xlu2 %1028 }
 0x274   : > { %v1398_v11 = vadd.f32 %v1397_v10, %v1299_v40  ;;  %v6411_v10 = vld [vmem:[%s9624_s3 + $0xf4] sm:$0xf] }
 0x276   : > { %v1477_v16 = vmax.f32 %v1398_v11, 0.0  ;;  %v5522_v11 = vld [vmem:[%s9624_s3 + $0xf8] sm:$0xf0] }
 0x277   : > { %v5525_v14 = vor.u32 %v6411_v10, %v5522_v11 }
 0x278   : > { %v1522_v18 = vrot.slane %v1477_v16, 4  ;;  %5554 = vmatmul.msk.bf16.gmra.mxu3 %vm9665_vm0, %v5501_v12  ;;  %v6412_v16 = vld [vmem:[%s9624_s3 + $0xf4] sm:$0xf0] }
 0x279   : > { %v1301_v19 = vpop.f32.mrf.mxu1 }
 0x27a   : > { %v1302_v21 = vadd.f32 %v1301_v19, %v7127_v9  ;;  %v1523_v23 = vsel %vm1516_vm4, %v1520_v0, %v1522_v18  ;;  %v5513_v0 = vor.u32 %v6410_v61, %v5512_v60 }
 0x27b   : > { %v1400_v25 = vpop.f32.mrf.mxu3  ;;  %1530 = vrot.lane.b32.xlu0 %v1523_v23, %s9661_s27 }
 0x27c   : > { %v1401_v26 = vadd.f32 %v1400_v25, %v1302_v21  ;;  %1340 = vmatmul.bf16.gmra.mxu1 %v5497_v57 }
 0x27e   : > { %v1478_v27 = vmax.f32 %v1401_v26, 0.0 }
 0x280   : > { %v7260_v28 = vrot.slane %v1478_v27, 4 }
 0x281   : > { %v1303_v29 = vpop.f32.mrf.mxu1 }
 0x282   : > { %v1304_v9 = vadd.f32 %v1303_v29, %v7114_v3  ;;  %v1525_v32 = vsel %vm1516_vm4, %v1522_v18, %v7260_v28 }
 0x283   : > { %v1402_v34 = vpop.f32.mrf.mxu3  ;;  %1532 = vrot.lane.b32.xlu1 %v1525_v32, %s9661_s27  ;;  %v5530_v32 = vld [vmem:[%s9624_s3 + $0x108] sm:$0xf0] }
 0x284   : > { %v1403_v37 = vadd.f32 %v1402_v34, %v1304_v9  ;;  %v6413_v9 = vld [vmem:[%s9624_s3 + $0x104] sm:$0xf] }
 0x285   : > { %v5533_v38 = vor.u32 %v6413_v9, %v5530_v32  ;;  %v984_v9 = vpop.permute.xlu1 %983 }
 0x286   : > { %v1479_v3 = vmax.f32 %v1403_v37, 0.0  ;;  %v7325_v37 = vpop.permute.xlu0 %1033 }
 0x288   : > { %5555 = vmatmul.msk.bf16.gmra.mxu3 %vm9665_vm0, %v5509_v36 }
 0x289   : > { %v1306_v42 = vpop.f32.mrf.mxu1 }
 0x28a   : > { %v1307_v43 = vadd.f32 %v1306_v42, %v7083_v52 }
 0x28b   : > { %v1405_v44 = vpop.f32.mrf.mxu3  ;;  %1553 = vrot.lane.b32.xlu1 %v1479_v3, %s9640_s17  ;;  %v6414_v3 = vld [vmem:[%s9624_s3 + $0x104] sm:$0xf0] }
 0x28c   : > { %v1406_v45 = vadd.f32 %v1405_v44, %v1307_v43  ;;  %1345 = vmatmul.bf16.gmra.mxu1 %v5505_v41  ;;  %v5528_v41 = vld [vmem:[%s9624_s3 + $0x100] sm:$0xf] }
 0x28d   : > { %v5529_v43 = vor.u32 %v6414_v3, %v5528_v41 }
 0x28e   : > { %v1480_v48 = vmax.f32 %v1406_v45, 0.0  ;;  %v7341_v54 = vpop.permute.xlu0 %1013 }
 0x290   : > { %1555 = vrot.lane.b32.xlu2 %v1480_v48, %s9640_s17 }
 0x291   : > { %v1308_v50 = vpop.f32.mrf.mxu1 }
 0x292   : > { %v1309_v52 = vadd.f32 %v1308_v50, %v7141_v17 }
 0x293   : > { %v1407_v55 = vpop.f32.mrf.mxu3 }
 0x294   : > { %v1408_v59 = vadd.f32 %v1407_v55, %v1309_v52 }
 0x296   : > { %v1481_v63 = vmax.f32 %v1408_v59, 0.0  ;;  %v6415_v59 = vld [vmem:[%s9624_s3 + $0x114] sm:$0xf] }
 0x298   : > { %5556 = vmatmul.msk.bf16.gmra.mxu3 %vm9665_vm0, %v5517_v56  ;;  %1557 = vrot.lane.b32.xlu2 %v1481_v63, %s9640_s17 }
 0x299   : > { %v1311_v1 = vpop.f32.mrf.mxu1 }
 0x29a   : > { %v1312_v17 = vadd.f32 %v1311_v1, %v7112_v2  ;;  %v5520_v2 = vld [vmem:[%s9624_s3 + $0xf0] sm:$0xf] }
 0x29b   : > { %v1410_v4 = vpop.f32.mrf.mxu3  ;;  %v5521_v57 = vor.u32 %v6412_v16, %v5520_v2  ;;  %v5536_v1 = vld [vmem:[%s9624_s3 + $0x110] sm:$0xf] }
 0x29c   : > { %v1411_v7 = vadd.f32 %v1410_v4, %v1312_v17  ;;  %1350 = vmatmul.bf16.gmra.mxu1 %v5513_v0  ;;  %v6416_v17 = vld [vmem:[%s9624_s3 + $0x114] sm:$0xf0] }
 0x29e   : > { %v1482_v40 = vmax.f32 %v1411_v7, 0.0 }
 0x2a0   : > { %1559 = vrot.lane.b32.xlu0 %v1482_v40, %s9640_s17 }
 0x2a1   : > { %v1313_v8 = vpop.f32.mrf.mxu1 }
 0x2a2   : > { %v1314_v13 = vadd.f32 %v1313_v8, %v7070_v46  ;;  %v5537_v8 = vor.u32 %v6416_v17, %v5536_v1  ;;  %v6436_v1 = vld [vmem:[%s9626_s5 + $0x98] sm:$0xf0] }
 0x2a3   : > { %v1412_v12 = vpop.f32.mrf.mxu3 }
 0x2a4   : > { %v1413_v18 = vadd.f32 %v1412_v12, %v1314_v13 }
 0x2a6   : > { %v1483_v25 = vmax.f32 %v1413_v18, 0.0 }
 0x2a8   : > { %5557 = vmatmul.msk.bf16.gmra.mxu3 %vm9665_vm0, %v5525_v14  ;;  %v1579_v27 = vrot.slane %v1483_v25, 4 }
 0x2a9   : > { %v1316_v19 = vpop.f32.mrf.mxu1 }
 0x2aa   : > { %v1317_v21 = vadd.f32 %v1316_v19, %v7072_v47 }
 0x2ab   : > { %v1415_v23 = vpop.f32.mrf.mxu3 }
 0x2ac   : > { %v1416_v26 = vadd.f32 %v1415_v23, %v1317_v21  ;;  %1355 = vmatmul.bf16.gmra.mxu1 %v5521_v57 }
 0x2ae   : > { %v1484_v46 = vmax.f32 %v1416_v26, 0.0 }
 0x2b0   : > { %v1580_v29 = vrot.slane %v1484_v46, 4 }
 0x2b1   : > { %v1318_v30 = vpop.f32.mrf.mxu1 }
 0x2b2   : > { %v1319_v47 = vadd.f32 %v1318_v30, %v7075_v49  ;;  %v1581_v34 = vsel %vm1516_vm4, %v1579_v27, %v1580_v29 }
 0x2b3   : > { %v1417_v36 = vpop.f32.mrf.mxu3  ;;  %1588 = vrot.lane.b32.xlu0 %v1581_v34, %s9636_s24 }
 0x2b4   : > { %v1418_v39 = vadd.f32 %v1417_v36, %v1319_v47 }
 0x2b6   : > { %v1485_v42 = vmax.f32 %v1418_v39, 0.0  ;;  %v7376_v39 = vpop.permute.xlu1 %1023 }
 0x2b8   : > { %v1582_v49 = vrot.slane %v1485_v42, 4  ;;  %5558 = vmatmul.msk.bf16.gmra.mxu3 %vm9665_vm0, %v5533_v38 }
 0x2b9   : > { %v1321_v44 = vpop.f32.mrf.mxu1 }
 0x2ba   : > { %v1322_v45 = vadd.f32 %v1321_v44, %v7094_v58  ;;  %v1583_v48 = vsel %vm1516_vm4, %v1580_v29, %v1582_v49  ;;  %v5538_v58 = vld [vmem:[%s9624_s3 + $0x118] sm:$0xf0] }
 0x2bb   : > { %v1420_v50 = vpop.f32.mrf.mxu3  ;;  %1590 = vrot.lane.b32.xlu1 %v1583_v48, %s9636_s24  ;;  %1534 = vrot.lane.b32.xlu0 %v7260_v28, %s9661_s27  ;;  %v5541_v63 = vor.u32 %v6415_v59, %v5538_v58  ;;  %v5646_v59 = vld [vmem:[%s9626_s5 + $0xa8] sm:$0xf] }
 0x2bc   : > { %1360 = vmatmul.bf16.gmra.mxu1 %v5529_v43  ;;  %v1421_v52 = vadd.f32 %v1420_v50, %v1322_v45 }
 0x2be   : > { %v1486_v56 = vmax.f32 %v1421_v52, 0.0 }
 0x2c0   : > { %v1584_v4 = vrot.slane %v1486_v56, 4 }
 0x2c1   : > { %v1323_v55 = vpop.f32.mrf.mxu1 }
 0x2c2   : > { %v1324_v60 = vadd.f32 %v1323_v55, %v7104_v62  ;;  %v7358_v62 = vpop.permute.xlu0 %1008  ;;  %v1585_v12 = vsel %vm1516_vm4, %v1582_v49, %v1584_v4 }
 0x2c3   : > { %v1422_v61 = vpop.f32.mrf.mxu3  ;;  %1561 = vrot.lane.b32.xlu1 %v1483_v25, %s9640_s17  ;;  %s9669_s17 = smov 72  }
 0x2c4   : > { %v1423_v28 = vadd.f32 %v1422_v61, %v1324_v60 }
 0x2c5   : > { %v1527_v0 = vpop.permute.xlu2 %1526 }
 0x2c6   : > { %v1487_v7 = vmax.f32 %v1423_v28, 0.0  ;;  %1542 = vst.msk [vmem:[#allocation3] sm:$0xff] %vm1541_vm5, %v1527_v0  ;;  %v5634_v0 = vld [vmem:[%s9626_s5 + $0x90] sm:$0xf] }
 0x2c8   : > { %v1586_v40 = vrot.slane %v1487_v7, 4  ;;  %5559 = vmatmul.msk.bf16.gmra.mxu3 %vm9665_vm0, %v5541_v63 }
 0x2c9   : > { %v1326_v10 = vpop.f32.mrf.mxu1 }
 0x2ca   : > { %v1327_v11 = vadd.f32 %v1326_v10, %v7136_v15  ;;  %1596 = vrot.lane.b32.xlu2 %v1586_v40, %s9636_s24  ;;  %v1587_v18 = vsel %vm1516_vm4, %v1584_v4, %v1586_v40  ;;  %v979_v57 = vpop.permute.xlu0 %978  ;;  %v5635_v4 = vor.u32 %v6436_v1, %v5634_v0  ;;  %v5622_v40 = vld [vmem:[%s9626_s5 + $0x78] sm:$0xf] }
 0x2cb   : > { %v1425_v13 = vpop.f32.mrf.mxu3  ;;  %1592 = vrot.lane.b32.xlu1 %v1585_v12, %s9636_s24 }
 0x2cc   : > { %v1426_v14 = vadd.f32 %v1425_v13, %v1327_v11  ;;  %1365 = vmatmul.bf16.gmra.mxu1 %v5537_v8  ;;  %v6433_v8 = vld [vmem:[%s9626_s5 + $0x80] sm:$0xf0] }
 0x2cd   : > { %v5623_v12 = vor.u32 %v6433_v8, %v5622_v40 }
 0x2ce   : > { %v1488_v2 = vmax.f32 %v1426_v14, 0.0 }
 0x2d0   : > { %1621 = vrot.lane.b32.xlu0 %v1488_v2, %s9646_s16  ;;  %v5610_v2 = vld [vmem:[%s9626_s5 + $0x60] sm:$0xf] }
 0x2d1   : > { %v1328_v16 = vpop.f32.mrf.mxu1 }
 0x2d2   : > { %v1329_v19 = vadd.f32 %v1328_v16, %v7149_v20  ;;  %1594 = vrot.lane.b32.xlu2 %v1587_v18, %s9636_s24  ;;  %v7370_v27 = vpop.permute.xlu0 %1053  ;;  %v6430_v16 = vld [vmem:[%s9626_s5 + $0x68] sm:$0xf0]  ;;  %s9642_s24 = smov 124  }
 0x2d3   : > { %v1427_v15 = vpop.f32.mrf.mxu3 }
 0x2d4   : > { %v1428_v21 = vadd.f32 %v1427_v15, %v1329_v19  ;;  %v5598_v19 = vld [vmem:[%s9626_s5 + $0x48] sm:$0xf]  ;;  %v6427_v15 = vld [vmem:[%s9626_s5 + $0x50] sm:$0xf0] }
 0x2d6   : > { %v1489_v23 = vmax.f32 %v1428_v21, 0.0 }
 0x2d8   : > { %1623 = vrot.lane.b32.xlu1 %v1489_v23, %s9646_s16 }
 0x2d9   : > { %v1331_v25 = vpop.f32.mrf.mxu1 }
 0x2da   : > { %v1332_v26 = vadd.f32 %v1331_v25, %v979_v57  ;;  %v5611_v57 = vor.u32 %v6430_v16, %v5610_v2  ;;  %v5599_v25 = vor.u32 %v6427_v15, %v5598_v19 }
 0x2db   : > { %v1430_v46 = vpop.f32.mrf.mxu3 }
 0x2dc   : > { %v7372_v29 = vadd.f32 %v1430_v46, %v1332_v26  ;;  %v5586_v46 = vld [vmem:[%s9626_s5 + $0x30] sm:$0xf] }
 0x2e1   : > { %v1333_v30 = vpop.f32.mrf.mxu1 }
 0x2e2   : > { %v1334_v10 = vadd.f32 %v1333_v30, %v984_v9  ;;  %v6424_v30 = vld [vmem:[%s9626_s5 + $0x38] sm:$0xf0] }
 0x2e3   : > { %v1432_v32 = vpop.f32.mrf.mxu3  ;;  %v5587_v9 = vor.u32 %v6424_v30, %v5586_v46 }
 0x2e4   : > { %v1433_v18 = vadd.f32 %v1432_v32, %v1334_v10 }
 0x2e5   : > { %v1529_v47 = vpop.permute.xlu0 %1528 }
 0x2e6   : > { %1543 = vst.msk [vmem:[#allocation3 + $0x18] sm:$0xff] %vm1541_vm5, %v1529_v47  ;;  %v1491_v21 = vmax.f32 %v1433_v18, 0.0  ;;  %v5574_v47 = vld [vmem:[%s9626_s5 + $0x18] sm:$0xf] }
 0x2e9   : > { %v1336_v20 = vpop.f32.mrf.mxu1 }
 0x2ea   : > { %v1556_v34 = vpop.permute.xlu2 %1555  ;;  %v1337_v38 = vadd.f32 %v1336_v20, %v7117_v5  ;;  %v6421_v20 = vld [vmem:[%s9626_s5 + $0x20] sm:$0xf0] }
 0x2eb   : > { %1570 = vst.msk [vmem:[#allocation3 + $0x18] sm:$0xff] %vm1568_vm6, %v1556_v34  ;;  %v1435_v36 = vpop.f32.mrf.mxu3 }
 0x2ec   : > { %v7380_v3 = vadd.f32 %v1435_v36, %v1337_v38  ;;  %v5575_v38 = vor.u32 %v6421_v20, %v5574_v47 }
 0x2ed   : > { %v1531_v41 = vpop.permute.xlu0 %1530 }
 0x2ee   : > { %1544 = vst.msk [vmem:[#allocation3 + $0x30] sm:$0xff] %vm1541_vm5, %v1531_v41  ;;  %v1492_v45 = vmax.f32 %v7380_v3, 0.0  ;;  %v6460_v3 = vld [vmem:[%s9626_s5 + $0x158] sm:$0xf0] }
 0x2f0   : > { %v1647_v5 = vrot.slane %v1492_v45, 4 }
 0x2f1   : > { %v1338_v42 = vpop.f32.mrf.mxu1 }
 0x2f2   : > { %v1339_v49 = vadd.f32 %v1338_v42, %v7156_v24  ;;  %v1558_v43 = vpop.permute.xlu2 %1557  ;;  %v6439_v24 = vld [vmem:[%s9626_s5 + $0xb0] sm:$0xf0] }
 0x2f3   : > { %1571 = vst.msk [vmem:[#allocation3 + $0x30] sm:$0xff] %vm1568_vm6, %v1558_v43  ;;  %v1437_v44 = vpop.f32.mrf.mxu3  ;;  %v5647_v56 = vor.u32 %v6439_v24, %v5646_v59  ;;  %v6418_v43 = vld [vmem:[%s9626_s5 + $0x8] sm:$0xf0] }
 0x2f4   : > { %v1438_v48 = vadd.f32 %v1437_v44, %v1339_v49  ;;  %v5562_v49 = vld [vmem:[%s9626_s5] sm:$0xf] }
 0x2f5   : > { %v1533_v50 = vpop.permute.xlu1 %1532  ;;  %2148 = vmatpush.bf16.msrb.mxu0 %v5647_v56 }
 0x2f6   : > { %v1493_v52 = vmax.f32 %v1438_v48, 0.0  ;;  %1545 = vst.msk [vmem:[#allocation3 + $0x48] sm:$0xff] %vm1541_vm5, %v1533_v50  ;;  %v5563_v48 = vor.u32 %v6418_v43, %v5562_v49 }
 0x2f8   : > { %v1648_v55 = vrot.slane %v1493_v52, 4 }
 0x2f9   : > { %v1341_v58 = vpop.f32.mrf.mxu1  ;;  %2149 = vmatpush.bf16.msrb.mxu0 %v5635_v4 }
 0x2fa   : > { %v1342_v60 = vadd.f32 %v1341_v58, %v7119_v6  ;;  %v1649_v61 = vsel %vm1516_vm4, %v1647_v5, %v1648_v55 }
 0x2fb   : > { %v1440_v28 = vpop.f32.mrf.mxu3  ;;  %1656 = vrot.lane.b32.xlu2 %v1649_v61, %s9638_s29 }
 0x2fc   : > { %v1441_v63 = vadd.f32 %v1440_v28, %v1342_v60 }
 0x2fd   : > { %v1554_v17 = vpop.permute.xlu1 %1553  ;;  %2150 = vmatpush.bf16.msrb.mxu0 %v5623_v12 }
 0x2fe   : > { %v1494_v7 = vmax.f32 %v1441_v63, 0.0  ;;  %1569 = vst.msk [vmem:[#allocation3] sm:$0xff] %vm1568_vm6, %v1554_v17 }
 0x300   : > { %v7404_v6 = vrot.slane %v1494_v7, 4 }
 0x301   : > { %v1343_v11 = vpop.f32.mrf.mxu1  ;;  %2151 = vmatpush.bf16.msrb.mxu0 %v5611_v57 }
 0x302   : > { %v1651_v13 = vsel %vm1516_vm4, %v1648_v55, %v7404_v6  ;;  %v1344_v24 = vadd.f32 %v1343_v11, %v7188_v53 }
 0x303   : > { %v1442_v14 = vpop.f32.mrf.mxu3  ;;  %1658 = vrot.lane.b32.xlu0 %v1651_v13, %s9638_s29 }
 0x304   : > { %v1443_v28 = vadd.f32 %v1442_v14, %v1344_v24 }
 0x305   : > { %2152 = vmatpush.bf16.msrb.mxu0 %v5599_v25 }
 0x306   : > { %v1495_v53 = vmax.f32 %v1443_v28, 0.0 }
 0x308   : > { %v7464_v7 = vrot.slane %v1495_v53, 4 }
 0x309   : > { %v1346_v23 = vpop.f32.mrf.mxu1  ;;  %2153 = vmatpush.bf16.msrb.mxu0 %v5587_v9 }
 0x30a   : > { %v1347_v59 = vadd.f32 %v1346_v23, %v7358_v62 }
 0x30b   : > { %v1445_v26 = vpop.f32.mrf.mxu3  ;;  %1627 = vrot.lane.b32.xlu0 %v1491_v21, %s9646_s16 }
 0x30c   : > { %v1446_v56 = vadd.f32 %v1445_v26, %v1347_v59 }
 0x30d   : > { %2154 = vmatpush.bf16.msrb.mxu0 %v5575_v38 }
 0x30e   : > { %v1496_v0 = vmax.f32 %v1446_v56, 0.0 }
 0x310   : > { %v7460_v1 = vrot.slane %v1496_v0, 4 }
 0x311   : > { %v1348_v32 = vpop.f32.mrf.mxu1  ;;  %2155 = vmatpush.bf16.msrb.mxu0 %v5563_v48 }
 0x312   : > { %v1349_v34 = vadd.f32 %v1348_v32, %v7341_v54  ;;  %v1560_v36 = vpop.permute.xlu0 %1559  ;;  %v1655_v8 = vsel %vm1516_vm4, %v7464_v7, %v7460_v1 }
 0x313   : > { %1572 = vst.msk [vmem:[#allocation3 + $0x48] sm:$0xff] %vm1568_vm6, %v1560_v36  ;;  %v1447_v41 = vpop.f32.mrf.mxu3 }
 0x314   : > { %v1448_v42 = vadd.f32 %v1447_v41, %v1349_v34 }
 0x316   : > { %v1497_v44 = vmax.f32 %v1448_v42, 0.0 }
 0x318   : > { %1683 = vrot.lane.b32.xlu1 %v1497_v44, %s9644_s23 }
 0x319   : > { %v1351_v54 = vpop.f32.mrf.mxu1 }
 0x31a   : > { %v1352_v50 = vadd.f32 %v1351_v54, %v7173_v35  ;;  %v1490_v35 = vmax.f32 %v7372_v29, 0.0 }
 0x31b   : > { %v1450_v52 = vpop.f32.mrf.mxu3 }
 0x31c   : > { %v1451_v5 = vadd.f32 %v1450_v52, %v1352_v50 }
 0x31e   : > { %v1498_v55 = vmax.f32 %v1451_v5, 0.0 }
 0x320   : > { %1685 = vrot.lane.b32.xlu2 %v1498_v55, %s9644_s23 }
 0x321   : > { %v1353_v58 = vpop.f32.mrf.mxu1 }
 0x322   : > { %v1354_v30 = vadd.f32 %v1353_v58, %v7376_v39 }
 0x323   : > { %v1452_v60 = vpop.f32.mrf.mxu3 }
 0x324   : > { %v1597_v61 = vpop.permute.xlu2 %1596  ;;  %v1453_v36 = vadd.f32 %v1452_v60, %v1354_v30  ;;  %v5766_v30 = vld [vmem:[%s9626_s5 + $0x198] sm:$0xf] }
 0x325   : > { %1615 = vst.msk [vmem:[#allocation3 + $0x68] sm:$0xf] %vm1614_vm7, %v1597_v61  ;;  %v1589_v63 = vpop.permute.xlu0 %1588 }
 0x326   : > { %1604 = vst.msk [vmem:[#allocation3] sm:$0xff] %vm9666_vm8, %v1589_v63  ;;  %v1499_v43 = vmax.f32 %v1453_v36, 0.0  ;;  %v6466_v36 = vld [vmem:[%s9626_s5 + $0x188] sm:$0xf0] }
 0x327   : > { %1605 = vst.msk [vmem:[#allocation3 + $0x8] sm:$0xff] %vm9665_vm0, %v1589_v63 }
 0x328   : > { %1625 = vrot.lane.b32.xlu2 %v1490_v35, %s9646_s16 }
 0x329   : > { %v7458_v62 = vpop.f32.mrf.mxu1 }
 0x32a   : > { %v1357_v59 = vadd.f32 %v7458_v62, %v7339_v51  ;;  %v5742_v62 = vld [vmem:[%s9626_s5 + $0x168] sm:$0xf] }
 0x32b   : > { %v7462_v17 = vpop.f32.mrf.mxu3 }
 0x32c   : > { %v1595_v4 = vpop.permute.xlu2 %1594  ;;  %v1456_v63 = vadd.f32 %v7462_v17, %v1357_v59  ;;  %v6463_v17 = vld [vmem:[%s9626_s5 + $0x170] sm:$0xf0]  ;;  %v5732_v59 = vld [vmem:[%s9626_s5 + $0x15c] sm:$0xf0] }
 0x32d   : > { %1610 = vst.msk [vmem:[#allocation3 + $0x48] sm:$0xff] %vm9666_vm8, %v1595_v4  ;;  %v1591_v29 = vpop.permute.xlu1 %1590  ;;  %v1535_v40 = vpop.permute.xlu0 %1534  ;;  %v1747_v14 = vld [vmem:[#allocation3] sm:$0xff] }
 0x32e   : > { %1611 = vst.msk [vmem:[#allocation3 + $0x50] sm:$0xff] %vm9665_vm0, %v1595_v4  ;;  %v5743_v4 = vor.u32 %v6463_v17, %v5742_v62  ;;  %v6429_v62 = vld [vmem:[%s9626_s5 + $0x64] sm:$0xf]  ;;  %v5612_v17 = vld [vmem:[%s9626_s5 + $0x6c] sm:$0xf0] }
 0x32f   : > { %1606 = vst.msk [vmem:[#allocation3 + $0x18] sm:$0xff] %vm9666_vm8, %v1591_v29 }
 0x330   : > { %1607 = vst.msk [vmem:[#allocation3 + $0x20] sm:$0xff] %vm9665_vm0, %v1591_v29  ;;  %1662 = vrot.lane.b32.xlu2 %v1655_v8, %s9638_s29  ;;  %2171 = vmatpush.bf16.msrb.mxu2 %v5743_v4 }
 0x331   : > { %1547 = vst.msk [vmem:[#allocation3 + $0x60] sm:$0xf] %vm1546_vm9, %v1535_v40  ;;  %v1358_v10 = vpop.f32.mrf.mxu1 }
 0x332   : > { %v1359_v12 = vadd.f32 %v1358_v10, %v7325_v37 }
 0x333   : > { %v1457_v11 = vpop.f32.mrf.mxu3 }
 0x334   : > { %v7480_v18 = vadd.f32 %v1457_v11, %v1359_v12  ;;  %v1756_v41 = vld [vmem:[#allocation3 + $0x48] sm:$0xff]  ;;  %v5718_v12 = vld [vmem:[%s9626_s5 + $0x138] sm:$0xf] }
 0x335   : > { %v1562_v13 = vpop.permute.xlu1 %1561 }
 0x336   : > { %1574 = vst.msk [vmem:[#allocation3 + $0x60] sm:$0xf] %vm9653_vm10, %v1562_v13  ;;  %v1750_v2 = vld [vmem:[#allocation3 + $0x18] sm:$0xff]  ;;  %v1501_v37 = vmax.f32 %v7480_v18, 0.0  ;;  %v6457_v13 = vld [vmem:[%s9626_s5 + $0x140] sm:$0xf0] }
 0x337   : > { %1613 = vst.msk [vmem:[#allocation3 + $0x60] sm:$0xf] %vm9648_vm11, %v1597_v61  ;;  %v7478_v16 = vpack.c.bf16 %v1750_v2, %v1747_v14  ;;  %v5706_v14 = vld [vmem:[%s9626_s5 + $0x120] sm:$0xf]  ;;  %v5719_v2 = vor.u32 %v6457_v13, %v5718_v12  ;;  %v6454_v18 = vld [vmem:[%s9626_s5 + $0x128] sm:$0xf0] }
 0x338   : > { %v1709_v26 = vrot.slane %v1501_v37, 4  ;;  %vm9650_vm11 = vcmask 1048544   ;;  %v6450_v13 = vld [vmem:[%s9626_s5 + $0x10c] sm:$0xf]  ;;  %vm9656_vm10 = vcmask 257024  }
 0x339   : > { %2156 = vmatmul.bf16.vlgmr.msrb.gmra.mxu0 %v7478_v16  ;;  %v1361_v57 = vpop.f32.mrf.mxu1 }
 0x33a   : > { %v1362_v19 = vadd.f32 %v1361_v57, %v7154_v22  ;;  %v5707_v57 = vor.u32 %v6454_v18, %v5706_v14  ;;  %v5696_v14 = vld [vmem:[%s9626_s5 + $0x114] sm:$0xf0]  ;;  %v6426_v18 = vld [vmem:[%s9626_s5 + $0x4c] sm:$0xf] }
 0x33b   : > { %v1460_v15 = vpop.f32.mrf.mxu3 }
 0x33c   : > { %v1461_v21 = vadd.f32 %v1460_v15, %v1362_v19  ;;  %v5694_v19 = vld [vmem:[%s9626_s5 + $0x108] sm:$0xf]  ;;  %v6451_v15 = vld [vmem:[%s9626_s5 + $0x110] sm:$0xf0] }
 0x33d   : > { %v1593_v23 = vpop.permute.xlu1 %1592 }
 0x33e   : > { %v1502_v25 = vmax.f32 %v1461_v21, 0.0  ;;  %1608 = vst.msk [vmem:[#allocation3 + $0x30] sm:$0xff] %vm9666_vm8, %v1593_v23  ;;  %v1759_v28 = vld [vmem:[#allocation3 + $0x60] sm:$0xf]  ;;  %v5682_v21 = vld [vmem:[%s9626_s5 + $0xf0] sm:$0xf] }
 0x33f   : > { %1609 = vst.msk [vmem:[#allocation3 + $0x38] sm:$0xff] %vm9665_vm0, %v1593_v23  ;;  %v6448_v23 = vld [vmem:[%s9626_s5 + $0xf8] sm:$0xf0] }
 0x340   : > { %v1710_v46 = vrot.slane %v1502_v25, 4  ;;  %v5683_v25 = vor.u32 %v6448_v23, %v5682_v21  ;;  %v6423_v21 = vld [vmem:[%s9626_s5 + $0x34] sm:$0xf]  ;;  %v5588_v23 = vld [vmem:[%s9626_s5 + $0x3c] sm:$0xf0] }
 0x341   : > { %v1363_v9 = vpop.f32.mrf.mxu1 }
 0x342   : > { %v1364_v32 = vadd.f32 %v1363_v9, %v7171_v33  ;;  %v1622_v47 = vpop.permute.xlu0 %1621  ;;  %v1711_v22 = vsel %vm1516_vm4, %v1709_v26, %v1710_v46  ;;  %v5670_v26 = vld [vmem:[%s9626_s5 + $0xd8] sm:$0xf] }
 0x343   : > { %1637 = vst.msk [vmem:[#allocation3 + $0x8] sm:$0xff] %vm1636_vm12, %v1622_v47  ;;  %v1462_v20 = vpop.f32.mrf.mxu3  ;;  %1718 = vrot.lane.b32.xlu0 %v1711_v22, %s9642_s24  ;;  %v5658_v47 = vld [vmem:[%s9626_s5 + $0xc0] sm:$0xf]  ;;  %v6442_v22 = vld [vmem:[%s9626_s5 + $0xc8] sm:$0xf0] }
 0x344   : > { %v1463_v34 = vadd.f32 %v1462_v20, %v1364_v32  ;;  %v6469_v32 = vld [vmem:[%s9626_s5 + $0x1a0] sm:$0xf0] }
 0x345   : > { %v1753_v38 = vld [vmem:[#allocation3 + $0x30] sm:$0xff]  ;;  %v5767_v20 = vor.u32 %v6469_v32, %v5766_v30  ;;  %v5591_v30 = vor.u32 %v6423_v21, %v5588_v23  ;;  %v5672_v32 = vld [vmem:[%s9626_s5 + $0xe4] sm:$0xf0]  ;;  %v6465_v21 = vld [vmem:[%s9626_s5 + $0x184] sm:$0xf] }
 0x346   : > { %v1503_v42 = vmax.f32 %v1463_v34, 0.0  ;;  %v7492_v49 = vpack.c.bf16 %v1756_v41, %v1753_v38  ;;  %v5754_v34 = vld [vmem:[%s9626_s5 + $0x180] sm:$0xf]  ;;  %v5659_v38 = vor.u32 %v6442_v22, %v5658_v47  ;;  %v6420_v22 = vld [vmem:[%s9626_s5 + $0x1c] sm:$0xf] }
 0x347   : > { %2200 = vmatpush.bf16.msra.mxu0 %v5767_v20  ;;  %v5755_v41 = vor.u32 %v6466_v36, %v5754_v34  ;;  %v5576_v20 = vld [vmem:[%s9626_s5 + $0x24] sm:$0xf0]  ;;  %v5582_v23 = vld [vmem:[%s9626_s5 + $0x20] sm:$0xf] }
 0x348   : > { %v1712_v39 = vrot.slane %v1503_v42, 4  ;;  %v5579_v36 = vor.u32 %v6420_v22, %v5576_v20  ;;  %v5750_v20 = vld [vmem:[%s9626_s5 + $0x170] sm:$0xf] }
 0x349   : > { %2161 = vmatmul.bf16.gmra.mxu0 %v7492_v49  ;;  %v1366_v33 = vpop.f32.mrf.mxu1 }
 0x34a   : > { %v1367_v44 = vadd.f32 %v1366_v33, %v7314_v31  ;;  %v1624_v48 = vpop.permute.xlu1 %1623  ;;  %v1713_v54 = vsel %vm1516_vm4, %v1710_v46, %v1712_v39  ;;  %v1653_v31 = vsel %vm1516_vm4, %v7404_v6, %v7464_v7  ;;  %v1500_v6 = vmax.f32 %v1456_v63, 0.0  ;;  %v6445_v46 = vld [vmem:[%s9626_s5 + $0xe0] sm:$0xf0]  ;;  %v6462_v33 = vld [vmem:[%s9626_s5 + $0x16c] sm:$0xf] }
 0x34b   : > { %1638 = vst.msk [vmem:[#allocation3 + $0x20] sm:$0xff] %vm1636_vm12, %v1624_v48  ;;  %v1465_v50 = vpop.f32.mrf.mxu3  ;;  %1720 = vrot.lane.b32.xlu1 %v1713_v54, %s9642_s24  ;;  %1687 = vrot.lane.b32.xlu0 %v1499_v43, %s9644_s23  ;;  %v5671_v9 = vor.u32 %v6445_v46, %v5670_v26  ;;  %v6438_v54 = vld [vmem:[%s9626_s5 + $0xac] sm:$0xf] }
 0x34c   : > { %v1466_v52 = vadd.f32 %v1465_v50, %v1367_v44  ;;  %2201 = vmatpush.bf16.msra.mxu0 %v5755_v41  ;;  %v5744_v44 = vld [vmem:[%s9626_s5 + $0x174] sm:$0xf0]  ;;  %v5660_v41 = vld [vmem:[%s9626_s5 + $0xcc] sm:$0xf0] }
 0x34d   : > { %v5747_v48 = vor.u32 %v6462_v33, %v5744_v44  ;;  %v5648_v50 = vld [vmem:[%s9626_s5 + $0xb4] sm:$0xf0] }
 0x34e   : > { %v1504_v5 = vmax.f32 %v1466_v52, 0.0  ;;  %v5651_v52 = vor.u32 %v6438_v54, %v5648_v50 }
 0x350   : > { %v1714_v55 = vrot.slane %v1504_v5, 4  ;;  %2240 = vmatpush.bf16.msrb.mxu0 %v5747_v48 }
 0x351   : > { %v1368_v24 = vpop.f32.mrf.mxu1 }
 0x352   : > { %v1369_v58 = vadd.f32 %v1368_v24, %v7370_v27  ;;  %v1715_v56 = vsel %vm1516_vm4, %v1712_v39, %v1714_v55  ;;  %v7511_v27 = vpack.c.bf16 %v1759_v28, %v1759_v28  ;;  %v5720_v28 = vld [vmem:[%s9626_s5 + $0x144] sm:$0xf0] }
 0x353   : > { %v1467_v60 = vpop.f32.mrf.mxu3  ;;  %1660 = vrot.lane.b32.xlu1 %v1653_v31, %s9638_s29  ;;  %1722 = vrot.lane.b32.xlu2 %v1715_v56, %s9642_s24  ;;  %v6435_v31 = vld [vmem:[%s9626_s5 + $0x94] sm:$0xf]  ;;  %v5636_v56 = vld [vmem:[%s9626_s5 + $0x9c] sm:$0xf0] }
 0x354   : > { %v1468_v61 = vadd.f32 %v1467_v60, %v1369_v58  ;;  %v5639_v60 = vor.u32 %v6435_v31, %v5636_v56 }
 0x355   : > { %v1657_v51 = vpop.permute.xlu2 %1656 }
 0x356   : > { %v1505_v35 = vmax.f32 %v1468_v61, 0.0  ;;  %1672 = vst.msk [vmem:[#allocation3 + $0x8] sm:$0xff] %vm9651_vm13, %v1657_v51  ;;  %v6456_v61 = vld [vmem:[%s9626_s5 + $0x13c] sm:$0xf] }
 0x357   : > { %v5723_v63 = vor.u32 %v6456_v61, %v5720_v28  ;;  %v6432_v51 = vld [vmem:[%s9626_s5 + $0x7c] sm:$0xf] }
 0x358   : > { %v1716_v0 = vrot.slane %v1505_v35, 4  ;;  %v5624_v35 = vld [vmem:[%s9626_s5 + $0x84] sm:$0xf0] }
 0x359   : > { %2166 = vmatmul.bf16.gmra.mxu0 %v7511_v27 }
 0x35a   : > { %v1717_v53 = vsel %vm1516_vm4, %v1714_v55, %v1716_v0  ;;  %v6459_v55 = vld [vmem:[%s9626_s5 + $0x154] sm:$0xf] }
 0x35b   : > { %1689 = vrot.lane.b32.xlu1 %v1500_v6, %s9644_s23  ;;  %1724 = vrot.lane.b32.xlu0 %v1717_v53, %s9642_s24  ;;  %v5735_v58 = vor.u32 %v6459_v55, %v5732_v59  ;;  %v6453_v6 = vld [vmem:[%s9626_s5 + $0x124] sm:$0xf]  ;;  %v5708_v53 = vld [vmem:[%s9626_s5 + $0x12c] sm:$0xf0] }
 0x35c   : > { %1664 = vrot.lane.b32.xlu2 %v7460_v1, %s9638_s29  ;;  %v5730_v1 = vld [vmem:[%s9626_s5 + $0x150] sm:$0xf]  ;;  %s9671_s29 = smov 16  }
 0x35d   : > { %2241 = vmatpush.bf16.msrb.mxu0 %v5735_v58 }
 0x361   : > { %2242 = vmatpush.bf16.msrb.mxu0 %v5723_v63 }
 0x363   : > { %1629 = vrot.lane.b32.xlu1 %v1492_v45, %s9646_s16  ;;  %1691 = vrot.lane.b32.xlu0 %v1501_v37, %s9644_s23  ;;  %v5731_v45 = vor.u32 %v6460_v3, %v5730_v1  ;;  %v5695_v37 = vor.u32 %v6451_v15, %v5694_v19  ;;  %v5711_v1 = vor.u32 %v6453_v6, %v5708_v53  ;;  %v6447_v19 = vld [vmem:[%s9626_s5 + $0xf4] sm:$0xf]  ;;  %v6440_v6 = vld [vmem:[%s9626_s5 + $0xb8] sm:$0xf0]  ;;  %s9670_s23 = smov 108  }
 0x365   : > { %2172 = vmatpush.bf16.msrb.mxu2 %v5731_v45  ;;  %2243 = vmatpush.bf16.msrb.mxu0 %v5711_v1 }
 0x369   : > { %2173 = vmatpush.bf16.msrb.mxu2 %v5719_v2  ;;  %v5699_v2 = vor.u32 %v6450_v13, %v5696_v14  ;;  %v6428_v13 = vld [vmem:[%s9626_s5 + $0x58] sm:$0xf0] }
 0x36b   : > { %1726 = vrot.lane.b32.xlu1 %v1716_v0, %s9642_s24  ;;  %v5627_v0 = vor.u32 %v6432_v51, %v5624_v35  ;;  %2244 = vmatpush.bf16.msrb.mxu0 %v5699_v2  ;;  %v5594_v2 = vld [vmem:[%s9626_s5 + $0x38] sm:$0xf]  ;;  %s9695_s24 = smov 36  }
 0x36d   : > { %2174 = vmatpush.bf16.msrb.mxu2 %v5707_v57  ;;  %v5600_v57 = vld [vmem:[%s9626_s5 + $0x54] sm:$0xf0] }
 0x36e   : > { %v5603_v15 = vor.u32 %v6426_v18, %v5600_v57  ;;  %v6425_v18 = vld [vmem:[%s9626_s5 + $0x40] sm:$0xf0]  ;;  %v6468_v57 = vld [vmem:[%s9626_s5 + $0x19c] sm:$0xf] }
 0x371   : > { %2175 = vmatpush.bf16.msrb.mxu2 %v5695_v37  ;;  %v5684_v37 = vld [vmem:[%s9626_s5 + $0xfc] sm:$0xf0] }
 0x375   : > { %v1659_v7 = vpop.permute.xlu0 %1658  ;;  %2176 = vmatpush.bf16.msrb.mxu2 %v5683_v25  ;;  %v5687_v25 = vor.u32 %v6447_v19, %v5684_v37  ;;  %v5768_v19 = vld [vmem:[%s9626_s5 + $0x1a4] sm:$0xf0] }
 0x376   : > { %1673 = vst.msk [vmem:[#allocation3 + $0x20] sm:$0xff] %vm9651_vm13, %v1659_v7  ;;  %v5771_v37 = vor.u32 %v6468_v57, %v5768_v19 }
 0x377   : > { %2245 = vmatpush.bf16.msrb.mxu0 %v5687_v25  ;;  %v6422_v25 = vld [vmem:[%s9626_s5 + $0x28] sm:$0xf0] }
 0x379   : > { %2177 = vmatpush.bf16.msrb.mxu2 %v5671_v9  ;;  %v6444_v9 = vld [vmem:[%s9626_s5 + $0xdc] sm:$0xf] }
 0x37a   : > { %v1686_v29 = vpop.permute.xlu2 %1685  ;;  %v5675_v34 = vor.u32 %v6444_v9, %v5672_v32  ;;  %v5570_v9 = vld [vmem:[%s9626_s5 + $0x8] sm:$0xf]  ;;  %v6419_v32 = vld [vmem:[%s9626_s5 + $0x10] sm:$0xf0] }
 0x37b   : > { %1700 = vst.msk [vmem:[#allocation3 + $0x20] sm:$0xff] %vm9649_vm14, %v1686_v29  ;;  %v5615_v29 = vor.u32 %v6429_v62, %v5612_v17  ;;  %v5642_v62 = vld [vmem:[%s9626_s5 + $0x98] sm:$0xf]  ;;  %v6437_v17 = vld [vmem:[%s9626_s5 + $0xa0] sm:$0xf0]  ;;  %v5571_v22 = vor.u32 %v6419_v32, %v5570_v9 }
 0x37c   : > { %2246 = vmatpush.bf16.msrb.mxu0 %v5675_v34  ;;  %v5643_v1 = vor.u32 %v6437_v17, %v5642_v62  ;;  %v6464_v34 = vld [vmem:[%s9626_s5 + $0x178] sm:$0xf0]  ;;  %v5762_v62 = vld [vmem:[%s9626_s5 + $0x188] sm:$0xf]  ;;  %v6467_v17 = vld [vmem:[%s9626_s5 + $0x190] sm:$0xf0] }
 0x37d   : > { %v1628_v40 = vpop.permute.xlu0 %1627  ;;  %2178 = vmatpush.bf16.msrb.mxu2 %v5659_v38  ;;  %v6441_v38 = vld [vmem:[%s9626_s5 + $0xc4] sm:$0xf] }
 0x37e   : > { %1640 = vst.msk [vmem:[#allocation3 + $0x50] sm:$0xff] %vm1636_vm12, %v1628_v40  ;;  %v5663_v33 = vor.u32 %v6441_v38, %v5660_v41  ;;  %v5751_v38 = vor.u32 %v6464_v34, %v5750_v20  ;;  %v6461_v41 = vld [vmem:[%s9626_s5 + $0x160] sm:$0xf0] }
 0x380   : > { %2247 = vmatpush.bf16.msrb.mxu0 %v5663_v33  ;;  %v6458_v33 = vld [vmem:[%s9626_s5 + $0x148] sm:$0xf0] }
 0x381   : > { %2217 = vmatpush.bf16.msra.mxu2 %v5651_v52 }
 0x382   : > { %v1626_v8 = vpop.permute.xlu2 %1625 }
 0x383   : > { %1639 = vst.msk [vmem:[#allocation3 + $0x38] sm:$0xff] %vm1636_vm12, %v1626_v8 }
 0x385   : > { %2218 = vmatpush.bf16.msra.mxu2 %v5639_v60 }
 0x389   : > { %2219 = vmatpush.bf16.msra.mxu2 %v5627_v0  ;;  %v5654_v0 = vld [vmem:[%s9626_s5 + $0xb0] sm:$0xf] }
 0x38a   : > { %v1684_v10 = vpop.permute.xlu1 %1683  ;;  %v1663_v11 = vpop.permute.xlu2 %1662  ;;  %v5655_v53 = vor.u32 %v6440_v6, %v5654_v0  ;;  %v5678_v0 = vld [vmem:[%s9626_s5 + $0xe0] sm:$0xf]  ;;  %v6446_v6 = vld [vmem:[%s9626_s5 + $0xe8] sm:$0xf0] }
 0x38b   : > { %1699 = vst.msk [vmem:[#allocation3 + $0x8] sm:$0xff] %vm9649_vm14, %v1684_v10 }
 0x38c   : > { %1675 = vst.msk [vmem:[#allocation3 + $0x50] sm:$0xff] %vm9651_vm13, %v1663_v11 }
 0x38d   : > { %2220 = vmatpush.bf16.msra.mxu2 %v5615_v29  ;;  %v6431_v29 = vld [vmem:[%s9626_s5 + $0x70] sm:$0xf0] }
 0x391   : > { %2221 = vmatpush.bf16.msra.mxu2 %v5603_v15  ;;  %v5595_v15 = vor.u32 %v6425_v18, %v5594_v2 }
 0x395   : > { %2222 = vmatpush.bf16.msra.mxu2 %v5591_v30  ;;  %v5583_v30 = vor.u32 %v6422_v25, %v5582_v23 }
 0x399   : > { %2223 = vmatpush.bf16.msra.mxu2 %v5579_v36  ;;  %v5738_v36 = vld [vmem:[%s9626_s5 + $0x158] sm:$0xf] }
 0x3ad   : > { %v1723_v42 = vpop.permute.xlu2 %1722 }
 0x3ae   : > { %1740 = vst.msk [vmem:[#allocation3 + $0x40] sm:$0xff] %vm1735_vm15, %v1723_v42 }
 0x3b5   : > { %v1719_v39 = vpop.permute.xlu0 %1718  ;;  %v1755_v59 = vld [vmem:[#allocation3 + $0x40] sm:$0xff] }
 0x3b6   : > { %1734 = vst.msk [vmem:[#allocation3 + $0x8] sm:$0xff] %vm9650_vm11, %v1719_v39  ;;  %v7592_v43 = vpop.f32.mrf.mxu0  ;;  %v1665_v48 = vpop.permute.xlu2 %1664 }
 0x3b7   : > { %1736 = vst.msk [vmem:[#allocation3 + $0x10] sm:$0xff] %vm1735_vm15, %v1719_v39  ;;  %v5564_v39 = vld [vmem:[%s9626_s5 + $0xc] sm:$0xf0] }
 0x3bd   : > { %v1721_v5 = vpop.permute.xlu1 %1720  ;;  %v1688_v4 = vpop.permute.xlu0 %1687  ;;  %v1748_v45 = vld [vmem:[#allocation3 + $0x8] sm:$0xff] }
 0x3be   : > { %1737 = vst.msk [vmem:[#allocation3 + $0x20] sm:$0xff] %vm9650_vm11, %v1721_v5  ;;  %v7614_v24 = vpop.f32.mrf.mxu0  ;;  %v1749_v10 = vld [vmem:[#allocation3 + $0x10] sm:$0xff] }
 0x3bf   : > { %1738 = vst.msk [vmem:[#allocation3 + $0x28] sm:$0xff] %vm1735_vm15, %v1721_v5 }
 0x3c5   : > { %v1661_v3 = vpop.permute.xlu1 %1660  ;;  %v1751_v7 = vld [vmem:[#allocation3 + $0x20] sm:$0xff] }
 0x3c6   : > { %1674 = vst.msk [vmem:[#allocation3 + $0x38] sm:$0xff] %vm9651_vm13, %v1661_v3  ;;  %v7648_v40 = vpop.f32.mrf.mxu0  ;;  %v7650_v8 = vpack.c.bf16 %v1751_v7, %v1748_v45  ;;  %v1752_v11 = vld [vmem:[#allocation3 + $0x28] sm:$0xff]  ;;  %vm1703_vm13 = vcmask 1011392  }
 0x3c7   : > { %1701 = vst.msk [vmem:[#allocation3 + $0x38] sm:$0xff] %vm9649_vm14, %v1688_v4  ;;  %v7653_v12 = vpack.c.bf16 %v1752_v11, %v1749_v10  ;;  %v5630_v4 = vld [vmem:[%s9626_s5 + $0x80] sm:$0xf]  ;;  %v6434_v3 = vld [vmem:[%s9626_s5 + $0x88] sm:$0xf0] }
 0x3c8   : > { %1739 = vst.msk [vmem:[#allocation3 + $0x38] sm:$0xff] %vm9650_vm11, %v1723_v42  ;;  %2179 = vmatmul.bf16.vlgmr.msrb.gmra.mxu2 %v7650_v8  ;;  %v6417_v42 = vld [vmem:[%s9626_s5 + $0x4] sm:$0xf]  ;;  %v5631_v45 = vor.u32 %v6434_v3, %v5630_v4  ;;  %v5618_v7 = vld [vmem:[%s9626_s5 + $0x68] sm:$0xf] }
 0x3c9   : > { %5776 = vmatmul.msk.bf16.vlgmr.msra.gmra.mxu0 %vm1735_vm15, %v7653_v12  ;;  %v5567_v5 = vor.u32 %v6417_v42, %v5564_v39  ;;  %v5619_v10 = vor.u32 %v6431_v29, %v5618_v7  ;;  %v5606_v11 = vld [vmem:[%s9626_s5 + $0x50] sm:$0xf]  ;;  %v5739_v42 = vor.u32 %v6461_v41, %v5738_v36  ;;  %v5726_v39 = vld [vmem:[%s9626_s5 + $0x140] sm:$0xf]  ;;  %v5666_v4 = vld [vmem:[%s9626_s5 + $0xc8] sm:$0xf] }
 0x3ca   : > { %2286 = vmatpush.bf16.msra.mxu0 %v5655_v53  ;;  %v5607_v14 = vor.u32 %v6428_v13, %v5606_v11  ;;  %v5679_v53 = vor.u32 %v6446_v6, %v5678_v0  ;;  %v6443_v3 = vld [vmem:[%s9626_s5 + $0xd0] sm:$0xf0]  ;;  %v7868_v7 = vld [vmem:[%s9627_s6] sm:$0x7] }
 0x3cb   : > { %2224 = vmatpush.bf16.msra.mxu2 %v5567_v5  ;;  %v5702_v5 = vld [vmem:[%s9626_s5 + $0x110] sm:$0xf]  ;;  %v1845_v29 = vperm.slane %v7868_v7, 0 }
 0x3cd   : > { %v1690_v26 = vpop.permute.xlu1 %1689  ;;  %v1725_v46 = vpop.permute.xlu0 %1724  ;;  %v2158_v11 = vadd.f32 %v7592_v43, %v1845_v29  ;;  %v2160_v57 = vadd.f32 %v7614_v24, %v1845_v29 }
 0x3ce   : > { %1702 = vst.msk [vmem:[#allocation3 + $0x50] sm:$0xff] %vm9649_vm14, %v1690_v26  ;;  %v7690_v47 = vpop.f32.mrf.mxu0  ;;  %vm9652_vm14 = vcmask 420992   ;;  %2287 = vmatpush.bf16.msra.mxu0 %v5643_v1  ;;  %v5756_v26 = vld [vmem:[%s9626_s5 + $0x18c] sm:$0xf0]  ;;  %v5763_v1 = vor.u32 %v6467_v17, %v5762_v62 }
 0x3cf   : > { %1741 = vst.msk [vmem:[#allocation3 + $0x50] sm:$0xff] %vm9650_vm11, %v1725_v46  ;;  %vm1676_vm11 = vcmask 716192   ;;  %v1754_v50 = vld [vmem:[#allocation3 + $0x38] sm:$0xff]  ;;  %2269 = vmatpush.bf16.msrb.mxu2 %v5771_v37 }
 0x3d0   : > { %1742 = vst.msk [vmem:[#allocation3 + $0x58] sm:$0xff] %vm1735_vm15, %v1725_v46  ;;  %v5759_v46 = vor.u32 %v6465_v21, %v5756_v26 }
 0x3d2   : > { %2288 = vmatpush.bf16.msra.mxu0 %v5631_v45  ;;  %v5667_v45 = vor.u32 %v6443_v3, %v5666_v4 }
 0x3d3   : > { %2270 = vmatpush.bf16.msrb.mxu2 %v5759_v46 }
 0x3d5   : > { %v1630_v44 = vpop.permute.xlu1 %1629  ;;  %v1692_v55 = vpop.permute.xlu0 %1691 }
 0x3d6   : > { %1642 = vst.msk [vmem:[#allocation3 + $0x68] sm:$0xf] %vm9652_vm14, %v1630_v44  ;;  %v7713_v54 = vpop.f32.mrf.mxu0  ;;  %v1757_v52 = vld [vmem:[#allocation3 + $0x50] sm:$0xff]  ;;  %vm1743_vm14 = vcmask 1044448   ;;  %2289 = vmatpush.bf16.msra.mxu0 %v5619_v10  ;;  %v5727_v44 = vor.u32 %v6458_v33, %v5726_v39 }
 0x3d7   : > { %1677 = vst.msk [vmem:[#allocation3 + $0x68] sm:$0xf] %vm1676_vm11, %v1665_v48  ;;  %v1758_v58 = vld [vmem:[#allocation3 + $0x58] sm:$0xff]  ;;  %v7716_v31 = vpack.c.bf16 %v1757_v52, %v1754_v50  ;;  %v5714_v48 = vld [vmem:[%s9626_s5 + $0x128] sm:$0xf] }
 0x3d8   : > { %1704 = vst.msk [vmem:[#allocation3 + $0x68] sm:$0xf] %vm1703_vm13, %v1692_v55  ;;  %v7719_v56 = vpack.c.bf16 %v1758_v58, %v1755_v59  ;;  %v6455_v50 = vld [vmem:[%s9626_s5 + $0x130] sm:$0xf0]  ;;  %v6452_v55 = vld [vmem:[%s9626_s5 + $0x118] sm:$0xf0] }
 0x3d9   : > { %2184 = vmatmul.bf16.gmra.mxu2 %v7716_v31  ;;  %v5715_v52 = vor.u32 %v6455_v50, %v5714_v48  ;;  %v5703_v59 = vor.u32 %v6452_v55, %v5702_v5  ;;  %v5690_v58 = vld [vmem:[%s9626_s5 + $0xf8] sm:$0xf]  ;;  %v1846_v55 = vperm.slane %v7868_v7, 1 }
 0x3da   : > { %5777 = vmatmul.msk.bf16.gmra.mxu0 %vm1735_vm15, %v7719_v56 }
 0x3db   : > { %2290 = vmatpush.bf16.msra.mxu0 %v5607_v14 }
 0x3dd   : > { %v1727_v60 = vpop.permute.xlu1 %1726 }
 0x3de   : > { %1744 = vst.msk [vmem:[#allocation3 + $0x68] sm:$0xf] %vm1743_vm14, %v1727_v60  ;;  %v2169_v61 = vpop.f32.mrf.mxu0 }
 0x3df   : > { %1746 = vst.msk [vmem:[#allocation3 + $0x70] sm:$0xf] %vm9656_vm10, %v1727_v60  ;;  %2291 = vmatpush.bf16.msra.mxu0 %v5595_v15  ;;  %v6449_v60 = vld [vmem:[%s9626_s5 + $0x100] sm:$0xf0]  ;;  %v5774_v61 = vld [vmem:[%s9626_s5 + $0x1a0] sm:$0xf] }
 0x3e0   : > { %vm2545_vm10 = vcmask 31744  }
 0x3e3   : > { %2292 = vmatpush.bf16.msra.mxu0 %v5583_v30 }
 0x3e5   : > { %v1760_v28 = vld [vmem:[#allocation3 + $0x68] sm:$0xf] }
 0x3e6   : > { %v1761_v63 = vld [vmem:[#allocation3 + $0x70] sm:$0xf]  ;;  %v7726_v51 = vpack.c.bf16 %v1760_v28, %v1760_v28  ;;  %v6470_v28 = vld [vmem:[%s9626_s5 + $0x1a8] sm:$0xf0] }
 0x3e7   : > { %v7728_v35 = vpack.c.bf16 %v1761_v63, %v1761_v63  ;;  %2293 = vmatpush.bf16.msra.mxu0 %v5571_v22  ;;  %v5775_v63 = vor.u32 %v6470_v28, %v5774_v61  ;;  %v2168_v22 = vadd.f32 %v7713_v54, %v1845_v29 }
 0x3e9   : > { %2189 = vmatmul.bf16.gmra.mxu2 %v7726_v51 }
 0x3ea   : > { %5778 = vmatmul.msk.bf16.gmra.mxu0 %vm1735_vm15, %v7728_v35 }
 0x3f9   : > { %2225 = vmatmul.bf16.vlgmr.msra.gmra.mxu2 %v7478_v16 }
 0x3fa   : > { %2248 = vmatmul.bf16.vlgmr.msrb.gmra.mxu0 %v7650_v8  ;;  %2309 = vmatpush.bf16.msra.mxu2 %v5751_v38 }
 0x3fb   : > { %2338 = vmatpush.bf16.msrb.mxu0 %v5775_v63 }
 0x3fe   : > { %2310 = vmatpush.bf16.msra.mxu2 %v5739_v42 }
 0x3ff   : > { %2339 = vmatpush.bf16.msrb.mxu0 %v5763_v1 }
 0x402   : > { %2311 = vmatpush.bf16.msra.mxu2 %v5727_v44 }
 0x406   : > { %2312 = vmatpush.bf16.msra.mxu2 %v5715_v52 }
 0x409   : > { %2230 = vmatmul.bf16.gmra.mxu2 %v7492_v49 }
 0x40a   : > { %2253 = vmatmul.bf16.gmra.mxu0 %v7716_v31  ;;  %2313 = vmatpush.bf16.msra.mxu2 %v5703_v59 }
 0x419   : > { %2235 = vmatmul.bf16.gmra.mxu2 %v7511_v27 }
 0x41a   : > { %2258 = vmatmul.bf16.gmra.mxu0 %v7726_v51 }
 0x429   : > { %5779 = vmatmul.msk.bf16.vlgmr.msrb.gmra.mxu2 %vm1735_vm15, %v7653_v12 }
 0x42a   : > { %2294 = vmatmul.bf16.vlgmr.msra.gmra.mxu0 %v7478_v16  ;;  %v5691_v16 = vor.u32 %v6449_v60, %v5690_v58 }
 0x42c   : > { %2314 = vmatpush.bf16.msra.mxu2 %v5691_v16 }
 0x430   : > { %2315 = vmatpush.bf16.msra.mxu2 %v5679_v53 }
 0x434   : > { %2316 = vmatpush.bf16.msra.mxu2 %v5667_v45 }
 0x439   : > { %5780 = vmatmul.msk.bf16.gmra.mxu2 %vm1735_vm15, %v7719_v56 }
 0x43a   : > { %2299 = vmatmul.bf16.gmra.mxu0 %v7492_v49 }
 0x446   : > { %v2203_v10 = vpop.f32.mrf.mxu0 }
 0x449   : > { %5781 = vmatmul.msk.bf16.gmra.mxu2 %vm1735_vm15, %v7728_v35 }
 0x44a   : > { %2304 = vmatmul.bf16.gmra.mxu0 %v7511_v27  ;;  %v2163_v27 = vadd.f32 %v7648_v40, %v1845_v29 }
 0x44b   : > { %v2180_v13 = vpop.f32.mrf.mxu2 }
 0x44c   : > { %v2181_v14 = vadd.f32 %v2180_v13, %v2158_v11 }
 0x44e   : > { %v2204_v2 = vadd.f32 %v2203_v10, %v2181_v14  ;;  %v2205_v49 = vpop.f32.mrf.mxu0 }
 0x450   : > { %v2355_v18 = vmax.f32 %v2204_v2, 0.0 }
 0x452   : > { %2370 = vst.msk [vmem:[#allocation2] sm:$0xff] %vm684_vm1, %v2355_v18  ;;  %2400 = vrot.lane.b32.xlu0 %v2355_v18, %s6643_s19  ;;  %2425 = vrot.lane.b32.xlu2 %v2355_v18, %s9667_s18 }
 0x453   : > { %v2182_v19 = vpop.f32.mrf.mxu2 }
 0x454   : > { %v2183_v15 = vadd.f32 %v2182_v19, %v2160_v57 }
 0x456   : > { %v2206_v37 = vadd.f32 %v2205_v49, %v2183_v15 }
 0x457   : > { %v2208_v21 = vpop.f32.mrf.mxu0 }
 0x458   : > { %v2358_v43 = vmax.f32 %v2206_v37, 0.0 }
 0x459   : > { %2317 = vmatmul.bf16.vlgmr.msra.gmra.mxu2 %v7650_v8  ;;  %v2165_v8 = vadd.f32 %v7690_v47, %v1845_v29 }
 0x45a   : > { %2371 = vst.msk [vmem:[#allocation2 + $0x8] sm:$0xff] %vm684_vm1, %v2358_v43  ;;  %5782 = vmatmul.msk.bf16.vlgmr.msrb.gmra.mxu0 %vm1735_vm15, %v7653_v12  ;;  %2429 = vrot.lane.b32.xlu1 %v2358_v43, %s9667_s18 }
 0x45b   : > { %2402 = vrot.lane.b32.xlu0 %v2358_v43, %s6643_s19  ;;  %2380 = vrot.lane.b32.xlu2 %v2355_v18, %s6644_s20 }
 0x45c   : > { %v2185_v24 = vpop.f32.mrf.mxu2 }
 0x45d   : > { %v2186_v23 = vadd.f32 %v2185_v24, %v2163_v27 }
 0x45f   : > { %v2209_v25 = vadd.f32 %v2208_v21, %v2186_v23  ;;  %v2210_v26 = vpop.f32.mrf.mxu0 }
 0x461   : > { %v2361_v46 = vmax.f32 %v2209_v25, 0.0 }
 0x463   : > { %2372 = vst.msk [vmem:[#allocation2 + $0x10] sm:$0xff] %vm684_vm1, %v2361_v46  ;;  %2382 = vrot.lane.b32.xlu0 %v2358_v43, %s6644_s20  ;;  %2404 = vrot.lane.b32.xlu1 %v2361_v46, %s6643_s19 }
 0x464   : > { %v2187_v12 = vpop.f32.mrf.mxu2 }
 0x465   : > { %v2188_v30 = vadd.f32 %v2187_v12, %v2165_v8 }
 0x467   : > { %v2211_v40 = vadd.f32 %v2210_v26, %v2188_v30  ;;  %v2213_v9 = vpop.f32.mrf.mxu0 }
 0x469   : > { %v7891_v32 = vmax.f32 %v2211_v40, 0.0  ;;  %2322 = vmatmul.bf16.gmra.mxu2 %v7716_v31 }
 0x46a   : > { %5783 = vmatmul.msk.bf16.gmra.mxu0 %vm1735_vm15, %v7719_v56 }
 0x46b   : > { %2373 = vst.msk [vmem:[#allocation2 + $0x18] sm:$0xff] %vm684_vm1, %v7891_v32  ;;  %2433 = vrot.lane.b32.xlu0 %v2361_v46, %s9667_s18  ;;  %2384 = vrot.lane.b32.xlu1 %v2361_v46, %s6644_s20 }
 0x46c   : > { %2406 = vrot.lane.b32.xlu2 %v7891_v32, %s6643_s19  ;;  %v2190_v47 = vpop.f32.mrf.mxu2 }
 0x46d   : > { %v2191_v20 = vadd.f32 %v2190_v47, %v2168_v22  ;;  %v1847_v22 = vperm.slane %v7868_v7, 2 }
 0x46f   : > { %v2214_v34 = vadd.f32 %v2213_v9, %v2191_v20  ;;  %v2215_v36 = vpop.f32.mrf.mxu0 }
 0x471   : > { %v7903_v31 = vmax.f32 %v2214_v34, 0.0 }
 0x473   : > { %2374 = vst.msk [vmem:[#allocation2 + $0x20] sm:$0xf] %vm689_vm2, %v7903_v31  ;;  %2386 = vrot.lane.b32.xlu1 %v7891_v32, %s6644_s20  ;;  %2408 = vrot.lane.b32.xlu0 %v7903_v31, %s6643_s19 }
 0x474   : > { %2388 = vrot.lane.b32.xlu2 %v7903_v31, %s6644_s20  ;;  %v2192_v54 = vpop.f32.mrf.mxu2 }
 0x477   : > { %v2249_v56 = vpop.f32.mrf.mxu0 }
 0x479   : > { %2327 = vmatmul.bf16.gmra.mxu2 %v7726_v51 }
 0x47a   : > { %5784 = vmatmul.msk.bf16.gmra.mxu0 %vm1735_vm15, %v7728_v35 }
 0x47c   : > { %v2226_v38 = vpop.f32.mrf.mxu2 }
 0x47d   : > { %v2227_v58 = vadd.f32 %v2226_v38, %v1846_v55 }
 0x47f   : > { %v2251_v41 = vpop.f32.mrf.mxu0  ;;  %v2250_v51 = vadd.f32 %v2249_v56, %v2227_v58 }
 0x484   : > { %v2228_v42 = vpop.f32.mrf.mxu2 }
 0x485   : > { %v2229_v28 = vadd.f32 %v2228_v42, %v1846_v55 }
 0x487   : > { %v2254_v39 = vpop.f32.mrf.mxu0  ;;  %v2252_v6 = vadd.f32 %v2251_v41, %v2229_v28 }
 0x48c   : > { %v2231_v33 = vpop.f32.mrf.mxu2 }
 0x48d   : > { %v2232_v1 = vadd.f32 %v2231_v33, %v1846_v55 }
 0x48f   : > { %v2256_v44 = vpop.f32.mrf.mxu0  ;;  %v2255_v45 = vadd.f32 %v2254_v39, %v2232_v1 }
 0x494   : > { %v2233_v48 = vpop.f32.mrf.mxu2 }
 0x495   : > { %v2234_v11 = vadd.f32 %v2233_v48, %v1846_v55 }
 0x497   : > { %v2259_v50 = vpop.f32.mrf.mxu0  ;;  %v2257_v2 = vadd.f32 %v2256_v44, %v2234_v11  ;;  %v2697_v11 = vld [vmem:[%s9629_s8 + $0x50] sm:$0xff] }
 0x49c   : > { %v2236_v52 = vpop.f32.mrf.mxu2 }
 0x49d   : > { %v2237_v15 = vadd.f32 %v2236_v52, %v1846_v55 }
 0x49f   : > { %v2261_v5 = vpop.f32.mrf.mxu0  ;;  %v2260_v43 = vadd.f32 %v2259_v50, %v2237_v15  ;;  %v2694_v15 = vld [vmem:[%s9629_s8 + $0x38] sm:$0xff] }
 0x4a4   : > { %v2238_v59 = vpop.f32.mrf.mxu2 }
 0x4a7   : > { %v7917_v60 = vpop.f32.mrf.mxu0 }
 0x4a8   : > { %v2296_v36 = vadd.f32 %v7917_v60, %v1847_v22 }
 0x4ac   : > { %v2272_v16 = vpop.f32.mrf.mxu2  ;;  %v7919_v61 = vpop.permute.xlu2 %2425 }
 0x4ad   : > { %v2273_v35 = vadd.f32 %v2272_v16, %v2250_v51 }
 0x4af   : > { %v2356_v63 = vmax.f32 %v2273_v35, 0.0  ;;  %v7921_v0 = vpop.f32.mrf.mxu0 }
 0x4b1   : > { %2525 = vrot.lane.b32.xlu1 %v2356_v63, %s9663_s28  ;;  %2427 = vrot.lane.b32.xlu0 %v2356_v63, %s9667_s18 }
 0x4b4   : > { %v2274_v53 = vpop.f32.mrf.mxu2 }
 0x4b5   : > { %v2275_v62 = vadd.f32 %v2274_v53, %v2252_v6  ;;  %v2381_v17 = vpop.permute.xlu2 %2380 }
 0x4b6   : > { %2395 = vst.msk [vmem:[#allocation2 + $0x24] sm:$0xff] %vm684_vm1, %v2381_v17  ;;  %v2692_v17 = vld [vmem:[%s9629_s8 + $0x28] sm:$0xff] }
 0x4b7   : > { %v7926_v4 = vmax.f32 %v2275_v62, 0.0  ;;  %v7928_v3 = vpop.f32.mrf.mxu0 }
 0x4b8   : > { %v2301_v44 = vadd.f32 %v7928_v3, %v1847_v22 }
 0x4b9   : > { %2500 = vrot.lane.b32.xlu1 %v2356_v63, %s9659_s30  ;;  %2480 = vrot.lane.b32.xlu0 %v2356_v63, %s9657_s14 }
 0x4ba   : > { %2431 = vrot.lane.b32.xlu2 %v7926_v4, %s9667_s18 }
 0x4bc   : > { %v2277_v29 = vpop.f32.mrf.mxu2 }
 0x4bd   : > { %v2278_v10 = vadd.f32 %v2277_v29, %v2255_v45  ;;  %v2691_v29 = vld [vmem:[%s9629_s8 + $0x20] sm:$0xff] }
 0x4bf   : > { %v7934_v13 = vmax.f32 %v2278_v10, 0.0  ;;  %v7936_v14 = vpop.f32.mrf.mxu0  ;;  %v2693_v10 = vld [vmem:[%s9629_s8 + $0x30] sm:$0xff] }
 0x4c0   : > { %v2303_v58 = vadd.f32 %v7936_v14, %v1847_v22 }
 0x4c1   : > { %2502 = vrot.lane.b32.xlu1 %v7926_v4, %s9659_s30  ;;  %2460 = vrot.lane.b32.xlu0 %v2356_v63, %s9654_s15  ;;  %v2298_v63 = vadd.f32 %v7921_v0, %v1847_v22  ;;  %v2701_v0 = vld [vmem:[%s9629_s8 + $0x70] sm:$0xff] }
 0x4c2   : > { %2504 = vrot.lane.b32.xlu2 %v7934_v13, %s9659_s30 }
 0x4c4   : > { %v2279_v49 = vpop.f32.mrf.mxu2  ;;  %v2401_v18 = vpop.permute.xlu0 %2400 }
 0x4c5   : > { %v2280_v57 = vadd.f32 %v2279_v49, %v2257_v2  ;;  %2415 = vst.msk [vmem:[#allocation2 + $0x48] sm:$0xff] %vm684_vm1, %v2401_v18  ;;  %v2700_v2 = vld [vmem:[%s9629_s8 + $0x68] sm:$0xff]  ;;  %v2702_v49 = vld [vmem:[%s9629_s8 + $0x78] sm:$0xff]  ;;  %v2703_v18 = vld [vmem:[%s9629_s8 + $0x80] sm:$0xff] }
 0x4c6   : > { %v2407_v19 = vpop.permute.xlu2 %2406 }
 0x4c7   : > { %v2365_v37 = vmax.f32 %v2280_v57, 0.0  ;;  %v7944_v21 = vpop.f32.mrf.mxu0  ;;  %2418 = vst.msk [vmem:[#allocation2 + $0x60] sm:$0xff] %vm684_vm1, %v2407_v19  ;;  %v2696_v19 = vld [vmem:[%s9629_s8 + $0x48] sm:$0xff] }
 0x4c8   : > { %v2306_v16 = vadd.f32 %v7944_v21, %v1847_v22 }
 0x4c9   : > { %2462 = vrot.lane.b32.xlu1 %v7926_v4, %s9654_s15  ;;  %2482 = vrot.lane.b32.xlu0 %v7926_v4, %s9657_s14 }
 0x4ca   : > { %2506 = vrot.lane.b32.xlu2 %v2365_v37, %s9659_s30 }
 0x4cc   : > { %v2282_v27 = vpop.f32.mrf.mxu2  ;;  %v7952_v24 = vpop.permute.xlu1 %2429 }
 0x4cd   : > { %v2283_v23 = vadd.f32 %v2282_v27, %v2260_v43  ;;  %v2403_v25 = vpop.permute.xlu0 %2402 }
 0x4ce   : > { %2416 = vst.msk [vmem:[#allocation2 + $0x50] sm:$0xff] %vm684_vm1, %v2403_v25  ;;  %v2389_v26 = vpop.permute.xlu2 %2388  ;;  %v2704_v25 = vld [vmem:[%s9629_s8 + $0x88] sm:$0xff] }
 0x4cf   : > { %v7955_v46 = vmax.f32 %v2283_v23, 0.0  ;;  %v2307_v8 = vpop.f32.mrf.mxu0  ;;  %2399 = vst.msk [vmem:[#allocation2 + $0x44] sm:$0xf] %vm689_vm2, %v2389_v26  ;;  %v2695_v23 = vld [vmem:[%s9629_s8 + $0x40] sm:$0xff]  ;;  %v2709_v26 = vld [vmem:[%s9629_s8 + $0xb0] sm:$0xff] }
 0x4d1   : > { %2435 = vrot.lane.b32.xlu1 %v7934_v13, %s9667_s18  ;;  %2508 = vrot.lane.b32.xlu0 %v7955_v46, %s9659_s30  ;;  %s9674_s30 = smov 124  }
 0x4d2   : > { %2486 = vrot.lane.b32.xlu2 %v2365_v37, %s9657_s14 }
 0x4d4   : > { %v2284_v12 = vpop.f32.mrf.mxu2 }
 0x4d5   : > { %v2383_v30 = vpop.permute.xlu0 %2382  ;;  %v2405_v40 = vpop.permute.xlu1 %2404  ;;  %v2698_v12 = vld [vmem:[%s9629_s8 + $0x58] sm:$0xff] }
 0x4d6   : > { %2396 = vst.msk [vmem:[#allocation2 + $0x2c] sm:$0xff] %vm684_vm1, %v2383_v30  ;;  %v2687_v30 = vld [vmem:[%s9629_s8] sm:$0xff] }
 0x4d7   : > { %v2341_v9 = vpop.f32.mrf.mxu0  ;;  %2417 = vst.msk [vmem:[#allocation2 + $0x58] sm:$0xff] %vm684_vm1, %v2405_v40  ;;  %v2705_v40 = vld [vmem:[%s9629_s8 + $0x90] sm:$0xff] }
 0x4d9   : > { %2484 = vrot.lane.b32.xlu1 %v7934_v13, %s9657_s14  ;;  %2488 = vrot.lane.b32.xlu0 %v7955_v46, %s9657_s14  ;;  %s9673_s14 = smov 88  }
 0x4da   : > { %2466 = vrot.lane.b32.xlu2 %v2365_v37, %s9654_s15 }
 0x4dc   : > { %v2318_v47 = vpop.f32.mrf.mxu2 }
 0x4dd   : > { %v7971_v20 = vpop.permute.xlu0 %2433  ;;  %v2385_v34 = vpop.permute.xlu1 %2384  ;;  %v2319_v56 = vadd.f32 %v2318_v47, %v2296_v36  ;;  %v2710_v36 = vld [vmem:[%s9629_s8 + $0xb8] sm:$0xff] }
 0x4de   : > { %2397 = vst.msk [vmem:[#allocation2 + $0x34] sm:$0xff] %vm684_vm1, %v2385_v34  ;;  %v2688_v34 = vld [vmem:[%s9629_s8 + $0x8] sm:$0xff] }
 0x4df   : > { %v2343_v54 = vpop.f32.mrf.mxu0  ;;  %v2342_v7 = vadd.f32 %v2341_v9, %v2319_v56 }
 0x4e1   : > { %2464 = vrot.lane.b32.xlu1 %v7934_v13, %s9654_s15  ;;  %2541 = vrot.lane.b32.xlu0 %v7955_v46, %s9663_s28  ;;  %v2357_v33 = vmax.f32 %v2342_v7, 0.0 }
 0x4e2   : > { %2468 = vrot.lane.b32.xlu2 %v7955_v46, %s9654_s15 }
 0x4e4   : > { %v2320_v38 = vpop.f32.mrf.mxu2 }
 0x4e5   : > { %v2387_v41 = vpop.permute.xlu1 %2386  ;;  %v2409_v42 = vpop.permute.xlu0 %2408  ;;  %v2321_v1 = vadd.f32 %v2320_v38, %v2298_v63 }
 0x4e6   : > { %2398 = vst.msk [vmem:[#allocation2 + $0x3c] sm:$0xff] %vm684_vm1, %v2387_v41  ;;  %v2711_v41 = vld [vmem:[%s9629_s8 + $0xc0] sm:$0xff] }
 0x4e7   : > { %v2346_v39 = vpop.f32.mrf.mxu0  ;;  %2419 = vst.msk [vmem:[#allocation2 + $0x68] sm:$0xf] %vm689_vm2, %v2409_v42  ;;  %v2706_v42 = vld [vmem:[%s9629_s8 + $0x98] sm:$0xff] }
 0x4e9   : > { %2537 = vrot.lane.b32.xlu1 %v2365_v37, %s9663_s28  ;;  %2439 = vrot.lane.b32.xlu0 %v2365_v37, %s9667_s18  ;;  %v2699_v37 = vld [vmem:[%s9629_s8 + $0x60] sm:$0xff] }
 0x4ea   : > { %2527 = vrot.lane.b32.xlu2 %v2357_v33, %s9663_s28 }
 0x4ec   : > { %v2323_v48 = vpop.f32.mrf.mxu2 }
 0x4ed   : > { %v2324_v50 = vadd.f32 %v2323_v48, %v2301_v44 }
 0x4ef   : > { %v2347_v52 = vadd.f32 %v2346_v39, %v2324_v50  ;;  %v2348_v5 = vpop.f32.mrf.mxu0  ;;  %v2714_v39 = vld [vmem:[%s9629_s8 + $0xd8] sm:$0xff] }
 0x4f1   : > { %v2363_v55 = vmax.f32 %v2347_v52, 0.0  ;;  %2441 = vrot.lane.b32.xlu1 %v7903_v31, %s9667_s18 }
 0x4f2   : > { %2533 = vrot.lane.b32.xlu2 %v7934_v13, %s9663_s28 }
 0x4f3   : > { %2535 = vrot.lane.b32.xlu0 %v2363_v55, %s9663_s28  ;;  %v2720_v55 = vld [vmem:[%s9629_s8 + $0x108] sm:$0xff] }
 0x4f4   : > { %v2325_v59 = vpop.f32.mrf.mxu2 }
 0x4f5   : > { %v2326_v51 = vadd.f32 %v2325_v59, %v2303_v58 }
 0x4f7   : > { %v2351_v60 = vpop.f32.mrf.mxu0  ;;  %v2349_v35 = vadd.f32 %v2348_v5, %v2326_v51  ;;  %v2718_v5 = vld [vmem:[%s9629_s8 + $0xf8] sm:$0xff] }
 0x4f9   : > { %v2366_v62 = vmax.f32 %v2349_v35, 0.0 }
 0x4fa   : > { %2437 = vrot.lane.b32.xlu2 %v7891_v32, %s9667_s18 }
 0x4fb   : > { %2529 = vrot.lane.b32.xlu0 %v7926_v4, %s9663_s28  ;;  %v2344_v4 = vadd.f32 %v2343_v54, %v2321_v1  ;;  %v2719_v54 = vld [vmem:[%s9629_s8 + $0x100] sm:$0xff]  ;;  %v2708_v1 = vld [vmem:[%s9629_s8 + $0xa8] sm:$0xff] }
 0x4fc   : > { %v2328_v31 = vpop.f32.mrf.mxu2 }
 0x4fd   : > { %v2329_v28 = vadd.f32 %v2328_v31, %v2306_v16  ;;  %v2360_v45 = vmax.f32 %v2344_v4, 0.0 }
 0x4ff   : > { %v2352_v6 = vadd.f32 %v2351_v60, %v2329_v28  ;;  %v2353_v53 = vpop.f32.mrf.mxu0 }
 0x501   : > { %v2369_v3 = vmax.f32 %v2352_v6, 0.0  ;;  %v2690_v6 = vld [vmem:[%s9629_s8 + $0x18] sm:$0xff] }
 0x502   : > { %2539 = vrot.lane.b32.xlu2 %v2366_v62, %s9663_s28 }
 0x503   : > { %2543 = vrot.lane.b32.xlu1 %v2369_v3, %s9663_s28  ;;  %2750 = vperm.xlu0 %6632, %v2692_v17   ;;  %v2715_v17 = vld [vmem:[%s9629_s8 + $0xe0] sm:$0xff] }
 0x504   : > { %v2330_v32 = vpop.f32.mrf.mxu2  ;;  %v2573_v3 = vld [vmem:[#allocation2 + $0x60] sm:$0xff] }
 0x50a   : > { %2443 = vrot.lane.b32.xlu2 %v7955_v46, %s9667_s18 }
 0x50b   : > { %2531 = vrot.lane.b32.xlu1 %v2360_v45, %s9663_s28  ;;  %2795 = vperm.xlu0 %6632, %v2701_v0  }
 0x512   : > { %2745 = vperm.xlu2 %6631, %v2691_v29  }
 0x513   : > { %2755 = vperm.xlu1 %6633, %v2693_v10   ;;  %2775 = vperm.xlu0 %6632, %v2697_v11   ;;  %v2572_v10 = vld [vmem:[#allocation2 + $0x58] sm:$0xff] }
 0x514   : > { %v2432_v13 = vpop.permute.xlu2 %2431 }
 0x515   : > { %v2446_v14 = vsel %vm761_vm3, %v7952_v24, %v2432_v13 }
 0x516   : > { %2456 = vst.msk [vmem:[#allocation2 + $0x74] sm:$0xff] %vm684_vm1, %v2446_v14 }
 0x51a   : > { %2790 = vperm.xlu2 %6631, %v2700_v2   ;;  %v2571_v2 = vld [vmem:[#allocation2 + $0x50] sm:$0xff] }
 0x51b   : > { %2800 = vperm.xlu1 %6633, %v2702_v49   ;;  %2805 = vperm.xlu0 %6632, %v2703_v18   ;;  %v2674_v18 = vpack.c.bf16 %v2572_v10, %v2571_v2  ;;  %v6474_v10 = vld [vmem:[%s9628_s7 + $0x1c] sm:$0xf] }
 0x51c   : > { %v2505_v57 = vpop.permute.xlu2 %2504 }
 0x51d   : > { %2517 = vst.msk [vmem:[#allocation2 + $0xe8] sm:$0xff] %vm684_vm1, %v2505_v57  ;;  %v2569_v57 = vld [vmem:[#allocation2 + $0x40] sm:$0xff] }
 0x522   : > { %2770 = vperm.xlu2 %6631, %v2696_v19   ;;  %v2707_v19 = vld [vmem:[%s9629_s8 + $0xa0] sm:$0xff] }
 0x523   : > { %2760 = vperm.xlu1 %6633, %v2694_v15   ;;  %v2526_v21 = vpop.permute.xlu1 %2525  ;;  %2785 = vperm.xlu0 %6632, %v2699_v37   ;;  %v2428_v43 = vpop.permute.xlu0 %2427 }
 0x524   : > { %v2445_v27 = vsel %vm761_vm3, %v7919_v61, %v2428_v43  ;;  %v2507_v24 = vpop.permute.xlu2 %2506  ;;  %v2590_v32 = vld [vmem:[#allocation2 + $0xe8] sm:$0xff] }
 0x525   : > { %2455 = vst.msk [vmem:[#allocation2 + $0x6c] sm:$0xff] %vm684_vm1, %v2445_v27  ;;  %v2570_v43 = vld [vmem:[#allocation2 + $0x48] sm:$0xff] }
 0x526   : > { %2518 = vst.msk [vmem:[#allocation2 + $0xf0] sm:$0xff] %vm684_vm1, %v2507_v24  ;;  %v2673_v27 = vpack.c.bf16 %v2570_v43, %v2569_v57 }
 0x52a   : > { %2765 = vperm.xlu2 %6631, %v2695_v23  }
 0x52b   : > { %2810 = vperm.xlu1 %6633, %v2704_v25   ;;  %v2501_v61 = vpop.permute.xlu1 %2500  ;;  %2835 = vperm.xlu0 %6632, %v2709_v26   ;;  %v2481_v46 = vpop.permute.xlu0 %2480  ;;  %v2568_v26 = vld [vmem:[#allocation2 + $0x38] sm:$0xff] }
 0x52c   : > { %2515 = vst.msk [vmem:[#allocation2 + $0xd8] sm:$0xff] %vm684_vm1, %v2501_v61  ;;  %v2487_v8 = vpop.permute.xlu2 %2486  ;;  %v2575_v51 = vld [vmem:[#allocation2 + $0x70] sm:$0xff]  ;;  %v2574_v53 = vld [vmem:[#allocation2 + $0x68] sm:$0xff] }
 0x52d   : > { %2495 = vst.msk [vmem:[#allocation2 + $0xb4] sm:$0xff] %vm684_vm1, %v2481_v46  ;;  %v2591_v31 = vld [vmem:[#allocation2 + $0xf0] sm:$0xff]  ;;  %v2675_v4 = vpack.c.bf16 %v2574_v53, %v2573_v3 }
 0x52e   : > { %2498 = vst.msk [vmem:[#allocation2 + $0xcc] sm:$0xff] %vm684_vm1, %v2487_v8 }
 0x532   : > { %2780 = vperm.xlu2 %6631, %v2698_v12  }
 0x533   : > { %2725 = vperm.xlu1 %6633, %v2687_v30   ;;  %v2503_v9 = vpop.permute.xlu1 %2502  ;;  %2815 = vperm.xlu0 %6632, %v2705_v40   ;;  %v2461_v22 = vpop.permute.xlu0 %2460  ;;  %v2588_v14 = vld [vmem:[#allocation2 + $0xd8] sm:$0xff]  ;;  %v2567_v40 = vld [vmem:[#allocation2 + $0x30] sm:$0xff] }
 0x534   : > { %2516 = vst.msk [vmem:[#allocation2 + $0xe0] sm:$0xff] %vm684_vm1, %v2503_v9  ;;  %v2467_v47 = vpop.permute.xlu2 %2466  ;;  %v2672_v9 = vpack.c.bf16 %v2568_v26, %v2567_v40  ;;  %v6477_v26 = vld [vmem:[%s9628_s7 + $0x34] sm:$0xf]  ;;  %v5823_v40 = vld [vmem:[%s9628_s7 + $0x48] sm:$0xf] }
 0x535   : > { %2475 = vst.msk [vmem:[#allocation2 + $0x90] sm:$0xff] %vm684_vm1, %v2461_v22 }
 0x536   : > { %2478 = vst.msk [vmem:[#allocation2 + $0xa8] sm:$0xff] %vm684_vm1, %v2467_v47  ;;  %v2722_v47 = vld [vmem:[%s9629_s8 + $0x118] sm:$0xff] }
 0x53a   : > { %2730 = vperm.xlu2 %6631, %v2688_v34   ;;  %v2566_v34 = vld [vmem:[#allocation2 + $0x28] sm:$0xff] }
 0x53b   : > { %2840 = vperm.xlu1 %6633, %v2710_v36   ;;  %v2463_v56 = vpop.permute.xlu1 %2462  ;;  %2885 = vperm.xlu0 %6632, %v2719_v54   ;;  %v2483_v7 = vpop.permute.xlu0 %2482  ;;  %v2589_v62 = vld [vmem:[#allocation2 + $0xe0] sm:$0xff]  ;;  %v2713_v54 = vld [vmem:[%s9629_s8 + $0xd0] sm:$0xff] }
 0x53c   : > { %2476 = vst.msk [vmem:[#allocation2 + $0x98] sm:$0xff] %vm684_vm1, %v2463_v56  ;;  %v2469_v38 = vpop.permute.xlu2 %2468  ;;  %v2683_v0 = vpack.c.bf16 %v2590_v32, %v2589_v62  ;;  %v2565_v56 = vld [vmem:[#allocation2 + $0x20] sm:$0xff] }
 0x53d   : > { %2496 = vst.msk [vmem:[#allocation2 + $0xbc] sm:$0xff] %vm684_vm1, %v2483_v7  ;;  %v2582_v7 = vld [vmem:[#allocation2 + $0xa8] sm:$0xff] }
 0x53e   : > { %2479 = vst.msk [vmem:[#allocation2 + $0xb0] sm:$0xf] %vm689_vm2, %v2469_v38  ;;  %v2671_v38 = vpack.c.bf16 %v2566_v34, %v2565_v56  ;;  %v5825_v34 = vld [vmem:[%s9628_s7 + $0x54] sm:$0xf0]  ;;  %v6479_v56 = vld [vmem:[%s9628_s7 + $0x40] sm:$0xf0] }
 0x542   : > { %2845 = vperm.xlu2 %6631, %v2711_v41  }
 0x543   : > { %2820 = vperm.xlu1 %6633, %v2706_v42   ;;  %v2436_v33 = vpop.permute.xlu1 %2435  ;;  %2860 = vperm.xlu0 %6632, %v2714_v39   ;;  %v2509_v44 = vpop.permute.xlu0 %2508  ;;  %v2564_v39 = vld [vmem:[#allocation2 + $0x18] sm:$0xff] }
 0x544   : > { %v2447_v48 = vsel %vm761_vm3, %v7971_v20, %v2436_v33  ;;  %2519 = vst.msk [vmem:[#allocation2 + $0xf8] sm:$0xf] %vm689_vm2, %v2509_v44  ;;  %v2528_v50 = vpop.permute.xlu2 %2527  ;;  %v2712_v20 = vld [vmem:[%s9629_s8 + $0xc8] sm:$0xff]  ;;  %v2584_v46 = vld [vmem:[#allocation2 + $0xb8] sm:$0xff] }
 0x545   : > { %2457 = vst.msk [vmem:[#allocation2 + $0x7c] sm:$0xff] %vm684_vm1, %v2447_v48  ;;  %v2546_v52 = vsel %vm2545_vm10, %v2526_v21, %v2528_v50  ;;  %v2689_v21 = vld [vmem:[%s9629_s8 + $0x10] sm:$0xff]  ;;  %v2580_v33 = vld [vmem:[#allocation2 + $0x98] sm:$0xff] }
 0x546   : > { %2556 = vst.msk [vmem:[#allocation2 + $0xfc] sm:$0xff] %vm684_vm1, %v2546_v52  ;;  %v2583_v61 = vld [vmem:[#allocation2 + $0xb0] sm:$0xff] }
 0x547   : > { %v2680_v22 = vpack.c.bf16 %v2584_v46, %v2583_v61  ;;  %v2563_v52 = vld [vmem:[#allocation2 + $0x10] sm:$0xff]  ;;  %v5813_v61 = vld [vmem:[%s9628_s7 + $0x3c] sm:$0xf0] }
 0x548   : > { %v5816_v46 = vor.u32 %v6477_v26, %v5813_v61  ;;  %v6495_v26 = vld [vmem:[%s9628_s7 + $0xc4] sm:$0xf]  ;;  %v5885_v61 = vld [vmem:[%s9628_s7 + $0xcc] sm:$0xf0] }
 0x54a   : > { %2880 = vperm.xlu2 %6631, %v2718_v5   ;;  %v2579_v5 = vld [vmem:[#allocation2 + $0x90] sm:$0xff] }
 0x54b   : > { %2890 = vperm.xlu1 %6633, %v2720_v55   ;;  %v2485_v59 = vpop.permute.xlu1 %2484  ;;  %2850 = vperm.xlu0 %6632, %v2712_v20   ;;  %v2489_v58 = vpop.permute.xlu0 %2488  ;;  %v2670_v20 = vpack.c.bf16 %v2564_v39, %v2563_v52  ;;  %v6483_v39 = vld [vmem:[%s9628_s7 + $0x64] sm:$0xf] }
 0x54c   : > { %2497 = vst.msk [vmem:[#allocation2 + $0xc4] sm:$0xff] %vm684_vm1, %v2485_v59  ;;  %v8106_v60 = vpop.permute.xlu2 %2533  ;;  %v2576_v16 = vld [vmem:[#allocation2 + $0x78] sm:$0xff]  ;;  %v2678_v59 = vpack.c.bf16 %v2580_v33, %v2579_v5  ;;  %v5837_v33 = vld [vmem:[%s9628_s7 + $0x6c] sm:$0xf0] }
 0x54d   : > { %2499 = vst.msk [vmem:[#allocation2 + $0xd4] sm:$0xf] %vm689_vm2, %v2489_v58  ;;  %v2676_v35 = vpack.c.bf16 %v2576_v16, %v2575_v51  ;;  %v2592_v28 = vld [vmem:[#allocation2 + $0xf8] sm:$0xff]  ;;  %v2562_v58 = vld [vmem:[#allocation2 + $0x8] sm:$0xff]  ;;  %v2721_v51 = vld [vmem:[%s9629_s8 + $0x110] sm:$0xff] }
 0x54e   : > { %v2684_v63 = vpack.c.bf16 %v2592_v28, %v2591_v31  ;;  %v5787_v16 = vld [vmem:[%s9628_s7] sm:$0xf]  ;;  %v5847_v5 = vld [vmem:[%s9628_s7 + $0x78] sm:$0xf] }
 0x54f   : > { %3227 = vmatpush.bf16.msrb.mxu2 %v2676_v35  ;;  %v6472_v35 = vld [vmem:[%s9628_s7 + $0x8] sm:$0xf0] }
 0x550   : > { %3326 = vmatpush.bf16.msra.mxu0 %v2684_v63  ;;  %v5788_v28 = vor.u32 %v6472_v35, %v5787_v16  ;;  %v6471_v63 = vld [vmem:[%s9628_s7 + $0x4] sm:$0xf] }
 0x552   : > { %2740 = vperm.xlu2 %6631, %v2690_v6   ;;  %v5789_v6 = vld [vmem:[%s9628_s7 + $0xc] sm:$0xf0] }
 0x553   : > { %2865 = vperm.xlu1 %6633, %v2715_v17   ;;  %v2465_v45 = vpop.permute.xlu1 %2464  ;;  %2830 = vperm.xlu0 %6632, %v2708_v1   ;;  %v8118_v29 = vpop.permute.xlu0 %2541  ;;  %v2585_v15 = vld [vmem:[#allocation2 + $0xc0] sm:$0xff]  ;;  %v2586_v37 = vld [vmem:[#allocation2 + $0xc8] sm:$0xff]  ;;  %v5792_v1 = vor.u32 %v6471_v63, %v5789_v6  ;;  %v5859_v63 = vld [vmem:[%s9628_s7 + $0x90] sm:$0xf] }
 0x554   : > { %2477 = vst.msk [vmem:[#allocation2 + $0xa0] sm:$0xff] %vm684_vm1, %v2465_v45  ;;  %3228 = vmatpush.bf16.msrb.mxu2 %v2675_v4  ;;  %3327 = vmatpush.bf16.msra.mxu0 %v2683_v0  ;;  %v2438_v11 = vpop.permute.xlu2 %2437  ;;  %v2587_v13 = vld [vmem:[#allocation2 + $0xd0] sm:$0xff]  ;;  %v2681_v24 = vpack.c.bf16 %v2586_v37, %v2585_v15  ;;  %v5799_v4 = vld [vmem:[%s9628_s7 + $0x18] sm:$0xf]  ;;  %v6475_v0 = vld [vmem:[%s9628_s7 + $0x20] sm:$0xf0] }
 0x555   : > { %v2682_v49 = vpack.c.bf16 %v2588_v14, %v2587_v13  ;;  %v5800_v45 = vor.u32 %v6475_v0, %v5799_v4  ;;  %v6473_v15 = vld [vmem:[%s9628_s7 + $0x10] sm:$0xf0]  ;;  %v6490_v6 = vld [vmem:[%s9628_s7 + $0x98] sm:$0xf0]  ;;  %v5855_v0 = vld [vmem:[%s9628_s7 + $0x80] sm:$0xf] }
 0x558   : > { %3229 = vmatpush.bf16.msrb.mxu2 %v2674_v18  ;;  %3328 = vmatpush.bf16.msra.mxu0 %v2682_v49 }
 0x55a   : > { %2825 = vperm.xlu2 %6631, %v2707_v19   ;;  %v5795_v19 = vld [vmem:[%s9628_s7 + $0x8] sm:$0xf] }
 0x55b   : > { %2735 = vperm.xlu1 %6633, %v2689_v21   ;;  %v2538_v23 = vpop.permute.xlu1 %2537  ;;  %v2440_v25 = vpop.permute.xlu0 %2439  ;;  %v2581_v36 = vld [vmem:[#allocation2 + $0xa0] sm:$0xff] }
 0x55c   : > { %v2448_v8 = vsel %vm761_vm3, %v2438_v11, %v2440_v25  ;;  %3230 = vmatpush.bf16.msrb.mxu2 %v2673_v27  ;;  %3329 = vmatpush.bf16.msra.mxu0 %v2681_v24  ;;  %v2540_v12 = vpop.permute.xlu2 %2539  ;;  %v2679_v41 = vpack.c.bf16 %v2582_v7, %v2581_v36  ;;  %v5801_v11 = vld [vmem:[%s9628_s7 + $0x24] sm:$0xf0]  ;;  %v5796_v27 = vor.u32 %v6473_v15, %v5795_v19  ;;  %v5811_v24 = vld [vmem:[%s9628_s7 + $0x30] sm:$0xf]  ;;  %v5867_v15 = vld [vmem:[%s9628_s7 + $0x98] sm:$0xf] }
 0x55d   : > { %2458 = vst.msk [vmem:[#allocation2 + $0x84] sm:$0xff] %vm684_vm1, %v2448_v8  ;;  %v2549_v30 = vsel %vm2545_vm10, %v2538_v23, %v2540_v12  ;;  %v5804_v57 = vor.u32 %v6474_v10, %v5801_v11  ;;  %v6478_v23 = vld [vmem:[%s9628_s7 + $0x38] sm:$0xf0]  ;;  %v5807_v8 = vld [vmem:[%s9628_s7 + $0x20] sm:$0xf] }
 0x55e   : > { %2559 = vst.msk [vmem:[#allocation2 + $0x114] sm:$0xff] %vm684_vm1, %v2549_v30  ;;  %v5812_v25 = vor.u32 %v6478_v23, %v5811_v24  ;;  %v6476_v12 = vld [vmem:[%s9628_s7 + $0x28] sm:$0xf0] }
 0x55f   : > { %v5808_v30 = vor.u32 %v6476_v12, %v5807_v8 }
 0x560   : > { %3231 = vmatpush.bf16.msrb.mxu2 %v2672_v9  ;;  %3330 = vmatpush.bf16.msra.mxu0 %v2680_v22  ;;  %v6481_v9 = vld [vmem:[%s9628_s7 + $0x50] sm:$0xf0] }
 0x561   : > { %v5824_v22 = vor.u32 %v6481_v9, %v5823_v40  ;;  %v5879_v9 = vld [vmem:[%s9628_s7 + $0xb0] sm:$0xf] }
 0x562   : > { %2900 = vperm.xlu2 %6631, %v2722_v47   ;;  %v6480_v47 = vld [vmem:[%s9628_s7 + $0x4c] sm:$0xf] }
 0x563   : > { %2855 = vperm.xlu1 %6633, %v2713_v54   ;;  %v2442_v42 = vpop.permute.xlu1 %2441  ;;  %v5828_v36 = vor.u32 %v6480_v47, %v5825_v34  ;;  %v5819_v54 = vld [vmem:[%s9628_s7 + $0x38] sm:$0xf] }
 0x564   : > { %3232 = vmatpush.bf16.msrb.mxu2 %v2671_v38  ;;  %3331 = vmatpush.bf16.msra.mxu0 %v2679_v41  ;;  %v2444_v44 = vpop.permute.xlu2 %2443  ;;  %v2577_v53 = vld [vmem:[#allocation2 + $0x80] sm:$0xff]  ;;  %v5820_v7 = vor.u32 %v6479_v56, %v5819_v54  ;;  %v6484_v41 = vld [vmem:[%s9628_s7 + $0x68] sm:$0xf0] }
 0x565   : > { %v2449_v48 = vsel %vm761_vm3, %v2442_v42, %v2444_v44  ;;  %v2536_v50 = vpop.permute.xlu0 %2535  ;;  %v5835_v38 = vld [vmem:[%s9628_s7 + $0x60] sm:$0xf]  ;;  %v5840_v44 = vor.u32 %v6483_v39, %v5837_v33  ;;  %v6499_v54 = vld [vmem:[%s9628_s7 + $0xe0] sm:$0xf0] }
 0x566   : > { %2459 = vst.msk [vmem:[#allocation2 + $0x8c] sm:$0xf] %vm689_vm2, %v2449_v48  ;;  %v2548_v55 = vsel %vm2545_vm10, %v8106_v60, %v2536_v50  ;;  %v2561_v60 = vld [vmem:[#allocation2] sm:$0xff]  ;;  %v5836_v42 = vor.u32 %v6484_v41, %v5835_v38  ;;  %v5831_v48 = vld [vmem:[%s9628_s7 + $0x50] sm:$0xf] }
 0x567   : > { %2558 = vst.msk [vmem:[#allocation2 + $0x10c] sm:$0xff] %vm684_vm1, %v2548_v55  ;;  %v2669_v31 = vpack.c.bf16 %v2562_v58, %v2561_v60  ;;  %v6482_v50 = vld [vmem:[%s9628_s7 + $0x58] sm:$0xf0]  ;;  %v6487_v55 = vld [vmem:[%s9628_s7 + $0x80] sm:$0xf0] }
 0x568   : > { %3233 = vmatpush.bf16.msrb.mxu2 %v2670_v20  ;;  %3332 = vmatpush.bf16.msra.mxu0 %v2678_v59  ;;  %v5832_v52 = vor.u32 %v6482_v50, %v5831_v48  ;;  %v5848_v59 = vor.u32 %v6487_v55, %v5847_v5  ;;  %v6486_v58 = vld [vmem:[%s9628_s7 + $0x7c] sm:$0xf]  ;;  %v5843_v60 = vld [vmem:[%s9628_s7 + $0x68] sm:$0xf]  ;;  %v6497_v5 = vld [vmem:[%s9628_s7 + $0xd0] sm:$0xf0] }
 0x569   : > { %v6498_v38 = vld [vmem:[%s9628_s7 + $0xdc] sm:$0xf]  ;;  %v5897_v41 = vld [vmem:[%s9628_s7 + $0xe4] sm:$0xf0] }
 0x56a   : > { %v5900_v33 = vor.u32 %v6498_v38, %v5897_v41 }
 0x56b   : > { %2895 = vperm.xlu1 %6633, %v2721_v51   ;;  %v5849_v51 = vld [vmem:[%s9628_s7 + $0x84] sm:$0xf0] }
 0x56c   : > { %3234 = vmatpush.bf16.msrb.mxu2 %v2669_v31  ;;  %v5852_v16 = vor.u32 %v6486_v58, %v5849_v51  ;;  %v6485_v31 = vld [vmem:[%s9628_s7 + $0x70] sm:$0xf0] }
 0x56d   : > { %v2578_v62 = vld [vmem:[#allocation2 + $0x88] sm:$0xff] }
 0x56e   : > { %v2677_v17 = vpack.c.bf16 %v2578_v62, %v2577_v53  ;;  %v2595_v2 = vld [vmem:[#allocation2 + $0x110] sm:$0xff]  ;;  %v8266_v53 = vpop.permute.xlu2 %2745  ;;  %v5860_v62 = vor.u32 %v6490_v6, %v5859_v63 }
 0x56f   : > { %3235 = vmatmul.bf16.vlgmr.msrb.gmra.mxu2 %v5788_v28  ;;  %v5844_v28 = vor.u32 %v6485_v31, %v5843_v60  ;;  %v6502_v60 = vld [vmem:[%s9628_s7 + $0xf8] sm:$0xf0] }
 0x570   : > { %3333 = vmatpush.bf16.msra.mxu0 %v2677_v17  ;;  %v6489_v17 = vld [vmem:[%s9628_s7 + $0x94] sm:$0xf] }
 0x573   : > { %3334 = vmatmul.bf16.vlgmr.msra.gmra.mxu0 %v5792_v1  ;;  %v5861_v1 = vld [vmem:[%s9628_s7 + $0x9c] sm:$0xf0] }
 0x575   : > { %v2544_v3 = vpop.permute.xlu1 %2543 }
 0x576   : > { %v2550_v32 = vsel %vm2545_vm10, %v8118_v29, %v2544_v3  ;;  %v2530_v29 = vpop.permute.xlu0 %2529  ;;  %v8277_v4 = vpop.permute.xlu2 %2790 }
 0x577   : > { %2560 = vst.msk [vmem:[#allocation2 + $0x11c] sm:$0xf] %vm689_vm2, %v2550_v32  ;;  %v5864_v32 = vor.u32 %v6489_v17, %v5861_v1 }
 0x57d   : > { %v2532_v13 = vpop.permute.xlu1 %2531 }
 0x57e   : > { %v2547_v14 = vsel %vm2545_vm10, %v2530_v29, %v2532_v13  ;;  %v2596_v49 = vld [vmem:[#allocation2 + $0x118] sm:$0xff]  ;;  %v5871_v29 = vld [vmem:[%s9628_s7 + $0xa8] sm:$0xf]  ;;  %v6493_v13 = vld [vmem:[%s9628_s7 + $0xb0] sm:$0xf0] }
 0x57f   : > { %2557 = vst.msk [vmem:[#allocation2 + $0x104] sm:$0xff] %vm684_vm1, %v2547_v14  ;;  %3240 = vmatmul.bf16.gmra.mxu2 %v5800_v45  ;;  %v2686_v18 = vpack.c.bf16 %v2596_v49, %v2595_v2  ;;  %v6488_v45 = vld [vmem:[%s9628_s7 + $0x88] sm:$0xf0]  ;;  %v5872_v14 = vor.u32 %v6493_v13, %v5871_v29  ;;  %v5873_v49 = vld [vmem:[%s9628_s7 + $0xb4] sm:$0xf0] }
 0x580   : > { %v5856_v11 = vor.u32 %v6488_v45, %v5855_v0  ;;  %v6492_v2 = vld [vmem:[%s9628_s7 + $0xac] sm:$0xf]  ;;  %v5909_v0 = vld [vmem:[%s9628_s7 + $0xfc] sm:$0xf0] }
 0x581   : > { %3431 = vmatpush.bf16.msrb.mxu1 %v2686_v18  ;;  %v8300_v18 = vpop.permute.xlu2 %2770 }
 0x583   : > { %3339 = vmatmul.bf16.gmra.mxu0 %v5804_v57  ;;  %v5876_v57 = vor.u32 %v6492_v2, %v5873_v49 }
 0x585   : > { %v8243_v20 = vpop.permute.xlu1 %2755 }
 0x586   : > { %v2593_v37 = vld [vmem:[#allocation2 + $0x100] sm:$0xff]  ;;  %v2594_v21 = vld [vmem:[#allocation2 + $0x108] sm:$0xff] }
 0x587   : > { %v2685_v43 = vpack.c.bf16 %v2594_v21, %v2593_v37  ;;  %v6491_v37 = vld [vmem:[%s9628_s7 + $0xa0] sm:$0xf0] }
 0x588   : > { %v5868_v21 = vor.u32 %v6491_v37, %v5867_v15  ;;  %v5903_v37 = vld [vmem:[%s9628_s7 + $0xe0] sm:$0xf] }
 0x589   : > { %3432 = vmatpush.bf16.msrb.mxu1 %v2685_v43  ;;  %v5883_v43 = vld [vmem:[%s9628_s7 + $0xc0] sm:$0xf]  ;;  %v8314_v24 = vpop.permute.xlu2 %2765 }
 0x58c   : > { %6001 = vmatmul.msk.bf16.vlgmr.msrb.gmra.mxu1 %vm1735_vm15, %v5796_v27  ;;  %v6496_v27 = vld [vmem:[%s9628_s7 + $0xc8] sm:$0xf0] }
 0x58d   : > { %v8252_v35 = vpop.permute.xlu1 %2800 }
 0x58f   : > { %3245 = vmatmul.bf16.gmra.mxu2 %v5812_v25  ;;  %v5884_v25 = vor.u32 %v6496_v27, %v5883_v43 }
 0x593   : > { %3344 = vmatmul.bf16.gmra.mxu0 %v5816_v46  ;;  %v5888_v46 = vor.u32 %v6495_v26, %v5885_v61  ;;  %v5919_v26 = vld [vmem:[%s9628_s7 + $0x108] sm:$0xf]  ;;  %v6505_v61 = vld [vmem:[%s9628_s7 + $0x110] sm:$0xf0] }
 0x595   : > { %v8275_v3 = vpop.permute.xlu1 %2760 }
 0x59c   : > { %6002 = vmatmul.msk.bf16.gmra.mxu1 %vm1735_vm15, %v5808_v30  ;;  %v8325_v30 = vpop.permute.xlu2 %2780 }
 0x59d   : > { %v8285_v10 = vpop.permute.xlu1 %2810 }
 0x59f   : > { %3250 = vmatmul.bf16.gmra.mxu2 %v5824_v22  ;;  %v6494_v22 = vld [vmem:[%s9628_s7 + $0xb8] sm:$0xf0] }
 0x5a0   : > { %v5880_v34 = vor.u32 %v6494_v22, %v5879_v9  ;;  %v5920_v22 = vor.u32 %v6505_v61, %v5919_v26  ;;  %v6511_v61 = vld [vmem:[%s9628_s7 + $0x140] sm:$0xf0] }
 0x5a3   : > { %3349 = vmatmul.bf16.gmra.mxu0 %v5828_v36  ;;  %v5895_v36 = vld [vmem:[%s9628_s7 + $0xd8] sm:$0xf] }
 0x5a5   : > { %v2726_v19 = vpop.permute.xlu1 %2725 }
 0x5ac   : > { %6003 = vmatmul.msk.bf16.gmra.mxu1 %vm1735_vm15, %v5820_v7  ;;  %v5896_v7 = vor.u32 %v6499_v54, %v5895_v36  ;;  %v6504_v36 = vld [vmem:[%s9628_s7 + $0x10c] sm:$0xf]  ;;  %v5921_v54 = vld [vmem:[%s9628_s7 + $0x114] sm:$0xf0] }
 0x5ad   : > { %v8316_v23 = vpop.permute.xlu1 %2840 }
 0x5af   : > { %3255 = vmatmul.bf16.gmra.mxu2 %v5836_v42  ;;  %v2731_v42 = vpop.permute.xlu2 %2730 }
 0x5b3   : > { %3354 = vmatmul.bf16.gmra.mxu0 %v5840_v44 }
 0x5b5   : > { %v8327_v40 = vpop.permute.xlu1 %2820 }
 0x5b7   : > { %v8356_v55 = vpop.permute.xlu2 %2845 }
 0x5bc   : > { %6004 = vmatmul.msk.bf16.gmra.mxu1 %vm1735_vm15, %v5832_v52  ;;  %v5891_v52 = vld [vmem:[%s9628_s7 + $0xc8] sm:$0xf] }
 0x5bd   : > { %v8348_v39 = vpop.permute.xlu1 %2890  ;;  %v5892_v51 = vor.u32 %v6497_v5, %v5891_v52  ;;  %v6503_v52 = vld [vmem:[%s9628_s7 + $0x100] sm:$0xf0] }
 0x5bf   : > { %3260 = vmatmul.bf16.gmra.mxu2 %v5848_v59  ;;  %v8374_v13 = vpop.permute.xlu2 %2880 }
 0x5c3   : > { %3359 = vmatmul.bf16.gmra.mxu0 %v5852_v16  ;;  %v5907_v16 = vld [vmem:[%s9628_s7 + $0xf0] sm:$0xf] }
 0x5c5   : > { %v8364_v31 = vpop.permute.xlu1 %2865 }
 0x5c7   : > { %v2741_v9 = vpop.permute.xlu2 %2740 }
 0x5cc   : > { %6005 = vmatmul.msk.bf16.gmra.mxu1 %vm1735_vm15, %v5844_v28 }
 0x5cf   : > { %3265 = vmatmul.bf16.gmra.mxu2 %v5860_v62  ;;  %v5908_v62 = vor.u32 %v6502_v60, %v5907_v16 }
 0x5d3   : > { %3364 = vmatmul.bf16.gmra.mxu0 %v5864_v32  ;;  %v6501_v32 = vld [vmem:[%s9628_s7 + $0xf4] sm:$0xf] }
 0x5d4   : > { %v5912_v45 = vor.u32 %v6501_v32, %v5909_v0  ;;  %v5933_v32 = vld [vmem:[%s9628_s7 + $0x12c] sm:$0xf0] }
 0x5dc   : > { %6006 = vmatmul.msk.bf16.gmra.mxu1 %vm1735_vm15, %v5856_v11 }
 0x5df   : > { %3270 = vmatmul.bf16.gmra.mxu2 %v5872_v14 }
 0x5e3   : > { %3369 = vmatmul.bf16.gmra.mxu0 %v5876_v57  ;;  %v2736_v57 = vpop.permute.xlu1 %2735 }
 0x5ec   : > { %6007 = vmatmul.msk.bf16.gmra.mxu1 %vm1735_vm15, %v5868_v21  ;;  %v6500_v21 = vld [vmem:[%s9628_s7 + $0xe8] sm:$0xf0] }
 0x5ef   : > { %3275 = vmatmul.bf16.gmra.mxu2 %v5884_v25  ;;  %v5904_v25 = vor.u32 %v6500_v21, %v5903_v37 }
 0x5f0   : > { %v3335_v8 = vpop.f32.mrf.mxu0 }
 0x5f2   : > { %v3236_v12 = vpop.f32.mrf.mxu2 }
 0x5f3   : > { %3374 = vmatmul.bf16.gmra.mxu0 %v5888_v46  ;;  %v3237_v50 = vadd.f32 %v3236_v12, %v2726_v19 }
 0x5f5   : > { %v3336_v59 = vadd.f32 %v3335_v8, %v3237_v50  ;;  %v5915_v50 = vld [vmem:[%s9628_s7 + $0xf8] sm:$0xf] }
 0x5f8   : > { %v3337_v47 = vpop.f32.mrf.mxu0 }
 0x5fa   : > { %v3238_v56 = vpop.f32.mrf.mxu2 }
 0x5fb   : > { %v3239_v17 = vadd.f32 %v3238_v56, %v2731_v42  ;;  %v5924_v56 = vor.u32 %v6504_v36, %v5921_v54  ;;  %v5945_v36 = vld [vmem:[%s9628_s7 + $0x144] sm:$0xf0] }
 0x5fc   : > { %6008 = vmatmul.msk.bf16.gmra.mxu1 %vm1735_vm15, %v5880_v34 }
 0x5fd   : > { %v3338_v11 = vadd.f32 %v3337_v47, %v3239_v17 }
 0x5ff   : > { %3280 = vmatmul.bf16.gmra.mxu2 %v5896_v7 }
 0x600   : > { %v3340_v44 = vpop.f32.mrf.mxu0 }
 0x602   : > { %v3241_v48 = vpop.f32.mrf.mxu2 }
 0x603   : > { %3379 = vmatmul.bf16.gmra.mxu0 %v5900_v33  ;;  %v3242_v19 = vadd.f32 %v3241_v48, %v2736_v57 }
 0x605   : > { %v3341_v43 = vadd.f32 %v3340_v44, %v3242_v19  ;;  %v5927_v19 = vld [vmem:[%s9628_s7 + $0x110] sm:$0xf] }
 0x608   : > { %v3342_v58 = vpop.f32.mrf.mxu0 }
 0x609   : > { %v3434_v28 = vpop.f32.mrf.mxu1 }
 0x60a   : > { %v3243_v63 = vpop.f32.mrf.mxu2  ;;  %v3435_v6 = vadd.f32 %v3434_v28, %v3336_v59 }
 0x60b   : > { %v3244_v47 = vadd.f32 %v3243_v63, %v2741_v9  ;;  %v2751_v63 = vpop.permute.xlu0 %2750 }
 0x60c   : > { %v3524_v1 = vmax.f32 %v3435_v6, 0.0  ;;  %6009 = vmatmul.msk.bf16.gmra.mxu1 %vm1735_vm15, %v5892_v51  ;;  %v5931_v51 = vld [vmem:[%s9628_s7 + $0x120] sm:$0xf] }
 0x60d   : > { %v3343_v7 = vadd.f32 %v3342_v58, %v3244_v47  ;;  %v5916_v58 = vor.u32 %v6503_v52, %v5915_v50  ;;  %v6509_v50 = vld [vmem:[%s9628_s7 + $0x130] sm:$0xf0] }
 0x60e   : > { %3560 = vst.msk [vmem:[#allocation3] sm:$0xff] %vm684_vm1, %v3524_v1  ;;  %v6507_v1 = vld [vmem:[%s9628_s7 + $0x124] sm:$0xf] }
 0x60f   : > { %3285 = vmatmul.bf16.gmra.mxu2 %v5908_v62  ;;  %v5936_v0 = vor.u32 %v6507_v1, %v5933_v32  ;;  %v5957_v1 = vld [vmem:[%s9628_s7 + $0x15c] sm:$0xf0] }
 0x610   : > { %v3345_v29 = vpop.f32.mrf.mxu0 }
 0x611   : > { %v3436_v14 = vpop.f32.mrf.mxu1 }
 0x612   : > { %v3246_v2 = vpop.f32.mrf.mxu2  ;;  %v3437_v49 = vadd.f32 %v3436_v14, %v3338_v11 }
 0x613   : > { %3384 = vmatmul.bf16.gmra.mxu0 %v5912_v45  ;;  %v3247_v44 = vadd.f32 %v3246_v2, %v8266_v53  ;;  %v6508_v53 = vld [vmem:[%s9628_s7 + $0x128] sm:$0xf0] }
 0x614   : > { %v3525_v15 = vmax.f32 %v3437_v49, 0.0  ;;  %v5932_v6 = vor.u32 %v6508_v53, %v5931_v51  ;;  %v5955_v51 = vld [vmem:[%s9628_s7 + $0x150] sm:$0xf]  ;;  %v6514_v53 = vld [vmem:[%s9628_s7 + $0x158] sm:$0xf0] }
 0x615   : > { %v3346_v5 = vadd.f32 %v3345_v29, %v3247_v44 }
 0x616   : > { %3561 = vst.msk [vmem:[#allocation3 + $0x18] sm:$0xff] %vm684_vm1, %v3525_v15  ;;  %v6506_v15 = vld [vmem:[%s9628_s7 + $0x118] sm:$0xf0] }
 0x617   : > { %v5928_v26 = vor.u32 %v6506_v15, %v5927_v19 }
 0x618   : > { %v3347_v27 = vpop.f32.mrf.mxu0 }
 0x619   : > { %v3439_v46 = vpop.f32.mrf.mxu1 }
 0x61a   : > { %v3248_v8 = vpop.f32.mrf.mxu2  ;;  %v3440_v12 = vadd.f32 %v3439_v46, %v3341_v43 }
 0x61b   : > { %v3249_v62 = vadd.f32 %v3248_v8, %v2751_v63 }
 0x61c   : > { %v3526_v34 = vmax.f32 %v3440_v12, 0.0  ;;  %6010 = vmatmul.msk.bf16.gmra.mxu1 %vm1735_vm15, %v5904_v25 }
 0x61d   : > { %v3348_v45 = vadd.f32 %v3347_v27, %v3249_v62 }
 0x61e   : > { %3562 = vst.msk [vmem:[#allocation3 + $0x30] sm:$0xff] %vm684_vm1, %v3526_v34  ;;  %v6510_v34 = vld [vmem:[%s9628_s7 + $0x13c] sm:$0xf] }
 0x61f   : > { %3290 = vmatmul.bf16.gmra.mxu2 %v5920_v22 }
 0x620   : > { %v3350_v38 = vpop.f32.mrf.mxu0 }
 0x621   : > { %v3441_v41 = vpop.f32.mrf.mxu1 }
 0x622   : > { %v3251_v42 = vpop.f32.mrf.mxu2  ;;  %v3442_v33 = vadd.f32 %v3441_v41, %v3343_v7 }
 0x623   : > { %3389 = vmatmul.bf16.gmra.mxu0 %v5924_v56  ;;  %v3252_v49 = vadd.f32 %v3251_v42, %v8243_v20  ;;  %v5943_v20 = vld [vmem:[%s9628_s7 + $0x138] sm:$0xf]  ;;  %v5948_v56 = vor.u32 %v6510_v34, %v5945_v36 }
 0x624   : > { %v3527_v48 = vmax.f32 %v3442_v33, 0.0  ;;  %v5944_v9 = vor.u32 %v6511_v61, %v5943_v20  ;;  %v5969_v34 = vld [vmem:[%s9628_s7 + $0x174] sm:$0xf0] }
 0x625   : > { %v3351_v43 = vadd.f32 %v3350_v38, %v3252_v49 }
 0x626   : > { %3563 = vst.msk [vmem:[#allocation3 + $0x48] sm:$0xff] %vm684_vm1, %v3527_v48  ;;  %v5939_v48 = vld [vmem:[%s9628_s7 + $0x128] sm:$0xf] }
 0x628   : > { %v3352_v59 = vpop.f32.mrf.mxu0 }
 0x629   : > { %v3444_v16 = vpop.f32.mrf.mxu1 }
 0x62a   : > { %v3253_v60 = vpop.f32.mrf.mxu2  ;;  %v3445_v28 = vadd.f32 %v3444_v16, %v3346_v5  ;;  %v8457_v16 = vpop.permute.xlu0 %2795 }
 0x62b   : > { %v3254_v22 = vadd.f32 %v3253_v60, %v8275_v3 }
 0x62c   : > { %v3528_v17 = vmax.f32 %v3445_v28, 0.0  ;;  %6011 = vmatmul.msk.bf16.gmra.mxu1 %vm1735_vm15, %v5916_v58  ;;  %v5940_v58 = vor.u32 %v6509_v50, %v5939_v48  ;;  %v6515_v48 = vld [vmem:[%s9628_s7 + $0x160] sm:$0xf0] }
 0x62d   : > { %v3353_v7 = vadd.f32 %v3352_v59, %v3254_v22 }
 0x62e   : > { %3564 = vst.msk [vmem:[#allocation3 + $0x60] sm:$0xf] %vm689_vm2, %v3528_v17  ;;  %v3570_v37 = vrot.slane %v3528_v17, 4  ;;  %v6513_v17 = vld [vmem:[%s9628_s7 + $0x154] sm:$0xf] }
 0x62f   : > { %3295 = vmatmul.bf16.gmra.mxu2 %v5932_v6  ;;  %v5956_v6 = vor.u32 %v6514_v53, %v5955_v51 }
 0x630   : > { %v3355_v11 = vpop.f32.mrf.mxu0 }
 0x631   : > { %v3446_v29 = vpop.f32.mrf.mxu1 }
 0x632   : > { %v3256_v14 = vpop.f32.mrf.mxu2  ;;  %v3447_v2 = vadd.f32 %v3446_v29, %v3348_v45  ;;  %v2776_v49 = vpop.permute.xlu0 %2775 }
 0x633   : > { %3394 = vmatmul.bf16.gmra.mxu0 %v5936_v0  ;;  %v3257_v63 = vadd.f32 %v3256_v14, %v8314_v24  ;;  %v5960_v0 = vor.u32 %v6513_v17, %v5957_v1 }
 0x634   : > { %v3529_v57 = vmax.f32 %v3447_v2, 0.0 }
 0x635   : > { %v3356_v32 = vadd.f32 %v3355_v11, %v3257_v63  ;;  %v6512_v11 = vld [vmem:[%s9628_s7 + $0x148] sm:$0xf0] }
 0x636   : > { %v3571_v21 = vrot.slane %v3529_v57, 4 }
 0x638   : > { %v3572_v27 = vsel %vm1516_vm4, %v3570_v37, %v3571_v21  ;;  %v3357_v25 = vpop.f32.mrf.mxu0  ;;  %v5951_v37 = vld [vmem:[%s9628_s7 + $0x140] sm:$0xf] }
 0x639   : > { %v3449_v46 = vpop.f32.mrf.mxu1  ;;  %3579 = vrot.lane.b32.xlu2 %v3572_v27, %s9661_s27  ;;  %v5952_v27 = vor.u32 %v6512_v11, %v5951_v37 }
 0x63a   : > { %v3258_v8 = vpop.f32.mrf.mxu2  ;;  %v3450_v12 = vadd.f32 %v3449_v46, %v3351_v43 }
 0x63b   : > { %v3259_v62 = vadd.f32 %v3258_v8, %v8300_v18 }
 0x63c   : > { %v3530_v47 = vmax.f32 %v3450_v12, 0.0  ;;  %6012 = vmatmul.msk.bf16.gmra.mxu1 %vm1735_vm15, %v5928_v26  ;;  %v6517_v26 = vld [vmem:[%s9628_s7 + $0x170] sm:$0xf0] }
 0x63d   : > { %v3358_v45 = vadd.f32 %v3357_v25, %v3259_v62  ;;  %v5967_v25 = vld [vmem:[%s9628_s7 + $0x168] sm:$0xf] }
 0x63e   : > { %v3573_v54 = vrot.slane %v3530_v47, 4  ;;  %v5968_v12 = vor.u32 %v6517_v26, %v5967_v25  ;;  %v6516_v47 = vld [vmem:[%s9628_s7 + $0x16c] sm:$0xf] }
 0x63f   : > { %3300 = vmatmul.bf16.gmra.mxu2 %v5944_v9 }
 0x640   : > { %v3574_v38 = vsel %vm1516_vm4, %v3571_v21, %v3573_v54  ;;  %v3360_v41 = vpop.f32.mrf.mxu0 }
 0x641   : > { %v3451_v42 = vpop.f32.mrf.mxu1  ;;  %3581 = vrot.lane.b32.xlu0 %v3574_v38, %s9661_s27 }
 0x642   : > { %v3261_v3 = vpop.f32.mrf.mxu2  ;;  %v3452_v33 = vadd.f32 %v3451_v42, %v3353_v7  ;;  %v2716_v42 = vld [vmem:[%s9629_s8 + $0xe8] sm:$0xff] }
 0x643   : > { %3399 = vmatmul.bf16.gmra.mxu0 %v5948_v56  ;;  %v3262_v57 = vadd.f32 %v3261_v3, %v2776_v49 }
 0x644   : > { %v3531_v44 = vmax.f32 %v3452_v33, 0.0  ;;  %v2806_v33 = vpop.permute.xlu0 %2805 }
 0x645   : > { %v3361_v21 = vadd.f32 %v3360_v41, %v3262_v57 }
 0x646   : > { %v3575_v52 = vrot.slane %v3531_v44, 4  ;;  %v5963_v44 = vld [vmem:[%s9628_s7 + $0x158] sm:$0xf] }
 0x648   : > { %v3576_v5 = vsel %vm1516_vm4, %v3573_v54, %v3575_v52  ;;  %v3362_v59 = vpop.f32.mrf.mxu0 }
 0x649   : > { %v3454_v60 = vpop.f32.mrf.mxu1  ;;  %3583 = vrot.lane.b32.xlu0 %v3576_v5, %s9661_s27  ;;  %v5979_v5 = vld [vmem:[%s9628_s7 + $0x180] sm:$0xf] }
 0x64a   : > { %v3263_v28 = vpop.f32.mrf.mxu2  ;;  %v3455_v24 = vadd.f32 %v3454_v60, %v3356_v32  ;;  %v6519_v60 = vld [vmem:[%s9628_s7 + $0x184] sm:$0xf] }
 0x64b   : > { %v3264_v9 = vadd.f32 %v3263_v28, %v8325_v30  ;;  %v5972_v30 = vor.u32 %v6516_v47, %v5969_v34  ;;  %v5981_v28 = vld [vmem:[%s9628_s7 + $0x18c] sm:$0xf0]  ;;  %v2826_v34 = vpop.permute.xlu2 %2825 }
 0x64c   : > { %6013 = vmatmul.msk.bf16.gmra.mxu1 %vm1735_vm15, %v5940_v58  ;;  %v3532_v15 = vmax.f32 %v3455_v24, 0.0  ;;  %v2786_v63 = vpop.permute.xlu0 %2785  ;;  %v5975_v24 = vld [vmem:[%s9628_s7 + $0x170] sm:$0xf] }
 0x64d   : > { %v3363_v54 = vadd.f32 %v3362_v59, %v3264_v9  ;;  %v6520_v59 = vld [vmem:[%s9628_s7 + $0x188] sm:$0xf0] }
 0x64e   : > { %v8486_v20 = vrot.slane %v3532_v15, 4  ;;  %v5980_v53 = vor.u32 %v6520_v59, %v5979_v5 }
 0x64f   : > { %3305 = vmatmul.bf16.gmra.mxu2 %v5956_v6  ;;  %v5984_v6 = vor.u32 %v6519_v60, %v5981_v28 }
 0x650   : > { %v8469_v29 = vpop.f32.mrf.mxu0  ;;  %v3578_v36 = vsel %vm1516_vm4, %v3575_v52, %v8486_v20  ;;  %v5964_v52 = vor.u32 %v6515_v48, %v5963_v44  ;;  %v2717_v48 = vld [vmem:[%s9629_s8 + $0xf0] sm:$0xff] }
 0x651   : > { %v3456_v14 = vpop.f32.mrf.mxu1 }
 0x652   : > { %v8471_v2 = vpop.f32.mrf.mxu2  ;;  %v3457_v18 = vadd.f32 %v3456_v14, %v3358_v45  ;;  %v6518_v14 = vld [vmem:[%s9628_s7 + $0x178] sm:$0xf0] }
 0x653   : > { %3404 = vmatmul.bf16.gmra.mxu0 %v5960_v0  ;;  %v8569_v60 = vpop.permute.xlu2 %2900 }
 0x654   : > { %v3533_v19 = vmax.f32 %v3457_v18, 0.0  ;;  %v8541_v15 = vpop.permute.xlu0 %2835 }
 0x656   : > { %3604 = vrot.lane.b32.xlu1 %v3533_v19, %s9669_s17  ;;  %v5991_v19 = vld [vmem:[%s9628_s7 + $0x198] sm:$0xf] }
 0x658   : > { %v3367_v43 = vpop.f32.mrf.mxu0 }
 0x659   : > { %v3459_v61 = vpop.f32.mrf.mxu1 }
 0x65a   : > { %v3268_v46 = vpop.f32.mrf.mxu2  ;;  %v3460_v8 = vadd.f32 %v3459_v61, %v3361_v21  ;;  %v6522_v61 = vld [vmem:[%s9628_s7 + $0x19c] sm:$0xf] }
 0x65b   : > { %v3269_v62 = vadd.f32 %v3268_v46, %v8277_v4  ;;  %v5976_v4 = vor.u32 %v6518_v14, %v5975_v24  ;;  %v5993_v46 = vld [vmem:[%s9628_s7 + $0x1a4] sm:$0xf0] }
 0x65c   : > { %v3534_v22 = vmax.f32 %v3460_v8, 0.0  ;;  %6014 = vmatmul.msk.bf16.gmra.mxu1 %vm1735_vm15, %v5952_v27  ;;  %v5996_v9 = vor.u32 %v6522_v61, %v5993_v46 }
 0x65d   : > { %v3368_v0 = vadd.f32 %v3367_v43, %v3269_v62 }
 0x65e   : > { %3585 = vrot.lane.b32.xlu1 %v3578_v36, %s9661_s27  ;;  %3606 = vrot.lane.b32.xlu2 %v3534_v22, %s9669_s17 }
 0x65f   : > { %3310 = vmatmul.bf16.gmra.mxu2 %v5968_v12 }
 0x660   : > { %v3370_v56 = vpop.f32.mrf.mxu0 }
 0x661   : > { %v3461_v7 = vpop.f32.mrf.mxu1 }
 0x662   : > { %v3271_v38 = vpop.f32.mrf.mxu2  ;;  %v3462_v41 = vadd.f32 %v3461_v7, %v3363_v54 }
 0x663   : > { %3409 = vmatmul.bf16.gmra.mxu0 %v5972_v30  ;;  %v3272_v45 = vadd.f32 %v3271_v38, %v8457_v16  ;;  %v6523_v16 = vld [vmem:[%s9628_s7 + $0x1a0] sm:$0xf0]  ;;  %v3267_v38 = vadd.f32 %v8471_v2, %v2786_v63 }
 0x664   : > { %v3535_v3 = vmax.f32 %v3462_v41, 0.0  ;;  %v5992_v27 = vor.u32 %v6523_v16, %v5991_v19  ;;  %v5987_v41 = vld [vmem:[%s9628_s7 + $0x188] sm:$0xf]  ;;  %v6524_v19 = vld [vmem:[%s9628_s7 + $0x1a8] sm:$0xf0] }
 0x665   : > { %v3371_v49 = vadd.f32 %v3370_v56, %v3272_v45  ;;  %v2816_v56 = vpop.permute.xlu0 %2815  ;;  %v3366_v2 = vadd.f32 %v8469_v29, %v3267_v38 }
 0x666   : > { %2870 = vperm.xlu1 %6633, %v2716_v42   ;;  %3608 = vrot.lane.b32.xlu2 %v3535_v3, %s9669_s17  ;;  %v6521_v42 = vld [vmem:[%s9628_s7 + $0x190] sm:$0xf0] }
 0x667   : > { %v5988_v5 = vor.u32 %v6521_v42, %v5987_v41 }
 0x668   : > { %v3372_v50 = vpop.f32.mrf.mxu0 }
 0x669   : > { %v8516_v58 = vpop.f32.mrf.mxu1 }
 0x66a   : > { %v3273_v51 = vpop.f32.mrf.mxu2 }
 0x66b   : > { %v3274_v25 = vadd.f32 %v3273_v51, %v8252_v35 }
 0x66c   : > { %6015 = vmatmul.msk.bf16.gmra.mxu1 %vm1735_vm15, %v5964_v52 }
 0x66d   : > { %v3373_v22 = vadd.f32 %v3372_v50, %v3274_v25 }
 0x66f   : > { %3315 = vmatmul.bf16.gmra.mxu2 %v5980_v53 }
 0x670   : > { %v3375_v17 = vpop.f32.mrf.mxu0 }
 0x671   : > { %v3466_v1 = vpop.f32.mrf.mxu1 }
 0x672   : > { %v3276_v32 = vpop.f32.mrf.mxu2  ;;  %v8533_v18 = vadd.f32 %v3466_v1, %v3368_v0 }
 0x673   : > { %3414 = vmatmul.bf16.gmra.mxu0 %v5984_v6  ;;  %v3277_v3 = vadd.f32 %v3276_v32, %v2806_v33  ;;  %v3465_v33 = vadd.f32 %v8516_v58, %v3366_v2  ;;  %v8574_v6 = vpop.permute.xlu0 %2885 }
 0x674   : > { %v3537_v11 = vmax.f32 %v8533_v18, 0.0 }
 0x675   : > { %v3376_v51 = vadd.f32 %v3375_v17, %v3277_v3  ;;  %v3536_v62 = vmax.f32 %v3465_v33, 0.0 }
 0x676   : > { %v3628_v8 = vrot.slane %v3537_v11, 4 }
 0x678   : > { %v3377_v57 = vpop.f32.mrf.mxu0 }
 0x679   : > { %v3469_v37 = vpop.f32.mrf.mxu1 }
 0x67a   : > { %v3278_v21 = vpop.f32.mrf.mxu2  ;;  %v3470_v43 = vadd.f32 %v3469_v37, %v3371_v49 }
 0x67b   : > { %v3279_v28 = vadd.f32 %v3278_v21, %v8285_v10 }
 0x67c   : > { %v3538_v26 = vmax.f32 %v3470_v43, 0.0  ;;  %6016 = vmatmul.msk.bf16.gmra.mxu1 %vm1735_vm15, %v5976_v4 }
 0x67d   : > { %v3378_v1 = vadd.f32 %v3377_v57, %v3279_v28  ;;  %v5999_v57 = vld [vmem:[%s9628_s7 + $0x1a0] sm:$0xf] }
 0x67e   : > { %v3629_v12 = vrot.slane %v3538_v26, 4  ;;  %v6000_v25 = vor.u32 %v6524_v19, %v5999_v57 }
 0x67f   : > { %3320 = vmatmul.bf16.gmra.mxu2 %v5992_v27 }
 0x680   : > { %v3630_v35 = vsel %vm1516_vm4, %v3628_v8, %v3629_v12  ;;  %v3380_v47 = vpop.f32.mrf.mxu0 }
 0x681   : > { %v3471_v36 = vpop.f32.mrf.mxu1  ;;  %3637 = vrot.lane.b32.xlu2 %v3630_v35, %s9670_s23 }
 0x682   : > { %v3281_v30 = vpop.f32.mrf.mxu2  ;;  %v3472_v54 = vadd.f32 %v3471_v36, %v3373_v22 }
 0x683   : > { %3419 = vmatmul.bf16.gmra.mxu0 %v5996_v9  ;;  %v3282_v10 = vadd.f32 %v3281_v30, %v2816_v56 }
 0x684   : > { %v3539_v7 = vmax.f32 %v3472_v54, 0.0 }
 0x685   : > { %v3381_v37 = vadd.f32 %v3380_v47, %v3282_v10 }
 0x686   : > { %v3631_v44 = vrot.slane %v3539_v7, 4 }
 0x688   : > { %v3632_v50 = vsel %vm1516_vm4, %v3629_v12, %v3631_v44  ;;  %v3382_v52 = vpop.f32.mrf.mxu0 }
 0x689   : > { %v3474_v59 = vpop.f32.mrf.mxu1  ;;  %3639 = vrot.lane.b32.xlu0 %v3632_v50, %s9670_s23  ;;  %2875 = vperm.xlu2 %6631, %v2717_v48   ;;  %v8609_v48 = vpop.permute.xlu1 %2855 }
 0x68a   : > { %v3283_v53 = vpop.f32.mrf.mxu2  ;;  %v3475_v63 = vadd.f32 %v3474_v59, %v3376_v51 }
 0x68b   : > { %v3284_v12 = vadd.f32 %v3283_v53, %v8327_v40 }
 0x68c   : > { %6017 = vmatmul.msk.bf16.gmra.mxu1 %vm1735_vm15, %v5988_v5  ;;  %v3540_v29 = vmax.f32 %v3475_v63, 0.0 }
 0x68d   : > { %v3383_v35 = vadd.f32 %v3382_v52, %v3284_v12  ;;  %v6541_v12 = vld [vmem:[%s9630_s9 + $0x80] sm:$0xf0] }
 0x68e   : > { %v3633_v14 = vrot.slane %v3540_v29, 4 }
 0x690   : > { %v3385_v32 = vpop.f32.mrf.mxu0  ;;  %v3634_v43 = vsel %vm1516_vm4, %v3631_v44, %v3633_v14 }
 0x691   : > { %v3476_v0 = vpop.f32.mrf.mxu1  ;;  %3610 = vrot.lane.b32.xlu0 %v3536_v62, %s9669_s17  ;;  %3587 = vrot.lane.b32.xlu2 %v8486_v20, %s9661_s27  ;;  %v8586_v20 = vpop.permute.xlu0 %2860 }
 0x692   : > { %v3286_v17 = vpop.f32.mrf.mxu2  ;;  %v3477_v45 = vadd.f32 %v3476_v0, %v3378_v1  ;;  %v8621_v33 = vpop.permute.xlu1 %2895 }
 0x693   : > { %v3287_v58 = vadd.f32 %v3286_v17, %v2826_v34  ;;  %v3580_v24 = vpop.permute.xlu2 %3579 }
 0x694   : > { %v3541_v49 = vmax.f32 %v3477_v45, 0.0  ;;  %3594 = vst.msk [vmem:[#allocation3] sm:$0xff] %vm1541_vm5, %v3580_v24  ;;  %v6547_v24 = vld [vmem:[%s9630_s9 + $0xb0] sm:$0xf0] }
 0x695   : > { %v3386_v4 = vadd.f32 %v3385_v32, %v3287_v58  ;;  %v6105_v58 = vld [vmem:[%s9630_s9 + $0xa8] sm:$0xf] }
 0x696   : > { %v3635_v16 = vrot.slane %v3541_v49, 4  ;;  %v6106_v10 = vor.u32 %v6547_v24, %v6105_v58  ;;  %v6526_v58 = vld [vmem:[%s9630_s9 + $0x8] sm:$0xf0] }
 0x698   : > { %v3636_v21 = vsel %vm1516_vm4, %v3633_v14, %v3635_v16  ;;  %v8590_v27 = vpop.f32.mrf.mxu0  ;;  %4184 = vmatpush.bf16.msra.mxu3 %v6106_v10 }
 0x699   : > { %v3479_v26 = vpop.f32.mrf.mxu1  ;;  %3643 = vrot.lane.b32.xlu1 %v3636_v21, %s9670_s23  ;;  %3641 = vrot.lane.b32.xlu0 %v3634_v43, %s9670_s23  ;;  %v8599_v22 = vpop.permute.xlu0 %2850 }
 0x69a   : > { %v8594_v61 = vpop.f32.mrf.mxu2  ;;  %v3480_v46 = vadd.f32 %v3479_v26, %v3381_v37  ;;  %v6544_v37 = vld [vmem:[%s9630_s9 + $0x98] sm:$0xf0] }
 0x69c   : > { %v3542_v8 = vmax.f32 %v3480_v46, 0.0  ;;  %6018 = vmatmul.msk.bf16.gmra.mxu1 %vm1735_vm15, %v6000_v25 }
 0x69e   : > { %3667 = vrot.lane.b32.xlu2 %v3542_v8, %s9671_s29  ;;  %v6081_v8 = vld [vmem:[%s9630_s9 + $0x78] sm:$0xf] }
 0x6a0   : > { %v3390_v9 = vpop.f32.mrf.mxu0 }
 0x6a1   : > { %v3481_v47 = vpop.f32.mrf.mxu1  ;;  %3645 = vrot.lane.b32.xlu1 %v3635_v16, %s9670_s23  ;;  %3612 = vrot.lane.b32.xlu0 %v3537_v11, %s9669_s17  ;;  %v2831_v38 = vpop.permute.xlu0 %2830  ;;  %v6093_v16 = vld [vmem:[%s9630_s9 + $0x90] sm:$0xf] }
 0x6a2   : > { %v3291_v34 = vpop.f32.mrf.mxu2  ;;  %v3482_v36 = vadd.f32 %v3481_v47, %v3383_v35  ;;  %v6094_v25 = vor.u32 %v6544_v37, %v6093_v16  ;;  %v3289_v26 = vadd.f32 %v8594_v61, %v2831_v38 }
 0x6a3   : > { %v3292_v18 = vadd.f32 %v3291_v34, %v8541_v15 }
 0x6a4   : > { %v3543_v30 = vmax.f32 %v3482_v36, 0.0  ;;  %4185 = vmatpush.bf16.msra.mxu3 %v6094_v25  ;;  %v3388_v34 = vadd.f32 %v8590_v27, %v3289_v26  ;;  %v6057_v27 = vld [vmem:[%s9630_s9 + $0x48] sm:$0xf] }
 0x6a5   : > { %v3391_v59 = vadd.f32 %v3390_v9, %v3292_v18  ;;  %v6082_v9 = vor.u32 %v6541_v12, %v6081_v8 }
 0x6a8   : > { %v3392_v54 = vpop.f32.mrf.mxu0  ;;  %4186 = vmatpush.bf16.msra.mxu3 %v6082_v9 }
 0x6a9   : > { %v3484_v56 = vpop.f32.mrf.mxu1  ;;  %3669 = vrot.lane.b32.xlu0 %v3543_v30, %s9671_s29 }
 0x6aa   : > { %v3293_v40 = vpop.f32.mrf.mxu2  ;;  %v8606_v7 = vadd.f32 %v3484_v56, %v3386_v4  ;;  %v6538_v56 = vld [vmem:[%s9630_s9 + $0x68] sm:$0xf0] }
 0x6ab   : > { %v3294_v51 = vadd.f32 %v3293_v40, %v8316_v23 }
 0x6ad   : > { %v3393_v28 = vadd.f32 %v3392_v54, %v3294_v51  ;;  %v6069_v54 = vld [vmem:[%s9630_s9 + $0x60] sm:$0xf] }
 0x6ae   : > { %v6070_v40 = vor.u32 %v6538_v56, %v6069_v54 }
 0x6b0   : > { %v3395_v41 = vpop.f32.mrf.mxu0  ;;  %4187 = vmatpush.bf16.msra.mxu3 %v6070_v40 }
 0x6b1   : > { %v3486_v42 = vpop.f32.mrf.mxu1 }
 0x6b2   : > { %v3296_v3 = vpop.f32.mrf.mxu2  ;;  %v3487_v36 = vadd.f32 %v3486_v42, %v3388_v34 }
 0x6b3   : > { %v3582_v44 = vpop.permute.xlu0 %3581  ;;  %v3297_v23 = vadd.f32 %v3296_v3, %v8356_v55 }
 0x6b4   : > { %3595 = vst.msk [vmem:[#allocation3 + $0x18] sm:$0xff] %vm1541_vm5, %v3582_v44  ;;  %v3545_v42 = vmax.f32 %v3487_v36, 0.0 }
 0x6b5   : > { %v3396_v14 = vadd.f32 %v3395_v41, %v3297_v23  ;;  %v6535_v41 = vld [vmem:[%s9630_s9 + $0x50] sm:$0xf0] }
 0x6b6   : > { %v6058_v3 = vor.u32 %v6535_v41, %v6057_v27 }
 0x6b8   : > { %v3607_v11 = vpop.permute.xlu2 %3606  ;;  %v8612_v50 = vpop.f32.mrf.mxu0  ;;  %4188 = vmatpush.bf16.msra.mxu3 %v6058_v3 }
 0x6b9   : > { %3620 = vst.msk [vmem:[#allocation3 + $0x18] sm:$0xff] %vm1568_vm6, %v3607_v11  ;;  %v3489_v52 = vpop.f32.mrf.mxu1  ;;  %v6045_v11 = vld [vmem:[%s9630_s9 + $0x30] sm:$0xf] }
 0x6ba   : > { %v8615_v5 = vpop.f32.mrf.mxu2  ;;  %v8619_v53 = vadd.f32 %v3489_v52, %v3391_v59  ;;  %v6532_v52 = vld [vmem:[%s9630_s9 + $0x38] sm:$0xf0] }
 0x6bb   : > { %v3584_v2 = vpop.permute.xlu0 %3583  ;;  %v6046_v59 = vor.u32 %v6532_v52, %v6045_v11 }
 0x6bc   : > { %3596 = vst.msk [vmem:[#allocation3 + $0x30] sm:$0xff] %vm1541_vm5, %v3584_v2  ;;  %v3546_v62 = vmax.f32 %v8619_v53, 0.0  ;;  %v6209_v53 = vld [vmem:[%s9630_s9 + $0x170] sm:$0xf] }
 0x6bd   : > { %4189 = vmatpush.bf16.msra.mxu3 %v6046_v59 }
 0x6be   : > { %v3691_v17 = vrot.slane %v3546_v62, 4 }
 0x6c0   : > { %v3609_v15 = vpop.permute.xlu2 %3608  ;;  %v8627_v32 = vpop.f32.mrf.mxu0 }
 0x6c1   : > { %3621 = vst.msk [vmem:[#allocation3 + $0x30] sm:$0xff] %vm1568_vm6, %v3609_v15  ;;  %v3491_v63 = vpop.f32.mrf.mxu1  ;;  %v6529_v15 = vld [vmem:[%s9630_s9 + $0x20] sm:$0xf0] }
 0x6c2   : > { %v8625_v1 = vpop.f32.mrf.mxu2  ;;  %v3492_v29 = vadd.f32 %v3491_v63, %v3393_v28  ;;  %v6033_v28 = vld [vmem:[%s9630_s9 + $0x18] sm:$0xf] }
 0x6c3   : > { %v6034_v63 = vor.u32 %v6529_v15, %v6033_v28  ;;  %v3302_v16 = vadd.f32 %v8625_v1, %v8609_v48 }
 0x6c4   : > { %v3547_v0 = vmax.f32 %v3492_v29, 0.0 }
 0x6c5   : > { %4190 = vmatpush.bf16.msra.mxu3 %v6034_v63 }
 0x6c6   : > { %v3692_v45 = vrot.slane %v3547_v0, 4 }
 0x6c8   : > { %v3605_v49 = vpop.permute.xlu1 %3604  ;;  %v3693_v4 = vsel %vm1516_vm4, %v3691_v17, %v3692_v45  ;;  %v3402_v43 = vpop.f32.mrf.mxu0 }
 0x6c9   : > { %3619 = vst.msk [vmem:[#allocation3] sm:$0xff] %vm1568_vm6, %v3605_v49  ;;  %v3494_v55 = vpop.f32.mrf.mxu1  ;;  %3700 = vrot.lane.b32.xlu1 %v3693_v4, %s9672_s21 }
 0x6ca   : > { %v3303_v57 = vpop.f32.mrf.mxu2  ;;  %v3495_v19 = vadd.f32 %v3494_v55, %v3396_v14 }
 0x6cb   : > { %v3304_v2 = vadd.f32 %v3303_v57, %v8586_v20 }
 0x6cc   : > { %v3548_v21 = vmax.f32 %v3495_v19, 0.0 }
 0x6cd   : > { %v3403_v29 = vadd.f32 %v3402_v43, %v3304_v2  ;;  %v3401_v43 = vadd.f32 %v8627_v32, %v3302_v16 }
 0x6ce   : > { %v8648_v46 = vrot.slane %v3548_v21, 4 }
 0x6d0   : > { %v3586_v35 = vpop.permute.xlu1 %3585  ;;  %v3695_v47 = vsel %vm1516_vm4, %v3692_v45, %v8648_v46  ;;  %v3405_v38 = vpop.f32.mrf.mxu0  ;;  %v6021_v45 = vld [vmem:[%s9630_s9] sm:$0xf] }
 0x6d1   : > { %3597 = vst.msk [vmem:[#allocation3 + $0x48] sm:$0xff] %vm1541_vm5, %v3586_v35  ;;  %v3496_v61 = vpop.f32.mrf.mxu1  ;;  %3702 = vrot.lane.b32.xlu2 %v3695_v47, %s9672_s21  ;;  %v6022_v14 = vor.u32 %v6526_v58, %v6021_v45  ;;  %v3544_v35 = vmax.f32 %v8606_v7, 0.0 }
 0x6d2   : > { %v3306_v30 = vpop.f32.mrf.mxu2 }
 0x6d3   : > { %v3307_v24 = vadd.f32 %v3306_v30, %v8364_v31  ;;  %4191 = vmatpush.bf16.msra.mxu3 %v6022_v14  ;;  %v3299_v31 = vadd.f32 %v8615_v5, %v8599_v22 }
 0x6d5   : > { %v3406_v4 = vadd.f32 %v3405_v38, %v3307_v24  ;;  %v3398_v25 = vadd.f32 %v8612_v50, %v3299_v31 }
 0x6d7   : > { %v3497_v9 = vadd.f32 %v3496_v61, %v3398_v25 }
 0x6d8   : > { %v8691_v23 = vpop.f32.mrf.mxu0  ;;  %v2871_v56 = vpop.permute.xlu1 %2870 }
 0x6d9   : > { %v3499_v44 = vpop.f32.mrf.mxu1  ;;  %3673 = vrot.lane.b32.xlu2 %v3545_v42, %s9671_s29  ;;  %v3549_v47 = vmax.f32 %v3497_v9, 0.0 }
 0x6da   : > { %v8682_v51 = vpop.f32.mrf.mxu2  ;;  %v3500_v26 = vadd.f32 %v3499_v44, %v3401_v43 }
 0x6db   : > { %v3638_v18 = vpop.permute.xlu2 %3637  ;;  %v8722_v5 = vrot.slane %v3549_v47, 4 }
 0x6dc   : > { %3652 = vst.msk [vmem:[#allocation3] sm:$0xff] %vm9666_vm8, %v3638_v18  ;;  %v3550_v1 = vmax.f32 %v3500_v26, 0.0 }
 0x6dd   : > { %3653 = vst.msk [vmem:[#allocation3 + $0x8] sm:$0xff] %vm9665_vm0, %v3638_v18 }
 0x6de   : > { %v8717_v36 = vrot.slane %v3550_v1, 4 }
 0x6e0   : > { %v8705_v57 = vpop.f32.mrf.mxu0  ;;  %v3699_v7 = vsel %vm1516_vm4, %v8722_v5, %v8717_v36 }
 0x6e1   : > { %v3501_v20 = vpop.f32.mrf.mxu1 }
 0x6e2   : > { %v3502_v0 = vadd.f32 %v3501_v20, %v3403_v29  ;;  %v8703_v49 = vpop.f32.mrf.mxu2  ;;  %v3309_v29 = vadd.f32 %v8682_v51, %v2871_v56 }
 0x6e3   : > { %v8693_v17 = vpop.permute.xlu2 %2875  ;;  %v3783_v38 = vld [vmem:[#allocation3] sm:$0xff] }
 0x6e4   : > { %v3551_v10 = vmax.f32 %v3502_v0, 0.0 }
 0x6e6   : > { %3725 = vrot.lane.b32.xlu0 %v3551_v10, %s9673_s14 }
 0x6e8   : > { %v3412_v48 = vpop.f32.mrf.mxu0 }
 0x6e9   : > { %v3504_v55 = vpop.f32.mrf.mxu1 }
 0x6ea   : > { %v3505_v19 = vadd.f32 %v3504_v55, %v3406_v4  ;;  %v3313_v8 = vpop.f32.mrf.mxu2 }
 0x6eb   : > { %v3588_v37 = vpop.permute.xlu2 %3587  ;;  %v3314_v30 = vadd.f32 %v3313_v8, %v8374_v13 }
 0x6ec   : > { %v3552_v21 = vmax.f32 %v3505_v19, 0.0  ;;  %3598 = vst.msk [vmem:[#allocation3 + $0x60] sm:$0xf] %vm1546_vm9, %v3588_v37 }
 0x6ed   : > { %v3413_v41 = vadd.f32 %v3412_v48, %v3314_v30 }
 0x6ee   : > { %3727 = vrot.lane.b32.xlu1 %v3552_v21, %s9673_s14 }
 0x6f0   : > { %v3415_v61 = vpop.f32.mrf.mxu0 }
 0x6f1   : > { %v3506_v12 = vpop.f32.mrf.mxu1 }
 0x6f2   : > { %v3316_v50 = vpop.f32.mrf.mxu2 }
 0x6f3   : > { %v3317_v42 = vadd.f32 %v3316_v50, %v8574_v6 }
 0x6f5   : > { %v3416_v11 = vadd.f32 %v3415_v61, %v3317_v42  ;;  %v3697_v61 = vsel %vm1516_vm4, %v8648_v46, %v8722_v5  ;;  %v6201_v5 = vld [vmem:[%s9630_s9 + $0x168] sm:$0xf]  ;;  %v6572_v42 = vld [vmem:[%s9630_s9 + $0x178] sm:$0xf0] }
 0x6f6   : > { %3671 = vrot.lane.b32.xlu1 %v3544_v35, %s9671_s29 }
 0x6f8   : > { %v3668_v34 = vpop.permute.xlu2 %3667  ;;  %v3417_v52 = vpop.f32.mrf.mxu0 }
 0x6f9   : > { %3682 = vst.msk [vmem:[#allocation3 + $0x8] sm:$0xff] %vm1636_vm12, %v3668_v34  ;;  %v8720_v22 = vpop.f32.mrf.mxu1  ;;  %v3312_v34 = vadd.f32 %v8703_v49, %v8693_v17 }
 0x6fa   : > { %v3318_v44 = vpop.f32.mrf.mxu2 }
 0x6fb   : > { %v3640_v32 = vpop.permute.xlu0 %3639  ;;  %v3319_v63 = vadd.f32 %v3318_v44, %v8348_v39  ;;  %v3408_v39 = vadd.f32 %v8691_v23, %v3309_v29  ;;  %v6189_v44 = vld [vmem:[%s9630_s9 + $0x150] sm:$0xf]  ;;  %v6566_v29 = vld [vmem:[%s9630_s9 + $0x148] sm:$0xf0] }
 0x6fc   : > { %3654 = vst.msk [vmem:[#allocation3 + $0x18] sm:$0xff] %vm9666_vm8, %v3640_v32 }
 0x6fd   : > { %3655 = vst.msk [vmem:[#allocation3 + $0x20] sm:$0xff] %vm9665_vm0, %v3640_v32  ;;  %v3418_v58 = vadd.f32 %v3417_v52, %v3319_v63  ;;  %v3507_v4 = vadd.f32 %v3506_v12, %v3408_v39  ;;  %v6197_v52 = vld [vmem:[%s9630_s9 + $0x158] sm:$0xf]  ;;  %v6563_v39 = vld [vmem:[%s9630_s9 + $0x130] sm:$0xf0] }
 0x6fe   : > { %3706 = vrot.lane.b32.xlu1 %v3699_v7, %s9672_s21 }
 0x6ff   : > { %v3553_v25 = vmax.f32 %v3507_v4, 0.0  ;;  %v6153_v4 = vld [vmem:[%s9630_s9 + $0x108] sm:$0xf] }
 0x700   : > { %v3420_v51 = vpop.f32.mrf.mxu0 }
 0x701   : > { %v3511_v54 = vpop.f32.mrf.mxu1 }
 0x702   : > { %v8735_v18 = vadd.f32 %v3511_v54, %v3413_v41  ;;  %v3321_v45 = vpop.f32.mrf.mxu2  ;;  %v6571_v41 = vld [vmem:[%s9630_s9 + $0x170] sm:$0xf0] }
 0x703   : > { %v3611_v40 = vpop.permute.xlu0 %3610  ;;  %v3786_v27 = vld [vmem:[#allocation3 + $0x18] sm:$0xff]  ;;  %v3322_v37 = vadd.f32 %v3321_v45, %v8621_v33  ;;  %v6165_v45 = vld [vmem:[%s9630_s9 + $0x120] sm:$0xf] }
 0x704   : > { %3622 = vst.msk [vmem:[#allocation3 + $0x48] sm:$0xff] %vm1568_vm6, %v3611_v40  ;;  %v8733_v3 = vpack.c.bf16 %v3786_v27, %v3783_v38  ;;  %v3555_v2 = vmax.f32 %v8735_v18, 0.0  ;;  %v6568_v18 = vld [vmem:[%s9630_s9 + $0x158] sm:$0xf0] }
 0x705   : > { %v3421_v26 = vadd.f32 %v3420_v51, %v3322_v37  ;;  %v6560_v37 = vld [vmem:[%s9630_s9 + $0x118] sm:$0xf0] }
 0x706   : > { %4192 = vmatmul.bf16.vlgmr.msra.gmra.mxu3 %v8733_v3  ;;  %v3749_v20 = vrot.slane %v3555_v2, 4 }
 0x708   : > { %v3422_v47 = vpop.f32.mrf.mxu0 }
 0x709   : > { %v3514_v13 = vpop.f32.mrf.mxu1 }
 0x70a   : > { %v3515_v59 = vadd.f32 %v3514_v13, %v3416_v11  ;;  %v3323_v12 = vpop.f32.mrf.mxu2  ;;  %v6210_v11 = vor.u32 %v6572_v42, %v6209_v53  ;;  %v6569_v13 = vld [vmem:[%s9630_s9 + $0x160] sm:$0xf0] }
 0x70b   : > { %v3644_v28 = vpop.permute.xlu1 %3643  ;;  %v3642_v15 = vpop.permute.xlu0 %3641  ;;  %v3324_v48 = vadd.f32 %v3323_v12, %v8569_v60  ;;  %v3411_v60 = vadd.f32 %v8705_v57, %v3312_v34  ;;  %v6227_v34 = vld [vmem:[%s9630_s9 + $0x1a4] sm:$0xf0] }
 0x70c   : > { %v3556_v6 = vmax.f32 %v3515_v59, 0.0  ;;  %3658 = vst.msk [vmem:[#allocation3 + $0x48] sm:$0xff] %vm9666_vm8, %v3644_v28  ;;  %4345 = vmatpush.bf16.msrb.mxu0 %v6210_v11  ;;  %v6198_v59 = vor.u32 %v6569_v13, %v6197_v52 }
 0x70d   : > { %3659 = vst.msk [vmem:[#allocation3 + $0x50] sm:$0xff] %vm9665_vm0, %v3644_v28  ;;  %v3423_v32 = vadd.f32 %v3422_v47, %v3324_v48  ;;  %v3510_v40 = vadd.f32 %v8720_v22, %v3411_v60  ;;  %v6177_v28 = vld [vmem:[%s9630_s9 + $0x138] sm:$0xf]  ;;  %v6553_v48 = vld [vmem:[%s9630_s9 + $0xe0] sm:$0xf0] }
 0x70e   : > { %v3750_v0 = vrot.slane %v3556_v6, 4  ;;  %3656 = vst.msk [vmem:[#allocation3 + $0x30] sm:$0xff] %vm9666_vm8, %v3642_v15  ;;  %vm9676_vm8 = vcmask 1044320   ;;  %v6185_v6 = vld [vmem:[%s9630_s9 + $0x140] sm:$0xf] }
 0x70f   : > { %3657 = vst.msk [vmem:[#allocation3 + $0x38] sm:$0xff] %vm9665_vm0, %v3642_v15  ;;  %vm9675_vm0 = vcmask 880192   ;;  %v3554_v27 = vmax.f32 %v3510_v40, 0.0  ;;  %v6565_v15 = vld [vmem:[%s9630_s9 + $0x140] sm:$0xf0] }
 0x710   : > { %v3751_v24 = vsel %vm1516_vm4, %v3749_v20, %v3750_v0  ;;  %v6178_v20 = vor.u32 %v6565_v15, %v6177_v28  ;;  %4346 = vmatpush.bf16.msrb.mxu0 %v6198_v59  ;;  %v6576_v47 = vld [vmem:[%s9630_s9 + $0x19c] sm:$0xf]  ;;  %v6117_v60 = vld [vmem:[%s9630_s9 + $0xc0] sm:$0xf]  ;;  %v6578_v28 = vld [vmem:[%s9630_s9 + $0x1a8] sm:$0xf0] }
 0x711   : > { %v3516_v10 = vpop.f32.mrf.mxu1  ;;  %3758 = vrot.lane.b32.xlu2 %v3751_v24, %s9674_s30  ;;  %v6173_v24 = vld [vmem:[%s9630_s9 + $0x128] sm:$0xf]  ;;  %v6233_v59 = vld [vmem:[%s9630_s9 + $0x1a0] sm:$0xf]  ;;  %v6225_v15 = vld [vmem:[%s9630_s9 + $0x198] sm:$0xf] }
 0x712   : > { %v3517_v14 = vadd.f32 %v3516_v10, %v3418_v58  ;;  %v6562_v58 = vld [vmem:[%s9630_s9 + $0x128] sm:$0xf0]  ;;  %v6174_v51 = vor.u32 %v6563_v39, %v6173_v24 }
 0x713   : > { %v3646_v55 = vpop.permute.xlu1 %3645  ;;  %v3613_v19 = vpop.permute.xlu0 %3612  ;;  %v3792_v16 = vld [vmem:[#allocation3 + $0x48] sm:$0xff]  ;;  %v6166_v10 = vor.u32 %v6562_v58, %v6165_v45  ;;  %v6213_v58 = vld [vmem:[%s9630_s9 + $0x180] sm:$0xf] }
 0x714   : > { %v3557_v21 = vmax.f32 %v3517_v14, 0.0  ;;  %3661 = vst.msk [vmem:[#allocation3 + $0x68] sm:$0xf] %vm1614_vm7, %v3646_v55  ;;  %v6574_v24 = vld [vmem:[%s9630_s9 + $0x188] sm:$0xf0] }
 0x715   : > { %3623 = vst.msk [vmem:[#allocation3 + $0x60] sm:$0xf] %vm9675_vm0, %v3613_v19  ;;  %v3789_v31 = vld [vmem:[#allocation3 + $0x30] sm:$0xff]  ;;  %vm9677_vm0 = vcmask 720288  }
 0x716   : > { %v3752_v43 = vrot.slane %v3557_v21, 4  ;;  %3660 = vst.msk [vmem:[#allocation3 + $0x60] sm:$0xf] %vm9676_vm8, %v3646_v55  ;;  %v8754_v23 = vpack.c.bf16 %v3792_v16, %v3789_v31  ;;  %vm9678_vm8 = vmmov %vm9677_vm0  ;;  %v6559_v55 = vld [vmem:[%s9630_s9 + $0x110] sm:$0xf0] }
 0x717   : > { %v6161_v19 = vld [vmem:[%s9630_s9 + $0x110] sm:$0xf]  ;;  %v6154_v16 = vor.u32 %v6559_v55, %v6153_v4 }
 0x718   : > { %4197 = vmatmul.bf16.gmra.mxu3 %v8754_v23  ;;  %v3753_v8 = vsel %vm1516_vm4, %v3750_v0, %v3752_v43  ;;  %v6186_v0 = vor.u32 %v6566_v29, %v6185_v6  ;;  %v6162_v21 = vor.u32 %v6560_v37, %v6161_v19  ;;  %v6577_v6 = vld [vmem:[%s9630_s9 + $0x1a0] sm:$0xf0]  ;;  %v6221_v29 = vld [vmem:[%s9630_s9 + $0x188] sm:$0xf] }
 0x719   : > { %v3519_v9 = vpop.f32.mrf.mxu1  ;;  %3760 = vrot.lane.b32.xlu0 %v3753_v8, %s9674_s30  ;;  %3729 = vrot.lane.b32.xlu2 %v3553_v25, %s9673_s14  ;;  %v6556_v25 = vld [vmem:[%s9630_s9 + $0xf8] sm:$0xf0]  ;;  %v6226_v45 = vor.u32 %v6577_v6, %v6225_v15  ;;  %v6179_v6 = vld [vmem:[%s9630_s9 + $0x144] sm:$0xf0] }
 0x71a   : > { %v3520_v33 = vadd.f32 %v3519_v9, %v3421_v26  ;;  %4347 = vmatpush.bf16.msrb.mxu0 %v6186_v0  ;;  %v6149_v26 = vld [vmem:[%s9630_s9 + $0xf8] sm:$0xf]  ;;  %v6557_v9 = vld [vmem:[%s9630_s9 + $0x100] sm:$0xf0] }
 0x71b   : > { %v3670_v35 = vpop.permute.xlu0 %3669 }
 0x71c   : > { %v3558_v1 = vmax.f32 %v3520_v33, 0.0  ;;  %3683 = vst.msk [vmem:[#allocation3 + $0x20] sm:$0xff] %vm1636_vm12, %v3670_v35  ;;  %v6150_v33 = vor.u32 %v6557_v9, %v6149_v26  ;;  %v6129_v35 = vld [vmem:[%s9630_s9 + $0xd8] sm:$0xf] }
 0x71d   : > { %v3795_v56 = vld [vmem:[#allocation3 + $0x60] sm:$0xf] }
 0x71e   : > { %v3754_v50 = vrot.slane %v3558_v1, 4  ;;  %v8772_v38 = vpack.c.bf16 %v3795_v56, %v3795_v56  ;;  %4348 = vmatpush.bf16.msrb.mxu0 %v6174_v51  ;;  %v6130_v1 = vor.u32 %v6553_v48, %v6129_v35  ;;  %v6573_v56 = vld [vmem:[%s9630_s9 + $0x184] sm:$0xf]  ;;  %v6214_v51 = vor.u32 %v6574_v24, %v6213_v58  ;;  %v6558_v24 = vld [vmem:[%s9630_s9 + $0x10c] sm:$0xf] }
 0x720   : > { %v3755_v7 = vsel %vm1516_vm4, %v3752_v43, %v3754_v50  ;;  %v6141_v43 = vld [vmem:[%s9630_s9 + $0xf0] sm:$0xf] }
 0x721   : > { %v3521_v30 = vpop.f32.mrf.mxu1  ;;  %3762 = vrot.lane.b32.xlu1 %v3755_v7, %s9674_s30  ;;  %3704 = vrot.lane.b32.xlu0 %v3697_v61, %s9672_s21  ;;  %v6142_v12 = vor.u32 %v6556_v25, %v6141_v43  ;;  %v6554_v7 = vld [vmem:[%s9630_s9 + $0xe8] sm:$0xf0] }
 0x722   : > { %v3522_v54 = vadd.f32 %v3521_v30, %v3423_v32  ;;  %4349 = vmatpush.bf16.msrb.mxu0 %v6162_v21  ;;  %v6230_v32 = vor.u32 %v6576_v47, %v6227_v34  ;;  %v6107_v47 = vld [vmem:[%s9630_s9 + $0xb4] sm:$0xf0]  ;;  %v6543_v34 = vld [vmem:[%s9630_s9 + $0x94] sm:$0xf] }
 0x724   : > { %v3559_v17 = vmax.f32 %v3522_v54, 0.0  ;;  %4305 = vmatpush.bf16.msra.mxu2 %v6230_v32  ;;  %v6550_v54 = vld [vmem:[%s9630_s9 + $0xc8] sm:$0xf0]  ;;  %v6095_v32 = vld [vmem:[%s9630_s9 + $0x9c] sm:$0xf0] }
 0x725   : > { %v6118_v40 = vor.u32 %v6550_v54, %v6117_v60  ;;  %v6537_v54 = vld [vmem:[%s9630_s9 + $0x64] sm:$0xf] }
 0x726   : > { %v3756_v49 = vrot.slane %v3559_v17, 4  ;;  %4350 = vmatpush.bf16.msrb.mxu0 %v6150_v33  ;;  %v6215_v17 = vld [vmem:[%s9630_s9 + $0x18c] sm:$0xf0] }
 0x728   : > { %4202 = vmatmul.bf16.gmra.mxu3 %v8772_v38  ;;  %v3757_v46 = vsel %vm1516_vm4, %v3754_v50, %v3756_v49  ;;  %v6137_v50 = vld [vmem:[%s9630_s9 + $0xe0] sm:$0xf] }
 0x729   : > { %3708 = vrot.lane.b32.xlu1 %v8717_v36, %s9672_s21  ;;  %3764 = vrot.lane.b32.xlu2 %v3757_v46, %s9674_s30  ;;  %v6138_v30 = vor.u32 %v6554_v7, %v6137_v50  ;;  %v6218_v46 = vor.u32 %v6573_v56, %v6215_v17  ;;  %v6098_v7 = vor.u32 %v6543_v34, %v6095_v32  ;;  %v6071_v56 = vld [vmem:[%s9630_s9 + $0x6c] sm:$0xf0]  ;;  %v6534_v17 = vld [vmem:[%s9630_s9 + $0x4c] sm:$0xf]  ;;  %s9693_s21 = smov 76  }
 0x72a   : > { %3731 = vrot.lane.b32.xlu0 %v3554_v27, %s9673_s14  ;;  %v6551_v27 = vld [vmem:[%s9630_s9 + $0xd0] sm:$0xf0]  ;;  %v6101_v34 = vld [vmem:[%s9630_s9 + $0x98] sm:$0xf] }
 0x72b   : > { %v3703_v57 = vpop.permute.xlu2 %3702  ;;  %4351 = vmatpush.bf16.msrb.mxu0 %v6138_v30  ;;  %4306 = vmatpush.bf16.msra.mxu2 %v6218_v46  ;;  %v6083_v30 = vld [vmem:[%s9630_s9 + $0x84] sm:$0xf0] }
 0x72c   : > { %3716 = vst.msk [vmem:[#allocation3 + $0x20] sm:$0xff] %vm9677_vm0, %v3703_v57  ;;  %vm9679_vm0 = vcmask 1015488  }
 0x731   : > { %3733 = vrot.lane.b32.xlu2 %v3555_v2, %s9673_s14  ;;  %v6190_v2 = vor.u32 %v6568_v18, %v6189_v44 }
 0x732   : > { %3675 = vrot.lane.b32.xlu0 %v3546_v62, %s9671_s29  ;;  %v6202_v62 = vor.u32 %v6571_v41, %v6201_v5 }
 0x733   : > { %v3674_v22 = vpop.permute.xlu2 %3673 }
 0x734   : > { %3685 = vst.msk [vmem:[#allocation3 + $0x50] sm:$0xff] %vm1636_vm12, %v3674_v22  ;;  %4207 = vmatpush.bf16.msrb.mxu3 %v6202_v62 }
 0x738   : > { %4208 = vmatpush.bf16.msrb.mxu3 %v6190_v2 }
 0x73a   : > { %3766 = vrot.lane.b32.xlu0 %v3756_v49, %s9674_s30  ;;  %v6125_v49 = vld [vmem:[%s9630_s9 + $0xc8] sm:$0xf]  ;;  %s9690_s30 = smov 20  }
 0x73b   : > { %v3701_v36 = vpop.permute.xlu1 %3700  ;;  %v6126_v57 = vor.u32 %v6551_v27, %v6125_v49  ;;  %v6059_v49 = vld [vmem:[%s9630_s9 + $0x54] sm:$0xf0]  ;;  %v6531_v27 = vld [vmem:[%s9630_s9 + $0x34] sm:$0xf] }
 0x73c   : > { %3715 = vst.msk [vmem:[#allocation3 + $0x8] sm:$0xff] %vm9678_vm8, %v3701_v36  ;;  %4209 = vmatpush.bf16.msrb.mxu3 %v6178_v20  ;;  %vm9680_vm8 = vmmov %vm9679_vm0  ;;  %v6575_v20 = vld [vmem:[%s9630_s9 + $0x190] sm:$0xf0]  ;;  %v6062_v46 = vor.u32 %v6534_v17, %v6059_v49 }
 0x73d   : > { %4352 = vmatpush.bf16.msrb.mxu0 %v6126_v57  ;;  %v6047_v57 = vld [vmem:[%s9630_s9 + $0x3c] sm:$0xf0] }
 0x740   : > { %4210 = vmatpush.bf16.msrb.mxu3 %v6166_v10  ;;  %v6222_v10 = vor.u32 %v6575_v20, %v6221_v29  ;;  %v6561_v20 = vld [vmem:[%s9630_s9 + $0x124] sm:$0xf] }
 0x744   : > { %4211 = vmatpush.bf16.msrb.mxu3 %v6154_v16 }
 0x748   : > { %4212 = vmatpush.bf16.msrb.mxu3 %v6142_v12 }
 0x74c   : > { %4213 = vmatpush.bf16.msrb.mxu3 %v6130_v1  ;;  %v6546_v1 = vld [vmem:[%s9630_s9 + $0xac] sm:$0xf] }
 0x74d   : > { %v6110_v50 = vor.u32 %v6546_v1, %v6107_v47 }
 0x750   : > { %4214 = vmatpush.bf16.msrb.mxu3 %v6118_v40  ;;  %v6074_v40 = vor.u32 %v6537_v54, %v6071_v56  ;;  %v6077_v56 = vld [vmem:[%s9630_s9 + $0x68] sm:$0xf] }
 0x754   : > { %4236 = vmatpush.bf16.msra.mxu3 %v6226_v45  ;;  %v6167_v45 = vld [vmem:[%s9630_s9 + $0x12c] sm:$0xf0] }
 0x755   : > { %v6170_v58 = vor.u32 %v6561_v20, %v6167_v45  ;;  %v9150_v45 = vld [vmem:[%s9631_s10] sm:$0x7] }
 0x758   : > { %v3726_v63 = vpop.permute.xlu0 %3725  ;;  %4237 = vmatpush.bf16.msra.mxu3 %v6214_v51  ;;  %v6555_v51 = vld [vmem:[%s9630_s9 + $0xf4] sm:$0xf] }
 0x759   : > { %3740 = vst.msk [vmem:[#allocation3 + $0x8] sm:$0xff] %vm9679_vm0, %v3726_v63  ;;  %vm9681_vm0 = vcmask 1048544   ;;  %v6234_v63 = vor.u32 %v6578_v28, %v6233_v59  ;;  %v6191_v28 = vld [vmem:[%s9630_s9 + $0x15c] sm:$0xf0] }
 0x75b   : > { %4374 = vmatpush.bf16.msrb.mxu2 %v6234_v63  ;;  %v6564_v63 = vld [vmem:[%s9630_s9 + $0x13c] sm:$0xf] }
 0x75c   : > { %v6182_v29 = vor.u32 %v6564_v63, %v6179_v6 }
 0x75f   : > { %4375 = vmatpush.bf16.msrb.mxu2 %v6222_v10 }
 0x760   : > { %v3728_v14 = vpop.permute.xlu1 %3727 }
 0x761   : > { %3741 = vst.msk [vmem:[#allocation3 + $0x20] sm:$0xff] %vm9680_vm8, %v3728_v14  ;;  %vm9683_vm8 = vmmov %vm9681_vm0 }
 0x768   : > { %v3672_v31 = vpop.permute.xlu1 %3671 }
 0x769   : > { %3684 = vst.msk [vmem:[#allocation3 + $0x38] sm:$0xff] %vm1636_vm12, %v3672_v31  ;;  %vm9682_vm12 = vcmask 720288  }
 0x76b   : > { %v3759_v8 = vpop.permute.xlu2 %3758 }
 0x76c   : > { %3773 = vst.msk [vmem:[#allocation3 + $0x8] sm:$0xff] %vm9681_vm0, %v3759_v8  ;;  %vm9684_vm0 = vmmov %vm9682_vm12 }
 0x76d   : > { %3774 = vst.msk [vmem:[#allocation3 + $0x10] sm:$0xff] %vm1735_vm15, %v3759_v8 }
 0x770   : > { %v3707_v61 = vpop.permute.xlu1 %3706 }
 0x771   : > { %3718 = vst.msk [vmem:[#allocation3 + $0x50] sm:$0xff] %vm9682_vm12, %v3707_v61  ;;  %vm9685_vm12 = vcmask 1015488   ;;  %v6540_v61 = vld [vmem:[%s9630_s9 + $0x7c] sm:$0xf] }
 0x772   : > { %v6086_v60 = vor.u32 %v6540_v61, %v6083_v30  ;;  %v6542_v61 = vld [vmem:[%s9630_s9 + $0x88] sm:$0xf0] }
 0x773   : > { %v3730_v22 = vpop.permute.xlu2 %3729  ;;  %v3784_v44 = vld [vmem:[#allocation3 + $0x8] sm:$0xff] }
 0x774   : > { %v3785_v52 = vld [vmem:[#allocation3 + $0x10] sm:$0xff] }
 0x783   : > { %v3765_v36 = vpop.permute.xlu2 %3764 }
 0x784   : > { %3780 = vst.msk [vmem:[#allocation3 + $0x58] sm:$0xff] %vm1735_vm15, %v3765_v36 }
 0x789   : > { %v8905_v5 = vpop.f32.mrf.mxu3 }
 0x78b   : > { %v3761_v41 = vpop.permute.xlu0 %3760  ;;  %v3794_v19 = vld [vmem:[#allocation3 + $0x58] sm:$0xff]  ;;  %v3734_v43 = vpop.permute.xlu2 %3733 }
 0x78c   : > { %3775 = vst.msk [vmem:[#allocation3 + $0x20] sm:$0xff] %vm9683_vm8, %v3761_v41 }
 0x78d   : > { %3776 = vst.msk [vmem:[#allocation3 + $0x28] sm:$0xff] %vm1735_vm15, %v3761_v41  ;;  %v6035_v41 = vld [vmem:[%s9630_s9 + $0x24] sm:$0xf0] }
 0x791   : > { %v8909_v53 = vpop.f32.mrf.mxu3 }
 0x793   : > { %v3763_v62 = vpop.permute.xlu1 %3762  ;;  %v3705_v42 = vpop.permute.xlu0 %3704  ;;  %v3787_v18 = vld [vmem:[#allocation3 + $0x20] sm:$0xff] }
 0x794   : > { %3778 = vst.msk [vmem:[#allocation3 + $0x40] sm:$0xff] %vm1735_vm15, %v3763_v62  ;;  %v8912_v11 = vpack.c.bf16 %v3787_v18, %v3784_v44  ;;  %v3788_v13 = vld [vmem:[#allocation3 + $0x28] sm:$0xff]  ;;  %v6023_v44 = vld [vmem:[%s9630_s9 + $0xc] sm:$0xf0] }
 0x795   : > { %3717 = vst.msk [vmem:[#allocation3 + $0x38] sm:$0xff] %vm9684_vm0, %v3705_v42  ;;  %v8915_v2 = vpack.c.bf16 %v3788_v13, %v3785_v52  ;;  %vm9686_vm0 = vmmov %vm9685_vm12  ;;  %v6525_v42 = vld [vmem:[%s9630_s9 + $0x4] sm:$0xf]  ;;  %v6570_v52 = vld [vmem:[%s9630_s9 + $0x16c] sm:$0xf] }
 0x796   : > { %3742 = vst.msk [vmem:[#allocation3 + $0x38] sm:$0xff] %vm9685_vm12, %v3730_v22  ;;  %4215 = vmatmul.bf16.vlgmr.msrb.gmra.mxu3 %v8912_v11  ;;  %4353 = vmatmul.bf16.vlgmr.msrb.gmra.mxu0 %v8912_v11  ;;  %vm9687_vm12 = vmmov %vm9683_vm8  ;;  %v6050_v22 = vor.u32 %v6531_v27, %v6047_v57  ;;  %v6026_v18 = vor.u32 %v6525_v42, %v6023_v44  ;;  %v6203_v13 = vld [vmem:[%s9630_s9 + $0x174] sm:$0xf0]  ;;  %v6065_v27 = vld [vmem:[%s9630_s9 + $0x50] sm:$0xf] }
 0x797   : > { %3777 = vst.msk [vmem:[#allocation3 + $0x38] sm:$0xff] %vm9683_vm8, %v3763_v62  ;;  %6238 = vmatmul.msk.bf16.vlgmr.msra.gmra.mxu2 %vm1735_vm15, %v8915_v2  ;;  %vm9688_vm8 = vcmask 420992   ;;  %4253 = vmatpush.bf16.msrb.mxu3 %v6110_v50  ;;  %v6206_v59 = vor.u32 %v6570_v52, %v6203_v13  ;;  %v6545_v50 = vld [vmem:[%s9630_s9 + $0xa0] sm:$0xf0]  ;;  %v6041_v44 = vld [vmem:[%s9630_s9 + $0x20] sm:$0xf] }
 0x798   : > { %v6102_v32 = vor.u32 %v6545_v50, %v6101_v34 }
 0x79b   : > { %v8941_v0 = vpop.f32.mrf.mxu3  ;;  %v3791_v14 = vld [vmem:[#allocation3 + $0x40] sm:$0xff]  ;;  %v3709_v16 = vpop.permute.xlu1 %3708  ;;  %4254 = vmatpush.bf16.msrb.mxu3 %v6098_v7 }
 0x79c   : > { %v3732_v39 = vpop.permute.xlu0 %3731  ;;  %v3803_v37 = vpack.c.bf16 %v3794_v19, %v3791_v14  ;;  %v6143_v14 = vld [vmem:[%s9630_s9 + $0xfc] sm:$0xf0]  ;;  %v6552_v19 = vld [vmem:[%s9630_s9 + $0xdc] sm:$0xf] }
 0x79d   : > { %3743 = vst.msk [vmem:[#allocation3 + $0x50] sm:$0xff] %vm9686_vm0, %v3732_v39  ;;  %vm9689_vm0 = vcmask 257024   ;;  %v6155_v39 = vld [vmem:[%s9630_s9 + $0x114] sm:$0xf0]  ;;  %v6089_v7 = vld [vmem:[%s9630_s9 + $0x80] sm:$0xf] }
 0x79e   : > { %3779 = vst.msk [vmem:[#allocation3 + $0x50] sm:$0xff] %vm9687_vm12, %v3765_v36  ;;  %v3790_v21 = vld [vmem:[#allocation3 + $0x38] sm:$0xff]  ;;  %v6158_v10 = vor.u32 %v6558_v24, %v6155_v39  ;;  %v6090_v30 = vor.u32 %v6542_v61, %v6089_v7  ;;  %v3881_v39 = vperm.slane %v9150_v45, 0  ;;  %vm9709_vm12 = vcmask 1044320  }
 0x79f   : > { %4255 = vmatpush.bf16.msrb.mxu3 %v6086_v60  ;;  %v6528_v36 = vld [vmem:[%s9630_s9 + $0x1c] sm:$0xf] }
 0x7a0   : > { %v6038_v62 = vor.u32 %v6528_v36, %v6035_v41  ;;  %v6053_v41 = vld [vmem:[%s9630_s9 + $0x38] sm:$0xf] }
 0x7a3   : > { %v8951_v4 = vpop.f32.mrf.mxu3  ;;  %4256 = vmatpush.bf16.msrb.mxu3 %v6074_v40  ;;  %v6539_v40 = vld [vmem:[%s9630_s9 + $0x70] sm:$0xf0] }
 0x7a4   : > { %v3676_v55 = vpop.permute.xlu0 %3675  ;;  %v6078_v17 = vor.u32 %v6539_v40, %v6077_v56  ;;  %v4201_v34 = vadd.f32 %v8951_v4, %v3881_v39 }
 0x7a5   : > { %3686 = vst.msk [vmem:[#allocation3 + $0x68] sm:$0xf] %vm9688_vm8, %v3676_v55  ;;  %v3793_v31 = vld [vmem:[#allocation3 + $0x50] sm:$0xff]  ;;  %v6146_v55 = vor.u32 %v6555_v51, %v6143_v14 }
 0x7a6   : > { %3719 = vst.msk [vmem:[#allocation3 + $0x68] sm:$0xf] %vm1676_vm11, %v3709_v16  ;;  %v8955_v25 = vpack.c.bf16 %v3793_v31, %v3790_v21  ;;  %v6131_v16 = vld [vmem:[%s9630_s9 + $0xe4] sm:$0xf0]  ;;  %v6549_v21 = vld [vmem:[%s9630_s9 + $0xc4] sm:$0xf] }
 0x7a7   : > { %3744 = vst.msk [vmem:[#allocation3 + $0x68] sm:$0xf] %vm1703_vm13, %v3734_v43  ;;  %6239 = vmatmul.msk.bf16.gmra.mxu2 %vm1735_vm15, %v3803_v37  ;;  %4257 = vmatpush.bf16.msrb.mxu3 %v6062_v46  ;;  %v6119_v31 = vld [vmem:[%s9630_s9 + $0xcc] sm:$0xf0]  ;;  %v6536_v46 = vld [vmem:[%s9630_s9 + $0x58] sm:$0xf0] }
 0x7a8   : > { %4220 = vmatmul.bf16.gmra.mxu3 %v8955_v25  ;;  %4358 = vmatmul.bf16.gmra.mxu0 %v8955_v25  ;;  %v6122_v43 = vor.u32 %v6549_v21, %v6119_v31  ;;  %v6066_v57 = vor.u32 %v6536_v46, %v6065_v27 }
 0x7ab   : > { %v8961_v26 = vpop.f32.mrf.mxu3  ;;  %4258 = vmatpush.bf16.msrb.mxu3 %v6050_v22 }
 0x7ac   : > { %v3767_v8 = vpop.permute.xlu0 %3766  ;;  %v4204_v61 = vadd.f32 %v8961_v26, %v3881_v39 }
 0x7ad   : > { %3781 = vst.msk [vmem:[#allocation3 + $0x68] sm:$0xf] %vm1743_vm14, %v3767_v8 }
 0x7ae   : > { %3782 = vst.msk [vmem:[#allocation3 + $0x70] sm:$0xf] %vm9689_vm0, %v3767_v8 }
 0x7af   : > { %4259 = vmatpush.bf16.msrb.mxu3 %v6038_v62 }
 0x7b3   : > { %v4205_v12 = vpop.f32.mrf.mxu3  ;;  %4260 = vmatpush.bf16.msrb.mxu3 %v6026_v18  ;;  %v6530_v18 = vld [vmem:[%s9630_s9 + $0x28] sm:$0xf0] }
 0x7b4   : > { %v3796_v9 = vld [vmem:[#allocation3 + $0x68] sm:$0xf]  ;;  %v6113_v12 = vld [vmem:[%s9630_s9 + $0xb0] sm:$0xf]  ;;  %v6042_v52 = vor.u32 %v6530_v18, %v6041_v44 }
 0x7b5   : > { %v3797_v33 = vld [vmem:[#allocation3 + $0x70] sm:$0xf]  ;;  %v8965_v35 = vpack.c.bf16 %v3796_v9, %v3796_v9  ;;  %v6548_v9 = vld [vmem:[%s9630_s9 + $0xb8] sm:$0xf0] }
 0x7b6   : > { %v3806_v48 = vpack.c.bf16 %v3797_v33, %v3797_v33 }
 0x7b8   : > { %6240 = vmatmul.msk.bf16.gmra.mxu2 %vm1735_vm15, %v3806_v48  ;;  %4225 = vmatmul.bf16.gmra.mxu3 %v8965_v35 }
 0x7b9   : > { %4363 = vmatmul.bf16.gmra.mxu0 %v8965_v35 }
 0x7c8   : > { %6241 = vmatmul.msk.bf16.vlgmr.msrb.gmra.mxu2 %vm1735_vm15, %v8915_v2  ;;  %6235 = vmatmul.msk.bf16.vlgmr.msra.gmra.mxu3 %vm1735_vm15, %v8915_v2  ;;  %v6567_v2 = vld [vmem:[%s9630_s9 + $0x154] sm:$0xf] }
 0x7c9   : > { %4276 = vmatpush.bf16.msra.mxu3 %v6206_v59  ;;  %v6194_v15 = vor.u32 %v6567_v2, %v6191_v28  ;;  %v6029_v59 = vld [vmem:[%s9630_s9 + $0x8] sm:$0xf]  ;;  %v6527_v28 = vld [vmem:[%s9630_s9 + $0x10] sm:$0xf0] }
 0x7cd   : > { %4277 = vmatpush.bf16.msra.mxu3 %v6194_v15  ;;  %v6030_v15 = vor.u32 %v6527_v28, %v6029_v59 }
 0x7d1   : > { %4278 = vmatpush.bf16.msra.mxu3 %v6182_v29 }
 0x7d5   : > { %4279 = vmatpush.bf16.msra.mxu3 %v6170_v58 }
 0x7d8   : > { %6242 = vmatmul.msk.bf16.gmra.mxu2 %vm1735_vm15, %v3803_v37  ;;  %6236 = vmatmul.msk.bf16.gmra.mxu3 %vm1735_vm15, %v3803_v37  ;;  %v6134_v37 = vor.u32 %v6552_v19, %v6131_v16  ;;  %v4196_v16 = vadd.f32 %v8909_v53, %v3881_v39 }
 0x7d9   : > { %4280 = vmatpush.bf16.msra.mxu3 %v6158_v10  ;;  %v4194_v10 = vadd.f32 %v8905_v5, %v3881_v39 }
 0x7dd   : > { %4281 = vmatpush.bf16.msra.mxu3 %v6146_v55 }
 0x7e1   : > { %4282 = vmatpush.bf16.msra.mxu3 %v6134_v37 }
 0x7e5   : > { %4283 = vmatpush.bf16.msra.mxu3 %v6122_v43  ;;  %v4199_v43 = vadd.f32 %v8941_v0, %v3881_v39 }
 0x7e8   : > { %6243 = vmatmul.msk.bf16.gmra.mxu2 %vm1735_vm15, %v3806_v48  ;;  %6237 = vmatmul.msk.bf16.gmra.mxu3 %vm1735_vm15, %v3806_v48  ;;  %v6114_v48 = vor.u32 %v6548_v9, %v6113_v12 }
 0x7f8   : > { %4261 = vmatmul.bf16.vlgmr.msrb.gmra.mxu3 %v8733_v3 }
 0x7f9   : > { %4322 = vmatpush.bf16.msrb.mxu3 %v6114_v48 }
 0x7fd   : > { %4323 = vmatpush.bf16.msrb.mxu3 %v6102_v32 }
 0x801   : > { %4324 = vmatpush.bf16.msrb.mxu3 %v6090_v30 }
 0x805   : > { %4325 = vmatpush.bf16.msrb.mxu3 %v6078_v17 }
 0x808   : > { %4266 = vmatmul.bf16.gmra.mxu3 %v8754_v23 }
 0x809   : > { %4326 = vmatpush.bf16.msrb.mxu3 %v6066_v57 }
 0x813   : > { %v9076_v8 = vpop.f32.mrf.mxu0 }
 0x818   : > { %4271 = vmatmul.bf16.gmra.mxu3 %v8772_v38 }
 0x819   : > { %v4216_v33 = vpop.f32.mrf.mxu3 }
 0x81a   : > { %v9085_v1 = vpop.f32.mrf.mxu2  ;;  %v4217_v51 = vadd.f32 %v4216_v33, %v4194_v10 }
 0x81b   : > { %v9087_v47 = vpop.f32.mrf.mxu0 }
 0x821   : > { %v4218_v60 = vpop.f32.mrf.mxu3 }
 0x822   : > { %v9101_v54 = vpop.f32.mrf.mxu2  ;;  %v4219_v37 = vadd.f32 %v4218_v60, %v4196_v16 }
 0x825   : > { %v9109_v49 = vpop.f32.mrf.mxu0 }
 0x828   : > { %4284 = vmatmul.bf16.vlgmr.msra.gmra.mxu3 %v8912_v11  ;;  %v6533_v11 = vld [vmem:[%s9630_s9 + $0x40] sm:$0xf0] }
 0x829   : > { %v6054_v42 = vor.u32 %v6533_v11, %v6053_v41  ;;  %v3882_v11 = vperm.slane %v9150_v45, 1 }
 0x82a   : > { %v9118_v22 = vpop.f32.mrf.mxu2 }
 0x82b   : > { %v4221_v36 = vpop.f32.mrf.mxu3  ;;  %4327 = vmatpush.bf16.msrb.mxu3 %v6054_v42 }
 0x82c   : > { %v4222_v53 = vadd.f32 %v4221_v36, %v4199_v43 }
 0x82d   : > { %v9126_v62 = vpop.f32.mrf.mxu0 }
 0x82f   : > { %4328 = vmatpush.bf16.msrb.mxu3 %v6042_v52 }
 0x832   : > { %v9134_v13 = vpop.f32.mrf.mxu2 }
 0x833   : > { %v4223_v2 = vpop.f32.mrf.mxu3  ;;  %4329 = vmatpush.bf16.msrb.mxu3 %v6030_v15 }
 0x834   : > { %v4224_v0 = vadd.f32 %v4223_v2, %v4201_v34 }
 0x836   : > { %v9142_v63 = vpop.f32.mrf.mxu0 }
 0x838   : > { %4289 = vmatmul.bf16.gmra.mxu3 %v8955_v25 }
 0x83b   : > { %v9145_v6 = vpop.f32.mrf.mxu2  ;;  %v4226_v29 = vpop.f32.mrf.mxu3 }
 0x83c   : > { %v4227_v4 = vadd.f32 %v4226_v29, %v4204_v61 }
 0x83e   : > { %v4366_v20 = vpop.f32.mrf.mxu0 }
 0x843   : > { %v4320_v58 = vpop.f32.mrf.mxu2  ;;  %v4228_v24 = vpop.f32.mrf.mxu3 }
 0x848   : > { %4294 = vmatmul.bf16.gmra.mxu3 %v8965_v35 }
 0x84b   : > { %v9155_v14 = vpop.f32.mrf.mxu2  ;;  %v4239_v25 = vpop.f32.mrf.mxu3 }
 0x84c   : > { %v4240_v55 = vadd.f32 %v4239_v25, %v4217_v51 }
 0x84e   : > { %v4391_v19 = vmax.f32 %v4240_v55, 0.0 }
 0x850   : > { %4406 = vst.msk [vmem:[#allocation2] sm:$0xff] %vm684_vm1, %v4391_v19  ;;  %4416 = vrot.lane.b32.xlu1 %v4391_v19, %s6644_s20  ;;  %4436 = vrot.lane.b32.xlu0 %v4391_v19, %s6643_s19 }
 0x851   : > { %4461 = vrot.lane.b32.xlu2 %v4391_v19, %s9690_s30 }
 0x853   : > { %v9162_v5 = vpop.f32.mrf.mxu2  ;;  %v4241_v35 = vpop.f32.mrf.mxu3 }
 0x854   : > { %v4242_v21 = vadd.f32 %v4241_v35, %v4219_v37 }
 0x856   : > { %v4394_v31 = vmax.f32 %v4242_v21, 0.0 }
 0x858   : > { %4407 = vst.msk [vmem:[#allocation2 + $0x8] sm:$0xff] %vm684_vm1, %v4394_v31  ;;  %4330 = vmatmul.bf16.vlgmr.msrb.gmra.mxu3 %v8733_v3  ;;  %4465 = vrot.lane.b32.xlu1 %v4394_v31, %s9690_s30 }
 0x859   : > { %4438 = vrot.lane.b32.xlu0 %v4394_v31, %s6643_s19 }
 0x85b   : > { %v9169_v12 = vpop.f32.mrf.mxu2  ;;  %v4244_v9 = vpop.f32.mrf.mxu3 }
 0x85c   : > { %v4245_v33 = vadd.f32 %v4244_v9, %v4222_v53 }
 0x85e   : > { %v4397_v48 = vmax.f32 %v4245_v33, 0.0 }
 0x860   : > { %4408 = vst.msk [vmem:[#allocation2 + $0x10] sm:$0xff] %vm684_vm1, %v4397_v48  ;;  %4440 = vrot.lane.b32.xlu1 %v4397_v48, %s6643_s19 }
 0x861   : > { %4418 = vrot.lane.b32.xlu0 %v4394_v31, %s6644_s20 }
 0x863   : > { %v9175_v3 = vpop.f32.mrf.mxu2  ;;  %v4246_v50 = vpop.f32.mrf.mxu3 }
 0x864   : > { %v4247_v32 = vadd.f32 %v4246_v50, %v4224_v0 }
 0x866   : > { %v9177_v7 = vmax.f32 %v4247_v32, 0.0 }
 0x868   : > { %4409 = vst.msk [vmem:[#allocation2 + $0x18] sm:$0xff] %vm684_vm1, %v9177_v7  ;;  %4335 = vmatmul.bf16.gmra.mxu3 %v8754_v23  ;;  %4420 = vrot.lane.b32.xlu1 %v4397_v48, %s6644_s20 }
 0x869   : > { %4469 = vrot.lane.b32.xlu0 %v4397_v48, %s9690_s30 }
 0x86b   : > { %v9185_v30 = vpop.f32.mrf.mxu2  ;;  %v4249_v60 = vpop.f32.mrf.mxu3 }
 0x86c   : > { %v4250_v56 = vadd.f32 %v4249_v60, %v4227_v4 }
 0x86e   : > { %v9187_v40 = vmax.f32 %v4250_v56, 0.0 }
 0x870   : > { %4410 = vst.msk [vmem:[#allocation2 + $0x20] sm:$0xf] %vm689_vm2, %v9187_v40  ;;  %4442 = vrot.lane.b32.xlu1 %v9177_v7, %s6643_s19  ;;  %4444 = vrot.lane.b32.xlu2 %v9187_v40, %s6643_s19  ;;  %s9691_s19 = smov 4  }
 0x873   : > { %v4389_v23 = vpop.f32.mrf.mxu2  ;;  %v4251_v26 = vpop.f32.mrf.mxu3 }
 0x878   : > { %4340 = vmatmul.bf16.gmra.mxu3 %v8772_v38  ;;  %4422 = vrot.lane.b32.xlu1 %v9177_v7, %s6644_s20 }
 0x879   : > { %4424 = vrot.lane.b32.xlu2 %v9187_v40, %s6644_s20  ;;  %s9692_s20 = smov 40  }
 0x87b   : > { %v4262_v17 = vpop.f32.mrf.mxu3 }
 0x87c   : > { %v4263_v42 = vadd.f32 %v4262_v17, %v3882_v11 }
 0x883   : > { %v4264_v27 = vpop.f32.mrf.mxu3 }
 0x884   : > { %v4265_v59 = vadd.f32 %v4264_v27, %v3882_v11 }
 0x88b   : > { %v4267_v46 = vpop.f32.mrf.mxu3 }
 0x88c   : > { %v4268_v15 = vadd.f32 %v4267_v46, %v3882_v11 }
 0x893   : > { %v4269_v57 = vpop.f32.mrf.mxu3 }
 0x89b   : > { %v4272_v36 = vpop.f32.mrf.mxu3 }
 0x89c   : > { %v4273_v19 = vadd.f32 %v4272_v36, %v3882_v11 }
 0x8a3   : > { %v4274_v41 = vpop.f32.mrf.mxu3 }
 0x8ab   : > { %v4285_v44 = vpop.f32.mrf.mxu3  ;;  %v9216_v39 = vpop.permute.xlu2 %4461 }
 0x8ac   : > { %v4286_v18 = vadd.f32 %v4285_v44, %v4263_v42 }
 0x8ae   : > { %v4309_v52 = vadd.f32 %v9085_v1, %v4286_v18 }
 0x8b0   : > { %v9202_v38 = vmax.f32 %v4309_v52, 0.0 }
 0x8b2   : > { %4561 = vrot.lane.b32.xlu1 %v9202_v38, %s9691_s19  ;;  %4463 = vrot.lane.b32.xlu0 %v9202_v38, %s9690_s30 }
 0x8b3   : > { %4536 = vrot.lane.b32.xlu2 %v9202_v38, %s9692_s20  ;;  %v4287_v2 = vpop.f32.mrf.mxu3 }
 0x8b4   : > { %v4288_v28 = vadd.f32 %v4287_v2, %v4265_v59 }
 0x8b6   : > { %v4311_v20 = vadd.f32 %v9101_v54, %v4288_v28  ;;  %v4691_v28 = vld [vmem:[%s9633_s12 + $0x28] sm:$0xff] }
 0x8b8   : > { %v9218_v10 = vmax.f32 %v4311_v20, 0.0 }
 0x8bb   : > { %4516 = vrot.lane.b32.xlu2 %v9202_v38, %s9693_s21  ;;  %v4290_v29 = vpop.f32.mrf.mxu3 }
 0x8bc   : > { %v4291_v1 = vadd.f32 %v4290_v29, %v4268_v15  ;;  %v4692_v15 = vld [vmem:[%s9633_s12 + $0x30] sm:$0xff]  ;;  %v4690_v29 = vld [vmem:[%s9633_s12 + $0x20] sm:$0xff] }
 0x8be   : > { %v4314_v58 = vadd.f32 %v9118_v22, %v4291_v1  ;;  %v4270_v22 = vadd.f32 %v4269_v57, %v3882_v11 }
 0x8c0   : > { %v9214_v24 = vmax.f32 %v4314_v58, 0.0 }
 0x8c2   : > { %4471 = vrot.lane.b32.xlu1 %v9214_v24, %s9690_s30  ;;  %v4417_v51 = vpop.permute.xlu1 %4416  ;;  %4540 = vrot.lane.b32.xlu0 %v9214_v24, %s9692_s20  ;;  %v4437_v25 = vpop.permute.xlu0 %4436 }
 0x8c3   : > { %4431 = vst.msk [vmem:[#allocation2 + $0x24] sm:$0xff] %vm684_vm1, %v4417_v51  ;;  %4467 = vrot.lane.b32.xlu2 %v9218_v10, %s9690_s30  ;;  %v4292_v54 = vpop.f32.mrf.mxu3  ;;  %v4693_v51 = vld [vmem:[%s9633_s12 + $0x38] sm:$0xff] }
 0x8c4   : > { %4451 = vst.msk [vmem:[#allocation2 + $0x48] sm:$0xff] %vm684_vm1, %v4437_v25  ;;  %v4293_v55 = vadd.f32 %v4292_v54, %v4270_v22 }
 0x8c6   : > { %v4316_v31 = vadd.f32 %v9134_v13, %v4293_v55  ;;  %v4700_v55 = vld [vmem:[%s9633_s12 + $0x70] sm:$0xff] }
 0x8c8   : > { %v4401_v9 = vmax.f32 %v4316_v31, 0.0  ;;  %v4702_v31 = vld [vmem:[%s9633_s12 + $0x80] sm:$0xff] }
 0x8ca   : > { %v9228_v16 = vpop.permute.xlu1 %4465  ;;  %4520 = vrot.lane.b32.xlu0 %v9214_v24, %s9693_s21  ;;  %v4445_v37 = vpop.permute.xlu2 %4444 }
 0x8cb   : > { %v4439_v35 = vpop.permute.xlu0 %4438  ;;  %4538 = vrot.lane.b32.xlu2 %v9218_v10, %s9692_s20  ;;  %4455 = vst.msk [vmem:[#allocation2 + $0x68] sm:$0xf] %vm689_vm2, %v4445_v37  ;;  %v4295_v21 = vpop.f32.mrf.mxu3 }
 0x8cc   : > { %4452 = vst.msk [vmem:[#allocation2 + $0x50] sm:$0xff] %vm684_vm1, %v4439_v35  ;;  %v4296_v43 = vadd.f32 %v4295_v21, %v4273_v19  ;;  %v4701_v19 = vld [vmem:[%s9633_s12 + $0x78] sm:$0xff]  ;;  %v4703_v35 = vld [vmem:[%s9633_s12 + $0x88] sm:$0xff]  ;;  %v4696_v21 = vld [vmem:[%s9633_s12 + $0x50] sm:$0xff] }
 0x8ce   : > { %v4319_v53 = vadd.f32 %v9145_v6, %v4296_v43  ;;  %v3883_v6 = vperm.slane %v9150_v45, 2 }
 0x8d0   : > { %v4404_v33 = vmax.f32 %v4319_v53, 0.0 }
 0x8d2   : > { %4544 = vrot.lane.b32.xlu1 %v4404_v33, %s9692_s20  ;;  %v4441_v48 = vpop.permute.xlu1 %4440  ;;  %4542 = vrot.lane.b32.xlu0 %v4401_v9, %s9692_s20 }
 0x8d3   : > { %4453 = vst.msk [vmem:[#allocation2 + $0x58] sm:$0xff] %vm684_vm1, %v4441_v48  ;;  %v4419_v34 = vpop.permute.xlu0 %4418  ;;  %4518 = vrot.lane.b32.xlu2 %v9218_v10, %s9693_s21  ;;  %v4425_v0 = vpop.permute.xlu2 %4424  ;;  %v4698_v48 = vld [vmem:[%s9633_s12 + $0x60] sm:$0xff] }
 0x8d4   : > { %4432 = vst.msk [vmem:[#allocation2 + $0x2c] sm:$0xff] %vm684_vm1, %v4419_v34  ;;  %v4297_v13 = vpop.f32.mrf.mxu3  ;;  %v4697_v34 = vld [vmem:[%s9633_s12 + $0x58] sm:$0xff] }
 0x8d5   : > { %4435 = vst.msk [vmem:[#allocation2 + $0x44] sm:$0xf] %vm689_vm2, %v4425_v0 }
 0x8da   : > { %4524 = vrot.lane.b32.xlu1 %v4404_v33, %s9693_s21  ;;  %v4421_v50 = vpop.permute.xlu1 %4420  ;;  %4522 = vrot.lane.b32.xlu0 %v4401_v9, %s9693_s21 }
 0x8db   : > { %4433 = vst.msk [vmem:[#allocation2 + $0x34] sm:$0xff] %vm684_vm1, %v4421_v50  ;;  %4500 = vrot.lane.b32.xlu2 %v9214_v24, %s9694_s22  ;;  %v4470_v1 = vpop.permute.xlu0 %4469 }
 0x8dc   : > { %v4331_v32 = vpop.f32.mrf.mxu3 }
 0x8dd   : > { %v4332_v61 = vadd.f32 %v4331_v32, %v3883_v6 }
 0x8df   : > { %v4355_v4 = vadd.f32 %v9076_v8, %v4332_v61 }
 0x8e1   : > { %v4378_v60 = vadd.f32 %v9155_v14, %v4355_v4 }
 0x8e2   : > { %4504 = vrot.lane.b32.xlu1 %v4404_v33, %s9694_s22  ;;  %v4443_v56 = vpop.permute.xlu1 %4442  ;;  %4502 = vrot.lane.b32.xlu0 %v4401_v9, %s9694_s22 }
 0x8e3   : > { %v4393_v45 = vmax.f32 %v4378_v60, 0.0  ;;  %4454 = vst.msk [vmem:[#allocation2 + $0x60] sm:$0xff] %vm684_vm1, %v4443_v56 }
 0x8e4   : > { %v4333_v23 = vpop.f32.mrf.mxu3 }
 0x8e5   : > { %4563 = vrot.lane.b32.xlu2 %v4393_v45, %s9691_s19  ;;  %v4334_v57 = vadd.f32 %v4333_v23, %v3883_v6  ;;  %v4607_v45 = vld [vmem:[#allocation2 + $0x58] sm:$0xff] }
 0x8ea   : > { %4473 = vrot.lane.b32.xlu1 %v9177_v7, %s9690_s30  ;;  %v4423_v26 = vpop.permute.xlu1 %4422  ;;  %4498 = vrot.lane.b32.xlu0 %v9218_v10, %s9694_s22  ;;  %v4608_v60 = vld [vmem:[#allocation2 + $0x60] sm:$0xff] }
 0x8eb   : > { %4434 = vst.msk [vmem:[#allocation2 + $0x3c] sm:$0xff] %vm684_vm1, %v4423_v26 }
 0x8ec   : > { %v4336_v8 = vpop.f32.mrf.mxu3 }
 0x8ed   : > { %4496 = vrot.lane.b32.xlu2 %v9202_v38, %s9694_s22  ;;  %v4337_v14 = vadd.f32 %v4336_v8, %v3883_v6  ;;  %v4606_v8 = vld [vmem:[#allocation2 + $0x50] sm:$0xff] }
 0x8ef   : > { %v4360_v27 = vadd.f32 %v9109_v49, %v4337_v14  ;;  %v4357_v49 = vadd.f32 %v9087_v47, %v4334_v57  ;;  %v4686_v47 = vld [vmem:[%s9633_s12] sm:$0xff]  ;;  %v4673_v14 = vpack.c.bf16 %v4607_v45, %v4606_v8  ;;  %v6248_v45 = vld [vmem:[%s9632_s11 + $0xc] sm:$0xf0] }
 0x8f1   : > { %v4383_v36 = vadd.f32 %v9169_v12, %v4360_v27  ;;  %v4380_v12 = vadd.f32 %v9162_v5, %v4357_v49  ;;  %v4688_v5 = vld [vmem:[%s9633_s12 + $0x10] sm:$0xff]  ;;  %v4605_v27 = vld [vmem:[#allocation2 + $0x48] sm:$0xff] }
 0x8f2   : > { %4479 = vrot.lane.b32.xlu1 %v4404_v33, %s9690_s30  ;;  %4477 = vrot.lane.b32.xlu0 %v9187_v40, %s9690_s30  ;;  %v4603_v57 = vld [vmem:[#allocation2 + $0x38] sm:$0xff] }
 0x8f3   : > { %v4399_v44 = vmax.f32 %v4383_v36, 0.0  ;;  %v4396_v2 = vmax.f32 %v4380_v12, 0.0  ;;  %v4600_v12 = vld [vmem:[#allocation2 + $0x20] sm:$0xff] }
 0x8f4   : > { %v4338_v17 = vpop.f32.mrf.mxu3 }
 0x8f5   : > { %4475 = vrot.lane.b32.xlu2 %v4401_v9, %s9690_s30  ;;  %v4339_v7 = vadd.f32 %v4338_v17, %v3883_v6 }
 0x8f7   : > { %v4362_v46 = vadd.f32 %v9126_v62, %v4339_v7  ;;  %v4604_v7 = vld [vmem:[#allocation2 + $0x40] sm:$0xff] }
 0x8f9   : > { %v4385_v40 = vadd.f32 %v9175_v3, %v4362_v46  ;;  %v4689_v3 = vld [vmem:[%s9633_s12 + $0x18] sm:$0xff]  ;;  %v4672_v46 = vpack.c.bf16 %v4605_v27, %v4604_v7 }
 0x8fa   : > { %4573 = vrot.lane.b32.xlu1 %v4401_v9, %s9691_s19  ;;  %4577 = vrot.lane.b32.xlu0 %v4404_v33, %s9691_s19 }
 0x8fb   : > { %v4402_v62 = vmax.f32 %v4385_v40, 0.0 }
 0x8fc   : > { %v4341_v41 = vpop.f32.mrf.mxu3 }
 0x8fd   : > { %v4342_v11 = vadd.f32 %v4341_v41, %v3883_v6  ;;  %4569 = vrot.lane.b32.xlu2 %v9214_v24, %s9691_s19  ;;  %v4694_v24 = vld [vmem:[%s9633_s12 + $0x40] sm:$0xff] }
 0x8ff   : > { %v4365_v42 = vadd.f32 %v9142_v63, %v4342_v11 }
 0x901   : > { %v4388_v18 = vadd.f32 %v9185_v30, %v4365_v42  ;;  %v4687_v30 = vld [vmem:[%s9633_s12 + $0x8] sm:$0xff]  ;;  %v4602_v42 = vld [vmem:[#allocation2 + $0x30] sm:$0xff] }
 0x902   : > { %4571 = vrot.lane.b32.xlu0 %v4399_v44, %s9691_s19  ;;  %v4671_v44 = vpack.c.bf16 %v4603_v57, %v4602_v42 }
 0x903   : > { %v4405_v52 = vmax.f32 %v4388_v18, 0.0 }
 0x904   : > { %v4343_v38 = vpop.f32.mrf.mxu3 }
 0x905   : > { %4579 = vrot.lane.b32.xlu1 %v4405_v52, %s9691_s19  ;;  %4575 = vrot.lane.b32.xlu2 %v4402_v62, %s9691_s19  ;;  %v4601_v62 = vld [vmem:[#allocation2 + $0x28] sm:$0xff] }
 0x90a   : > { %4567 = vrot.lane.b32.xlu0 %v4396_v2, %s9691_s19  ;;  %v4670_v2 = vpack.c.bf16 %v4601_v62, %v4600_v12 }
 0x90d   : > { %4706 = vperm.xlu1 %6633, %v4686_v47   ;;  %4565 = vrot.lane.b32.xlu2 %v9218_v10, %s9691_s19  ;;  %v4537_v63 = vpop.permute.xlu2 %4536  ;;  %v4695_v10 = vld [vmem:[%s9633_s12 + $0x48] sm:$0xff]  ;;  %v4599_v47 = vld [vmem:[#allocation2 + $0x18] sm:$0xff] }
 0x90e   : > { %4551 = vst.msk [vmem:[#allocation2 + $0xd8] sm:$0xff] %vm684_vm1, %v4537_v63 }
 0x912   : > { %4716 = vperm.xlu0 %6632, %v4688_v5  }
 0x915   : > { %4721 = vperm.xlu1 %6633, %v4689_v3   ;;  %4711 = vperm.xlu2 %6631, %v4687_v30   ;;  %v4517_v59 = vpop.permute.xlu2 %4516  ;;  %v4623_v30 = vld [vmem:[#allocation2 + $0xd8] sm:$0xff] }
 0x916   : > { %4531 = vst.msk [vmem:[#allocation2 + $0xb4] sm:$0xff] %vm684_vm1, %v4517_v59  ;;  %v4598_v59 = vld [vmem:[#allocation2 + $0x10] sm:$0xff] }
 0x91a   : > { %4731 = vperm.xlu0 %6632, %v4691_v28  }
 0x91d   : > { %4736 = vperm.xlu1 %6633, %v4692_v15   ;;  %4726 = vperm.xlu2 %6631, %v4690_v29   ;;  %v4468_v20 = vpop.permute.xlu2 %4467  ;;  %v4669_v15 = vpack.c.bf16 %v4599_v47, %v4598_v59  ;;  %v6581_v47 = vld [vmem:[%s9632_s11 + $0x10] sm:$0xf0]  ;;  %v6282_v59 = vld [vmem:[%s9632_s11 + $0x48] sm:$0xf] }
 0x91e   : > { %v4482_v58 = vsel %vm761_vm3, %v9228_v16, %v4468_v20  ;;  %v4699_v16 = vld [vmem:[%s9633_s12 + $0x68] sm:$0xff] }
 0x91f   : > { %4492 = vst.msk [vmem:[#allocation2 + $0x74] sm:$0xff] %vm684_vm1, %v4482_v58  ;;  %v4597_v20 = vld [vmem:[#allocation2 + $0x8] sm:$0xff]  ;;  %v6246_v58 = vld [vmem:[%s9632_s11] sm:$0xf] }
 0x922   : > { %4746 = vperm.xlu0 %6632, %v4694_v24   ;;  %v6580_v24 = vld [vmem:[%s9632_s11 + $0x8] sm:$0xf0] }
 0x924   : > { %v4464_v25 = vpop.permute.xlu0 %4463 }
 0x925   : > { %4751 = vperm.xlu1 %6633, %v4695_v10   ;;  %v4481_v54 = vsel %vm761_vm3, %v9216_v39, %v4464_v25  ;;  %4741 = vperm.xlu2 %6631, %v4693_v51   ;;  %v4539_v22 = vpop.permute.xlu2 %4538  ;;  %v4562_v39 = vpop.permute.xlu1 %4561  ;;  %v4596_v51 = vld [vmem:[#allocation2] sm:$0xff] }
 0x926   : > { %4491 = vst.msk [vmem:[#allocation2 + $0x6c] sm:$0xff] %vm684_vm1, %v4481_v54  ;;  %v4668_v54 = vpack.c.bf16 %v4597_v20, %v4596_v51  ;;  %v6294_v51 = vld [vmem:[%s9632_s11 + $0x60] sm:$0xf] }
 0x927   : > { %4552 = vst.msk [vmem:[#allocation2 + $0xe0] sm:$0xff] %vm684_vm1, %v4539_v22  ;;  %v6247_v22 = vor.u32 %v6580_v24, %v6246_v58  ;;  %v6266_v58 = vld [vmem:[%s9632_s11 + $0x20] sm:$0xf]  ;;  %v6584_v24 = vld [vmem:[%s9632_s11 + $0x28] sm:$0xf0] }
 0x92a   : > { %4776 = vperm.xlu0 %6632, %v4700_v55  }
 0x92d   : > { %4781 = vperm.xlu1 %6633, %v4701_v19   ;;  %4771 = vperm.xlu2 %6631, %v4699_v16   ;;  %v4519_v37 = vpop.permute.xlu2 %4518  ;;  %v4610_v13 = vld [vmem:[#allocation2 + $0x70] sm:$0xff]  ;;  %v4609_v61 = vld [vmem:[#allocation2 + $0x68] sm:$0xff] }
 0x92e   : > { %4532 = vst.msk [vmem:[#allocation2 + $0xbc] sm:$0xff] %vm684_vm1, %v4519_v37  ;;  %v4674_v56 = vpack.c.bf16 %v4609_v61, %v4608_v60  ;;  %v4624_v52 = vld [vmem:[#allocation2 + $0xe0] sm:$0xff] }
 0x932   : > { %4791 = vperm.xlu0 %6632, %v4703_v35  }
 0x934   : > { %v4472_v43 = vpop.permute.xlu1 %4471  ;;  %v4541_v53 = vpop.permute.xlu0 %4540 }
 0x935   : > { %4756 = vperm.xlu1 %6633, %v4696_v21   ;;  %v4483_v9 = vsel %vm761_vm3, %v4470_v1, %v4472_v43  ;;  %4553 = vst.msk [vmem:[#allocation2 + $0xe8] sm:$0xff] %vm684_vm1, %v4541_v53  ;;  %4786 = vperm.xlu2 %6631, %v4702_v31   ;;  %v4501_v33 = vpop.permute.xlu2 %4500 }
 0x936   : > { %4493 = vst.msk [vmem:[#allocation2 + $0x7c] sm:$0xff] %vm684_vm1, %v4483_v9 }
 0x937   : > { %4513 = vst.msk [vmem:[#allocation2 + $0xa0] sm:$0xff] %vm684_vm1, %v4501_v33 }
 0x93a   : > { %4766 = vperm.xlu0 %6632, %v4698_v48  }
 0x93c   : > { %v4521_v0 = vpop.permute.xlu0 %4520  ;;  %v4625_v18 = vld [vmem:[#allocation2 + $0xe8] sm:$0xff] }
 0x93d   : > { %4533 = vst.msk [vmem:[#allocation2 + $0xc4] sm:$0xff] %vm684_vm1, %v4521_v0  ;;  %4761 = vperm.xlu2 %6631, %v4697_v34   ;;  %v4611_v6 = vld [vmem:[#allocation2 + $0x78] sm:$0xff]  ;;  %v4682_v38 = vpack.c.bf16 %v4625_v18, %v4624_v52 }
 0x93e   : > { %v4675_v50 = vpack.c.bf16 %v4611_v6, %v4610_v13  ;;  %v4616_v43 = vld [vmem:[#allocation2 + $0xa0] sm:$0xff]  ;;  %v6258_v6 = vld [vmem:[%s9632_s11 + $0x18] sm:$0xf] }
 0x93f   : > { %v4564_v32 = vpop.permute.xlu2 %4563 }
 0x940   : > { %v4581_v4 = vsel %vm2545_vm10, %v4562_v39, %v4564_v32  ;;  %4956 = vmatpush.bf16.msra.mxu1 %v4675_v50  ;;  %v4619_v39 = vld [vmem:[#allocation2 + $0xb8] sm:$0xff]  ;;  %v6583_v50 = vld [vmem:[%s9632_s11 + $0x20] sm:$0xf0] }
 0x941   : > { %4591 = vst.msk [vmem:[#allocation2 + $0xfc] sm:$0xff] %vm684_vm1, %v4581_v4  ;;  %v6259_v61 = vor.u32 %v6583_v50, %v6258_v6  ;;  %v6594_v50 = vld [vmem:[%s9632_s11 + $0x7c] sm:$0xf] }
 0x944   : > { %v4545_v23 = vpop.permute.xlu1 %4544  ;;  %v4543_v26 = vpop.permute.xlu0 %4542  ;;  %4957 = vmatpush.bf16.msra.mxu1 %v4674_v56  ;;  %v4620_v10 = vld [vmem:[#allocation2 + $0xc0] sm:$0xff] }
 0x945   : > { %4555 = vst.msk [vmem:[#allocation2 + $0xf8] sm:$0xf] %vm689_vm2, %v4545_v23  ;;  %v6579_v56 = vld [vmem:[%s9632_s11 + $0x4] sm:$0xf] }
 0x946   : > { %4554 = vst.msk [vmem:[#allocation2 + $0xf0] sm:$0xff] %vm684_vm1, %v4543_v26 }
 0x947   : > { %v4497_v17 = vpop.permute.xlu2 %4496 }
 0x948   : > { %4511 = vst.msk [vmem:[#allocation2 + $0x90] sm:$0xff] %vm684_vm1, %v4497_v17  ;;  %4958 = vmatpush.bf16.msra.mxu1 %v4673_v14  ;;  %v6251_v17 = vor.u32 %v6579_v56, %v6248_v45  ;;  %v6330_v45 = vld [vmem:[%s9632_s11 + $0xa8] sm:$0xf] }
 0x94c   : > { %v4525_v36 = vpop.permute.xlu1 %4524  ;;  %v4523_v41 = vpop.permute.xlu0 %4522  ;;  %4959 = vmatpush.bf16.msra.mxu1 %v4672_v46  ;;  %v4627_v11 = vld [vmem:[#allocation2 + $0xf8] sm:$0xff] }
 0x94d   : > { %4535 = vst.msk [vmem:[#allocation2 + $0xd4] sm:$0xf] %vm689_vm2, %v4525_v36  ;;  %v4626_v40 = vld [vmem:[#allocation2 + $0xf0] sm:$0xff] }
 0x94e   : > { %4534 = vst.msk [vmem:[#allocation2 + $0xcc] sm:$0xff] %vm684_vm1, %v4523_v41  ;;  %v4683_v49 = vpack.c.bf16 %v4627_v11, %v4626_v40  ;;  %v6270_v36 = vld [vmem:[%s9632_s11 + $0x30] sm:$0xf]  ;;  %v6586_v41 = vld [vmem:[%s9632_s11 + $0x38] sm:$0xf0] }
 0x94f   : > { %v4476_v29 = vpop.permute.xlu2 %4475  ;;  %v4614_v48 = vld [vmem:[#allocation2 + $0x90] sm:$0xff]  ;;  %v6271_v11 = vor.u32 %v6586_v41, %v6270_v36  ;;  %v6604_v36 = vld [vmem:[%s9632_s11 + $0xc8] sm:$0xf0] }
 0x950   : > { %5010 = vmatpush.bf16.msra.mxu3 %v4683_v49  ;;  %4960 = vmatpush.bf16.msra.mxu1 %v4671_v44  ;;  %v6582_v49 = vld [vmem:[%s9632_s11 + $0x1c] sm:$0xf]  ;;  %v6260_v44 = vld [vmem:[%s9632_s11 + $0x24] sm:$0xf0] }
 0x951   : > { %v6263_v62 = vor.u32 %v6582_v49, %v6260_v44  ;;  %v6326_v44 = vld [vmem:[%s9632_s11 + $0x98] sm:$0xf] }
 0x954   : > { %5011 = vmatpush.bf16.msra.mxu3 %v4682_v38  ;;  %v4505_v63 = vpop.permute.xlu1 %4504  ;;  %v4503_v5 = vpop.permute.xlu0 %4502  ;;  %4961 = vmatpush.bf16.msra.mxu1 %v4670_v2  ;;  %v6254_v2 = vld [vmem:[%s9632_s11 + $0x8] sm:$0xf] }
 0x955   : > { %4515 = vst.msk [vmem:[#allocation2 + $0xb0] sm:$0xf] %vm689_vm2, %v4505_v63  ;;  %v4622_v3 = vld [vmem:[#allocation2 + $0xd0] sm:$0xff]  ;;  %v4621_v1 = vld [vmem:[#allocation2 + $0xc8] sm:$0xff] }
 0x956   : > { %4514 = vst.msk [vmem:[#allocation2 + $0xa8] sm:$0xff] %vm684_vm1, %v4503_v5  ;;  %v4681_v28 = vpack.c.bf16 %v4623_v30, %v4622_v3  ;;  %v4680_v25 = vpack.c.bf16 %v4621_v1, %v4620_v10  ;;  %v6255_v30 = vor.u32 %v6581_v47, %v6254_v2  ;;  %v6272_v1 = vld [vmem:[%s9632_s11 + $0x3c] sm:$0xf0]  ;;  %v6267_v10 = vor.u32 %v6584_v24, %v6266_v58 }
 0x957   : > { %v4570_v31 = vpop.permute.xlu2 %4569 }
 0x958   : > { %5012 = vmatpush.bf16.msra.mxu3 %v4681_v28  ;;  %4962 = vmatpush.bf16.msra.mxu1 %v4669_v15  ;;  %v6589_v28 = vld [vmem:[%s9632_s11 + $0x50] sm:$0xf0] }
 0x959   : > { %v6283_v15 = vor.u32 %v6589_v28, %v6282_v59 }
 0x95c   : > { %5013 = vmatpush.bf16.msra.mxu3 %v4680_v25  ;;  %v4474_v55 = vpop.permute.xlu1 %4473  ;;  %v4499_v19 = vpop.permute.xlu0 %4498  ;;  %4963 = vmatpush.bf16.msra.mxu1 %v4668_v54  ;;  %v4618_v16 = vld [vmem:[#allocation2 + $0xb0] sm:$0xff]  ;;  %v6592_v25 = vld [vmem:[%s9632_s11 + $0x68] sm:$0xf0] }
 0x95d   : > { %v4484_v37 = vsel %vm761_vm3, %v4474_v55, %v4476_v29  ;;  %4512 = vst.msk [vmem:[#allocation2 + $0x98] sm:$0xff] %vm684_vm1, %v4499_v19  ;;  %v4679_v35 = vpack.c.bf16 %v4619_v39, %v4618_v16  ;;  %v4617_v21 = vld [vmem:[#allocation2 + $0xa8] sm:$0xff]  ;;  %v6585_v29 = vld [vmem:[%s9632_s11 + $0x34] sm:$0xf]  ;;  %v6295_v54 = vor.u32 %v6592_v25, %v6294_v51  ;;  %v6284_v55 = vld [vmem:[%s9632_s11 + $0x54] sm:$0xf0] }
 0x95e   : > { %4494 = vst.msk [vmem:[#allocation2 + $0x84] sm:$0xff] %vm684_vm1, %v4484_v37  ;;  %v4678_v53 = vpack.c.bf16 %v4617_v21, %v4616_v43  ;;  %v6275_v20 = vor.u32 %v6585_v29, %v6272_v1  ;;  %v6278_v16 = vld [vmem:[%s9632_s11 + $0x38] sm:$0xf]  ;;  %v6587_v39 = vld [vmem:[%s9632_s11 + $0x40] sm:$0xf0] }
 0x95f   : > { %4964 = vmatmul.bf16.vlgmr.msra.gmra.mxu1 %v6247_v22  ;;  %v4576_v32 = vpop.permute.xlu2 %4575  ;;  %v6588_v22 = vld [vmem:[%s9632_s11 + $0x4c] sm:$0xf]  ;;  %v6279_v37 = vor.u32 %v6587_v39, %v6278_v16  ;;  %v6595_v21 = vld [vmem:[%s9632_s11 + $0x80] sm:$0xf0]  ;;  %v6350_v29 = vld [vmem:[%s9632_s11 + $0xc8] sm:$0xf] }
 0x960   : > { %5014 = vmatpush.bf16.msra.mxu3 %v4679_v35  ;;  %v6287_v19 = vor.u32 %v6588_v22, %v6284_v55  ;;  %v6306_v35 = vld [vmem:[%s9632_s11 + $0x78] sm:$0xf]  ;;  %v6591_v43 = vld [vmem:[%s9632_s11 + $0x64] sm:$0xf]  ;;  %v6605_v1 = vld [vmem:[%s9632_s11 + $0xd0] sm:$0xf0] }
 0x964   : > { %5015 = vmatpush.bf16.msra.mxu3 %v4678_v53  ;;  %v4480_v9 = vpop.permute.xlu1 %4479  ;;  %v4478_v33 = vpop.permute.xlu0 %4477  ;;  %v4615_v34 = vld [vmem:[#allocation2 + $0x98] sm:$0xff]  ;;  %v6296_v53 = vld [vmem:[%s9632_s11 + $0x6c] sm:$0xf0] }
 0x965   : > { %v4485_v0 = vsel %vm761_vm3, %v4478_v33, %v4480_v9  ;;  %v4677_v13 = vpack.c.bf16 %v4615_v34, %v4614_v48  ;;  %v4612_v26 = vld [vmem:[#allocation2 + $0x80] sm:$0xff]  ;;  %v6299_v9 = vor.u32 %v6591_v43, %v6296_v53  ;;  %v6290_v33 = vld [vmem:[%s9632_s11 + $0x50] sm:$0xf]  ;;  %v6590_v48 = vld [vmem:[%s9632_s11 + $0x58] sm:$0xf0] }
 0x966   : > { %4495 = vst.msk [vmem:[#allocation2 + $0x8c] sm:$0xf] %vm689_vm2, %v4485_v0  ;;  %v6291_v34 = vor.u32 %v6590_v48, %v6290_v33  ;;  %v6318_v0 = vld [vmem:[%s9632_s11 + $0x90] sm:$0xf] }
 0x967   : > { %v4566_v40 = vpop.permute.xlu2 %4565 }
 0x968   : > { %5016 = vmatpush.bf16.msra.mxu3 %v4677_v13  ;;  %v6598_v13 = vld [vmem:[%s9632_s11 + $0x98] sm:$0xf0] }
 0x969   : > { %v6319_v6 = vor.u32 %v6598_v13, %v6318_v0 }
 0x96c   : > { %v4574_v4 = vpop.permute.xlu1 %4573  ;;  %v4578_v60 = vpop.permute.xlu0 %4577 }
 0x96d   : > { %v4584_v23 = vsel %vm2545_vm10, %v4574_v4, %v4576_v32  ;;  %v4613_v8 = vld [vmem:[#allocation2 + $0x88] sm:$0xff] }
 0x96e   : > { %4594 = vst.msk [vmem:[#allocation2 + $0x114] sm:$0xff] %vm684_vm1, %v4584_v23  ;;  %v4676_v14 = vpack.c.bf16 %v4613_v8, %v4612_v26  ;;  %v6308_v32 = vld [vmem:[%s9632_s11 + $0x84] sm:$0xf0]  ;;  %v6601_v23 = vld [vmem:[%s9632_s11 + $0xb0] sm:$0xf0] }
 0x96f   : > { %4969 = vmatmul.bf16.gmra.mxu1 %v6259_v61  ;;  %v6311_v61 = vor.u32 %v6594_v50, %v6308_v32  ;;  %v6302_v4 = vld [vmem:[%s9632_s11 + $0x68] sm:$0xf]  ;;  %v6331_v26 = vor.u32 %v6601_v23, %v6330_v45  ;;  %v6597_v8 = vld [vmem:[%s9632_s11 + $0x94] sm:$0xf]  ;;  %v4712_v55 = vpop.permute.xlu2 %4711 }
 0x970   : > { %5017 = vmatpush.bf16.msra.mxu3 %v4676_v14  ;;  %v6320_v14 = vld [vmem:[%s9632_s11 + $0x9c] sm:$0xf0] }
 0x973   : > { %5018 = vmatmul.bf16.vlgmr.msra.gmra.mxu3 %v6251_v17  ;;  %v6323_v17 = vor.u32 %v6597_v8, %v6320_v14 }
 0x974   : > { %v4572_v7 = vpop.permute.xlu0 %4571 }
 0x975   : > { %v4583_v27 = vsel %vm2545_vm10, %v4570_v31, %v4572_v7  ;;  %v6307_v31 = vor.u32 %v6595_v21, %v6306_v35  ;;  %v6314_v7 = vld [vmem:[%s9632_s11 + $0x80] sm:$0xf] }
 0x976   : > { %4593 = vst.msk [vmem:[#allocation2 + $0x10c] sm:$0xff] %vm684_vm1, %v4583_v27  ;;  %v6596_v27 = vld [vmem:[%s9632_s11 + $0x88] sm:$0xf0] }
 0x977   : > { %v4580_v46 = vpop.permute.xlu1 %4579  ;;  %v4727_v45 = vpop.permute.xlu2 %4726 }
 0x978   : > { %v4585_v57 = vsel %vm2545_vm10, %v4578_v60, %v4580_v46  ;;  %v6593_v60 = vld [vmem:[%s9632_s11 + $0x70] sm:$0xf0]  ;;  %v6315_v46 = vor.u32 %v6596_v27, %v6314_v7 }
 0x979   : > { %4595 = vst.msk [vmem:[#allocation2 + $0x11c] sm:$0xf] %vm689_vm2, %v4585_v57  ;;  %v6303_v56 = vor.u32 %v6593_v60, %v6302_v4  ;;  %v6342_v57 = vld [vmem:[%s9632_s11 + $0xc0] sm:$0xf] }
 0x97a   : > { %v6343_v41 = vor.u32 %v6604_v36, %v6342_v57 }
 0x97c   : > { %v4568_v42 = vpop.permute.xlu0 %4567 }
 0x97d   : > { %v4582_v18 = vsel %vm2545_vm10, %v4566_v40, %v4568_v42  ;;  %v4630_v52 = vld [vmem:[#allocation2 + $0x110] sm:$0xff]  ;;  %v6332_v40 = vld [vmem:[%s9632_s11 + $0xb4] sm:$0xf0] }
 0x97e   : > { %4592 = vst.msk [vmem:[#allocation2 + $0x104] sm:$0xff] %vm684_vm1, %v4582_v18  ;;  %v6599_v18 = vld [vmem:[%s9632_s11 + $0xa0] sm:$0xf0] }
 0x97f   : > { %4974 = vmatmul.bf16.gmra.mxu1 %v6271_v11  ;;  %v6600_v11 = vld [vmem:[%s9632_s11 + $0xac] sm:$0xf] }
 0x980   : > { %v4631_v12 = vld [vmem:[#allocation2 + $0x118] sm:$0xff]  ;;  %v6335_v42 = vor.u32 %v6600_v11, %v6332_v40 }
 0x981   : > { %v4685_v38 = vpack.c.bf16 %v4631_v12, %v4630_v52  ;;  %v6603_v12 = vld [vmem:[%s9632_s11 + $0xc4] sm:$0xf] }
 0x983   : > { %5070 = vmatpush.bf16.msra.mxu0 %v4685_v38  ;;  %5023 = vmatmul.bf16.gmra.mxu3 %v6263_v62  ;;  %v6327_v62 = vor.u32 %v6599_v18, %v6326_v44  ;;  %v6344_v38 = vld [vmem:[%s9632_s11 + $0xcc] sm:$0xf0] }
 0x984   : > { %v6347_v2 = vor.u32 %v6603_v12, %v6344_v38  ;;  %v4717_v43 = vpop.permute.xlu0 %4716 }
 0x985   : > { %v4628_v63 = vld [vmem:[#allocation2 + $0x100] sm:$0xff]  ;;  %v4629_v5 = vld [vmem:[#allocation2 + $0x108] sm:$0xff] }
 0x986   : > { %v4684_v3 = vpack.c.bf16 %v4629_v5, %v4628_v63  ;;  %v6338_v63 = vld [vmem:[%s9632_s11 + $0xb0] sm:$0xf]  ;;  %v6602_v5 = vld [vmem:[%s9632_s11 + $0xb8] sm:$0xf0] }
 0x988   : > { %5071 = vmatpush.bf16.msra.mxu0 %v4684_v3 }
 0x98b   : > { %6352 = vmatmul.msk.bf16.vlgmr.msra.gmra.mxu0 %vm1735_vm15, %v6255_v30  ;;  %v6339_v30 = vor.u32 %v6602_v5, %v6338_v63 }
 0x98f   : > { %4979 = vmatmul.bf16.gmra.mxu1 %v6283_v15  ;;  %v4707_v15 = vpop.permute.xlu1 %4706 }
 0x993   : > { %5028 = vmatmul.bf16.gmra.mxu3 %v6275_v20 }
 0x997   : > { %v4722_v13 = vpop.permute.xlu1 %4721 }
 0x99b   : > { %6353 = vmatmul.msk.bf16.gmra.mxu0 %vm1735_vm15, %v6267_v10  ;;  %v6351_v10 = vor.u32 %v6605_v1, %v6350_v29 }
 0x99f   : > { %4984 = vmatmul.bf16.gmra.mxu1 %v6295_v54  ;;  %v4737_v44 = vpop.permute.xlu1 %4736 }
 0x9a3   : > { %5033 = vmatmul.bf16.gmra.mxu3 %v6287_v19 }
 0x9ab   : > { %6354 = vmatmul.msk.bf16.gmra.mxu0 %vm1735_vm15, %v6279_v37 }
 0x9af   : > { %4989 = vmatmul.bf16.gmra.mxu1 %v6307_v31 }
 0x9b3   : > { %5038 = vmatmul.bf16.gmra.mxu3 %v6299_v9 }
 0x9bb   : > { %6355 = vmatmul.msk.bf16.gmra.mxu0 %vm1735_vm15, %v6291_v34 }
 0x9bf   : > { %4994 = vmatmul.bf16.gmra.mxu1 %v6319_v6 }
 0x9c3   : > { %5043 = vmatmul.bf16.gmra.mxu3 %v6311_v61 }
 0x9cb   : > { %6356 = vmatmul.msk.bf16.gmra.mxu0 %vm1735_vm15, %v6303_v56 }
 0x9cf   : > { %4999 = vmatmul.bf16.gmra.mxu1 %v6331_v26 }
 0x9d3   : > { %5048 = vmatmul.bf16.gmra.mxu3 %v6323_v17 }
 0x9db   : > { %6357 = vmatmul.msk.bf16.gmra.mxu0 %vm1735_vm15, %v6315_v46  ;;  %v4732_v46 = vpop.permute.xlu0 %4731 }
 0x9dc   : > { %v4965_v49 = vpop.f32.mrf.mxu1 }
 0x9dd   : > { %v4966_v20 = vadd.f32 %v4965_v49, %v4707_v15 }
 0x9df   : > { %5004 = vmatmul.bf16.gmra.mxu1 %v6343_v41 }
 0x9e3   : > { %5053 = vmatmul.bf16.gmra.mxu3 %v6335_v42 }
 0x9e4   : > { %v4967_v52 = vpop.f32.mrf.mxu1 }
 0x9e5   : > { %v4968_v19 = vadd.f32 %v4967_v52, %v4712_v55 }
 0x9eb   : > { %6358 = vmatmul.msk.bf16.gmra.mxu0 %vm1735_vm15, %v6327_v62 }
 0x9ec   : > { %v4970_v47 = vpop.f32.mrf.mxu1 }
 0x9ed   : > { %v4971_v53 = vadd.f32 %v4970_v47, %v4717_v43 }
 0x9f3   : > { %5058 = vmatmul.bf16.gmra.mxu3 %v6347_v2 }
 0x9f4   : > { %v4972_v59 = vpop.f32.mrf.mxu1 }
 0x9f5   : > { %v4973_v50 = vadd.f32 %v4972_v59, %v4722_v13 }
 0x9f6   : > { %v5019_v3 = vpop.f32.mrf.mxu3 }
 0x9f7   : > { %v5020_v24 = vadd.f32 %v5019_v3, %v4966_v20  ;;  %v4752_v20 = vpop.permute.xlu1 %4751 }
 0x9fb   : > { %6359 = vmatmul.msk.bf16.gmra.mxu0 %vm1735_vm15, %v6339_v30  ;;  %v4742_v30 = vpop.permute.xlu2 %4741 }
 0x9fc   : > { %v4975_v51 = vpop.f32.mrf.mxu1 }
 0x9fd   : > { %v4976_v23 = vadd.f32 %v4975_v51, %v4727_v45  ;;  %v4747_v51 = vpop.permute.xlu0 %4746 }
 0x9fe   : > { %v5021_v28 = vpop.f32.mrf.mxu3 }
 0x9ff   : > { %v5022_v39 = vadd.f32 %v5021_v28, %v4968_v19 }
 0xa04   : > { %v4977_v21 = vpop.f32.mrf.mxu1 }
 0xa05   : > { %v4978_v57 = vadd.f32 %v4977_v21, %v4732_v46  ;;  %v4782_v21 = vpop.permute.xlu1 %4781 }
 0xa06   : > { %v5024_v58 = vpop.f32.mrf.mxu3 }
 0xa07   : > { %v5025_v33 = vadd.f32 %v5024_v58, %v4971_v53 }
 0xa08   : > { %v5073_v25 = vpop.f32.mrf.mxu0 }
 0xa09   : > { %v5074_v54 = vadd.f32 %v5073_v25, %v5020_v24 }
 0xa0b   : > { %v5118_v22 = vmax.f32 %v5074_v54, 0.0  ;;  %6360 = vmatmul.msk.bf16.gmra.mxu0 %vm1735_vm15, %v6351_v10 }
 0xa0c   : > { %v4980_v6 = vpop.f32.mrf.mxu1 }
 0xa0d   : > { %5136 = vst.msk [vmem:[#allocation3] sm:$0xff] %vm684_vm1, %v5118_v22  ;;  %v4981_v18 = vadd.f32 %v4980_v6, %v4737_v44 }
 0xa0e   : > { %v5026_v16 = vpop.f32.mrf.mxu3 }
 0xa0f   : > { %v5027_v61 = vadd.f32 %v5026_v16, %v4973_v50 }
 0xa10   : > { %v5075_v37 = vpop.f32.mrf.mxu0 }
 0xa11   : > { %v5076_v35 = vadd.f32 %v5075_v37, %v5022_v39  ;;  %v4772_v39 = vpop.permute.xlu2 %4771 }
 0xa13   : > { %v5119_v31 = vmax.f32 %v5076_v35, 0.0 }
 0xa14   : > { %v4982_v26 = vpop.f32.mrf.mxu1 }
 0xa15   : > { %5137 = vst.msk [vmem:[#allocation3 + $0x18] sm:$0xff] %vm684_vm1, %v5119_v31  ;;  %v4983_v59 = vadd.f32 %v4982_v26, %v4742_v30 }
 0xa16   : > { %v5029_v9 = vpop.f32.mrf.mxu3 }
 0xa17   : > { %v5030_v14 = vadd.f32 %v5029_v9, %v4976_v23 }
 0xa18   : > { %v5078_v48 = vpop.f32.mrf.mxu0 }
 0xa19   : > { %v5079_v34 = vadd.f32 %v5078_v48, %v5025_v33  ;;  %v4777_v33 = vpop.permute.xlu0 %4776  ;;  %v4787_v50 = vpop.permute.xlu2 %4786 }
 0xa1b   : > { %v5120_v0 = vmax.f32 %v5079_v34, 0.0 }
 0xa1c   : > { %v4985_v11 = vpop.f32.mrf.mxu1 }
 0xa1d   : > { %5138 = vst.msk [vmem:[#allocation3 + $0x30] sm:$0xff] %vm684_vm1, %v5120_v0  ;;  %v4986_v54 = vadd.f32 %v4985_v11, %v4747_v51 }
 0xa1e   : > { %v5031_v32 = vpop.f32.mrf.mxu3 }
 0xa1f   : > { %v5032_v41 = vadd.f32 %v5031_v32, %v4978_v57 }
 0xa20   : > { %v5080_v4 = vpop.f32.mrf.mxu0 }
 0xa21   : > { %v5081_v60 = vadd.f32 %v5080_v4, %v5027_v61  ;;  %v4757_v61 = vpop.permute.xlu1 %4756  ;;  %v4792_v26 = vpop.permute.xlu0 %4791 }
 0xa23   : > { %v5121_v56 = vmax.f32 %v5081_v60, 0.0 }
 0xa24   : > { %v4987_v5 = vpop.f32.mrf.mxu1 }
 0xa25   : > { %5139 = vst.msk [vmem:[#allocation3 + $0x48] sm:$0xff] %vm684_vm1, %v5121_v56  ;;  %v4988_v43 = vadd.f32 %v4987_v5, %v4752_v20  ;;  %vm9696_vm1 = vcmask 1048416  }
 0xa26   : > { %v5034_v8 = vpop.f32.mrf.mxu3  ;;  %vm9704_vm10 = vmmov %vm9696_vm1 }
 0xa27   : > { %v5035_v38 = vadd.f32 %v5034_v8, %v4981_v18  ;;  %vm9706_vm13 = vmmov %vm9696_vm1 }
 0xa28   : > { %v5083_v17 = vpop.f32.mrf.mxu0 }
 0xa29   : > { %v5084_v7 = vadd.f32 %v5083_v17, %v5030_v14  ;;  %v4762_v17 = vpop.permute.xlu2 %4761  ;;  %v4767_v11 = vpop.permute.xlu0 %4766 }
 0xa2b   : > { %v5122_v27 = vmax.f32 %v5084_v7, 0.0 }
 0xa2c   : > { %v4990_v25 = vpop.f32.mrf.mxu1 }
 0xa2d   : > { %5140 = vst.msk [vmem:[#allocation3 + $0x60] sm:$0xf] %vm689_vm2, %v5122_v27  ;;  %v5146_v62 = vrot.slane %v5122_v27, 4  ;;  %v4991_v4 = vadd.f32 %v4990_v25, %v4757_v61  ;;  %vm9697_vm2 = vcmask 130048  }
 0xa2e   : > { %v5036_v36 = vpop.f32.mrf.mxu3  ;;  %vm9699_vm3 = vmmov %vm9697_vm2 }
 0xa2f   : > { %v5037_v29 = vadd.f32 %v5036_v36, %v4983_v59  ;;  %vm9705_vm11 = vmmov %vm9697_vm2 }
 0xa30   : > { %v5085_v40 = vpop.f32.mrf.mxu0  ;;  %vm9707_vm14 = vmmov %vm9697_vm2 }
 0xa31   : > { %v5086_v42 = vadd.f32 %v5085_v40, %v5032_v41  ;;  %vm9708_vm15 = vmmov %vm9697_vm2 }
 0xa32   : > { %vm9710_vm8 = vmmov %vm9697_vm2 }
 0xa33   : > { %v5123_v49 = vmax.f32 %v5086_v42, 0.0 }
 0xa34   : > { %v4992_v9 = vpop.f32.mrf.mxu1 }
 0xa35   : > { %v5147_v52 = vrot.slane %v5123_v49, 4  ;;  %v4993_v7 = vadd.f32 %v4992_v9, %v4762_v17 }
 0xa36   : > { %v5039_v12 = vpop.f32.mrf.mxu3 }
 0xa37   : > { %v5148_v2 = vsel %vm1516_vm4, %v5146_v62, %v5147_v52  ;;  %v5040_v19 = vadd.f32 %v5039_v12, %v4986_v54 }
 0xa38   : > { %v5088_v47 = vpop.f32.mrf.mxu0  ;;  %5155 = vrot.lane.b32.xlu1 %v5148_v2, %s9695_s24 }
 0xa39   : > { %v5089_v63 = vadd.f32 %v5088_v47, %v5035_v38 }
 0xa3b   : > { %v5124_v3 = vmax.f32 %v5089_v63, 0.0 }
 0xa3c   : > { %v4995_v56 = vpop.f32.mrf.mxu1 }
 0xa3d   : > { %v5149_v28 = vrot.slane %v5124_v3, 4  ;;  %v4996_v42 = vadd.f32 %v4995_v56, %v4767_v11 }
 0xa3e   : > { %v5041_v15 = vpop.f32.mrf.mxu3 }
 0xa3f   : > { %v5150_v1 = vsel %vm1516_vm4, %v5147_v52, %v5149_v28  ;;  %v5042_v48 = vadd.f32 %v5041_v15, %v4988_v43 }
 0xa40   : > { %v5090_v58 = vpop.f32.mrf.mxu0  ;;  %5157 = vrot.lane.b32.xlu2 %v5150_v1, %s9695_s24 }
 0xa41   : > { %v5091_v24 = vadd.f32 %v5090_v58, %v5037_v29 }
 0xa43   : > { %v5125_v10 = vmax.f32 %v5091_v24, 0.0 }
 0xa44   : > { %v4997_v36 = vpop.f32.mrf.mxu1 }
 0xa45   : > { %v5151_v22 = vrot.slane %v5125_v10, 4  ;;  %v4998_v12 = vadd.f32 %v4997_v36, %v4772_v39 }
 0xa46   : > { %v5044_v55 = vpop.f32.mrf.mxu3 }
 0xa47   : > { %v5152_v16 = vsel %vm1516_vm4, %v5149_v28, %v5151_v22  ;;  %v5045_v60 = vadd.f32 %v5044_v55, %v4991_v4 }
 0xa48   : > { %v5093_v37 = vpop.f32.mrf.mxu0  ;;  %5159 = vrot.lane.b32.xlu0 %v5152_v16, %s9695_s24 }
 0xa49   : > { %v5094_v35 = vadd.f32 %v5093_v37, %v5040_v19 }
 0xa4b   : > { %v5126_v31 = vmax.f32 %v5094_v35, 0.0 }
 0xa4c   : > { %v5000_v52 = vpop.f32.mrf.mxu1 }
 0xa4d   : > { %v5153_v53 = vrot.slane %v5126_v31, 4  ;;  %v5001_v3 = vadd.f32 %v5000_v52, %v4777_v33 }
 0xa4e   : > { %v5046_v0 = vpop.f32.mrf.mxu3 }
 0xa4f   : > { %5163 = vrot.lane.b32.xlu2 %v5153_v53, %s9695_s24  ;;  %v5154_v34 = vsel %vm1516_vm4, %v5151_v22, %v5153_v53  ;;  %v5047_v27 = vadd.f32 %v5046_v0, %v4993_v7 }
 0xa50   : > { %v5095_v13 = vpop.f32.mrf.mxu0  ;;  %5161 = vrot.lane.b32.xlu1 %v5154_v34, %s9695_s24 }
 0xa51   : > { %v5096_v6 = vadd.f32 %v5095_v13, %v5042_v48 }
 0xa53   : > { %v5127_v32 = vmax.f32 %v5096_v6, 0.0 }
 0xa54   : > { %v5002_v30 = vpop.f32.mrf.mxu1 }
 0xa55   : > { %5180 = vrot.lane.b32.xlu0 %v5127_v32, %s9669_s17  ;;  %v5003_v20 = vadd.f32 %v5002_v30, %v4782_v21 }
 0xa56   : > { %v5049_v8 = vpop.f32.mrf.mxu3 }
 0xa57   : > { %v5050_v49 = vadd.f32 %v5049_v8, %v4996_v42 }
 0xa58   : > { %v5098_v45 = vpop.f32.mrf.mxu0 }
 0xa59   : > { %v5099_v23 = vadd.f32 %v5098_v45, %v5045_v60 }
 0xa5b   : > { %v5128_v14 = vmax.f32 %v5099_v23, 0.0 }
 0xa5c   : > { %v5005_v25 = vpop.f32.mrf.mxu1 }
 0xa5d   : > { %5182 = vrot.lane.b32.xlu1 %v5128_v14, %s9669_s17  ;;  %v5006_v16 = vadd.f32 %v5005_v25, %v4787_v50 }
 0xa5e   : > { %v5051_v40 = vpop.f32.mrf.mxu3 }
 0xa5f   : > { %v5052_v2 = vadd.f32 %v5051_v40, %v4998_v12 }
 0xa60   : > { %v5100_v46 = vpop.f32.mrf.mxu0 }
 0xa61   : > { %v5101_v57 = vadd.f32 %v5100_v46, %v5047_v27 }
 0xa63   : > { %v5129_v41 = vmax.f32 %v5101_v57, 0.0 }
 0xa64   : > { %v5007_v43 = vpop.f32.mrf.mxu1 }
 0xa65   : > { %5184 = vrot.lane.b32.xlu2 %v5129_v41, %s9669_s17  ;;  %v5008_v33 = vadd.f32 %v5007_v43, %v4792_v26 }
 0xa66   : > { %v5054_v38 = vpop.f32.mrf.mxu3 }
 0xa67   : > { %v5055_v59 = vadd.f32 %v5054_v38, %v5001_v3 }
 0xa68   : > { %v5103_v44 = vpop.f32.mrf.mxu0 }
 0xa69   : > { %v5104_v18 = vadd.f32 %v5103_v44, %v5050_v49 }
 0xa6b   : > { %v5130_v62 = vmax.f32 %v5104_v18, 0.0 }
 0xa6d   : > { %5186 = vrot.lane.b32.xlu0 %v5130_v62, %s9669_s17 }
 0xa6e   : > { %v5056_v28 = vpop.f32.mrf.mxu3 }
 0xa6f   : > { %v5057_v10 = vadd.f32 %v5056_v28, %v5003_v20 }
 0xa70   : > { %v5105_v47 = vpop.f32.mrf.mxu0 }
 0xa71   : > { %v5106_v63 = vadd.f32 %v5105_v47, %v5052_v2 }
 0xa73   : > { %v5131_v5 = vmax.f32 %v5106_v63, 0.0 }
 0xa75   : > { %5188 = vrot.lane.b32.xlu1 %v5131_v5, %s9669_s17  ;;  %v5204_v58 = vrot.slane %v5131_v5, 4  ;;  %s9698_s17 = smul.u32 80, %s9712_s26 }
 0xa76   : > { %v5059_v55 = vpop.f32.mrf.mxu3 }
 0xa77   : > { %v5060_v37 = vadd.f32 %v5059_v55, %v5006_v16  ;;  %s9591_s27 = scalar_lea.vmem %s9634_s13, %s9698_s17 }
 0xa78   : > { %v5108_v15 = vpop.f32.mrf.mxu0 }
 0xa79   : > { %v5109_v29 = vadd.f32 %v5108_v15, %v5055_v59 }
 0xa7b   : > { %v5132_v1 = vmax.f32 %v5109_v29, 0.0 }
 0xa7d   : > { %v5205_v24 = vrot.slane %v5132_v1, 4 }
 0xa7e   : > { %v5061_v9 = vpop.f32.mrf.mxu3 }
 0xa7f   : > { %v5206_v51 = vsel %vm1516_vm4, %v5204_v58, %v5205_v24  ;;  %v5062_v34 = vadd.f32 %v5061_v9, %v5008_v33 }
 0xa80   : > { %v5110_v54 = vpop.f32.mrf.mxu0  ;;  %5213 = vrot.lane.b32.xlu2 %v5206_v51, %s9670_s23 }
 0xa81   : > { %v5111_v22 = vadd.f32 %v5110_v54, %v5057_v10 }
 0xa83   : > { %v5133_v19 = vmax.f32 %v5111_v22, 0.0 }
 0xa85   : > { %v5207_v39 = vrot.slane %v5133_v19, 4 }
 0xa87   : > { %v5208_v35 = vsel %vm1516_vm4, %v5205_v24, %v5207_v39 }
 0xa88   : > { %v5113_v31 = vpop.f32.mrf.mxu0  ;;  %5215 = vrot.lane.b32.xlu0 %v5208_v35, %s9670_s23 }
 0xa89   : > { %v5114_v21 = vadd.f32 %v5113_v31, %v5060_v37 }
 0xa8b   : > { %v5134_v53 = vmax.f32 %v5114_v21, 0.0 }
 0xa8d   : > { %v5209_v48 = vrot.slane %v5134_v53, 4 }
 0xa8f   : > { %v5210_v0 = vsel %vm1516_vm4, %v5207_v39, %v5209_v48 }
 0xa90   : > { %v5115_v13 = vpop.f32.mrf.mxu0  ;;  %5217 = vrot.lane.b32.xlu1 %v5210_v0, %s9670_s23 }
 0xa91   : > { %v5116_v6 = vadd.f32 %v5115_v13, %v5062_v34 }
 0xa93   : > { %v5135_v50 = vmax.f32 %v5116_v6, 0.0 }
 0xa95   : > { %v5211_v32 = vrot.slane %v5135_v50, 4 }
 0xa97   : > { %5221 = vrot.lane.b32.xlu0 %v5211_v32, %s9670_s23  ;;  %v5212_v61 = vsel %vm1516_vm4, %v5209_v48, %v5211_v32  ;;  %vm9700_vm4 = vcmask 880192  }
 0xa98   : > { %5219 = vrot.lane.b32.xlu2 %v5212_v61, %s9670_s23 }
 0xa9a   : > { %v5158_v4 = vpop.permute.xlu2 %5157 }
 0xa9b   : > { %5171 = vst.msk [vmem:[#allocation3 + $0x18] sm:$0xff] %vm1541_vm5, %v5158_v4 }
 0xaa9   : > { %v5164_v60 = vpop.permute.xlu2 %5163 }
 0xaaa   : > { %5174 = vst.msk [vmem:[#allocation3 + $0x60] sm:$0xf] %vm1546_vm9, %v5164_v60  ;;  %v5156_v56 = vpop.permute.xlu1 %5155  ;;  %vm9702_vm9 = vmmov %vm9697_vm2 }
 0xaab   : > { %5170 = vst.msk [vmem:[#allocation3] sm:$0xff] %vm1541_vm5, %v5156_v56 }
 0xaba   : > { %v5160_v45 = vpop.permute.xlu0 %5159 }
 0xabb   : > { %5172 = vst.msk [vmem:[#allocation3 + $0x30] sm:$0xff] %vm1541_vm5, %v5160_v45 }
 0xabf   : > { %v5185_v23 = vpop.permute.xlu2 %5184 }
 0xac0   : > { %5197 = vst.msk [vmem:[#allocation3 + $0x30] sm:$0xff] %vm1568_vm6, %v5185_v23 }
 0xac2   : > { %v5162_v26 = vpop.permute.xlu1 %5161 }
 0xac3   : > { %5173 = vst.msk [vmem:[#allocation3 + $0x48] sm:$0xff] %vm1541_vm5, %v5162_v26  ;;  %vm9701_vm5 = vmmov %vm9696_vm1 }
 0xac7   : > { %v5181_v8 = vpop.permute.xlu0 %5180 }
 0xac8   : > { %5195 = vst.msk [vmem:[#allocation3] sm:$0xff] %vm1568_vm6, %v5181_v8 }
 0xacf   : > { %v5183_v14 = vpop.permute.xlu1 %5182 }
 0xad0   : > { %5196 = vst.msk [vmem:[#allocation3 + $0x18] sm:$0xff] %vm1568_vm6, %v5183_v14 }
 0xada   : > { %v5214_v17 = vpop.permute.xlu2 %5213 }
 0xadb   : > { %5228 = vst.msk [vmem:[#allocation3] sm:$0xff] %vm9696_vm1, %v5214_v17 }
 0xadc   : > { %5229 = vst.msk [vmem:[#allocation3 + $0x8] sm:$0xff] %vm9697_vm2, %v5214_v17 }
 0xadf   : > { %v5187_v7 = vpop.permute.xlu0 %5186 }
 0xae0   : > { %5198 = vst.msk [vmem:[#allocation3 + $0x48] sm:$0xff] %vm1568_vm6, %v5187_v7  ;;  %vm9703_vm6 = vmmov %vm9697_vm2 }
 0xae2   : > { %v5238_v27 = vld [vmem:[#allocation3] sm:$0xff] }
 0xae3   : > { %v5239_v46 = vld [vmem:[#allocation3 + $0x8] sm:$0xff]  ;;  %5248 = vst [vmem:[%s9591_s27] sm:$0xff] %v5238_v27 }
 0xae4   : > { %5249 = vst.msk [vmem:[%s9591_s27 + $0x8] sm:$0xff] %vm9699_vm3, %v5239_v46 }
 0xae7   : > { %v5189_v57 = vpop.permute.xlu1 %5188 }
 0xae8   : > { %5199 = vst.msk [vmem:[#allocation3 + $0x60] sm:$0xf] %vm9700_vm4, %v5189_v57 }
 0xaf2   : > { %v5220_v36 = vpop.permute.xlu2 %5219 }
 0xaf3   : > { %5234 = vst.msk [vmem:[#allocation3 + $0x48] sm:$0xff] %vm9701_vm5, %v5220_v36 }
 0xaf4   : > { %5235 = vst.msk [vmem:[#allocation3 + $0x50] sm:$0xff] %vm9702_vm9, %v5220_v36 }
 0xafa   : > { %v5244_v41 = vld [vmem:[#allocation3 + $0x48] sm:$0xff]  ;;  %v5216_v11 = vpop.permute.xlu0 %5215 }
 0xafb   : > { %v5245_v40 = vld [vmem:[#allocation3 + $0x50] sm:$0xff]  ;;  %5254 = vst [vmem:[%s9591_s27 + $0x30] sm:$0xff] %v5244_v41 }
 0xafc   : > { %5255 = vst.msk [vmem:[%s9591_s27 + $0x38] sm:$0xff] %vm9703_vm6, %v5245_v40 }
 0xafd   : > { %5230 = vst.msk [vmem:[#allocation3 + $0x18] sm:$0xff] %vm9704_vm10, %v5216_v11 }
 0xafe   : > { %5231 = vst.msk [vmem:[#allocation3 + $0x20] sm:$0xff] %vm9705_vm11, %v5216_v11 }
 0xb02   : > { %v5218_v42 = vpop.permute.xlu1 %5217 }
 0xb03   : > { %5232 = vst.msk [vmem:[#allocation3 + $0x30] sm:$0xff] %vm9706_vm13, %v5218_v42 }
 0xb04   : > { %v5240_v49 = vld [vmem:[#allocation3 + $0x18] sm:$0xff]  ;;  %5233 = vst.msk [vmem:[#allocation3 + $0x38] sm:$0xff] %vm9707_vm14, %v5218_v42 }
 0xb05   : > { %v5241_v44 = vld [vmem:[#allocation3 + $0x20] sm:$0xff]  ;;  %5250 = vst [vmem:[%s9591_s27 + $0x10] sm:$0xff] %v5240_v49 }
 0xb06   : > { %5251 = vst.msk [vmem:[%s9591_s27 + $0x18] sm:$0xff] %vm9708_vm15, %v5241_v44 }
 0xb09   : > { %v5222_v18 = vpop.permute.xlu0 %5221 }
 0xb0a   : > { %v5242_v62 = vld [vmem:[#allocation3 + $0x30] sm:$0xff]  ;;  %5236 = vst.msk [vmem:[#allocation3 + $0x60] sm:$0xf] %vm9709_vm12, %v5222_v18 }
 0xb0b   : > { %v5243_v52 = vld [vmem:[#allocation3 + $0x38] sm:$0xff]  ;;  %5252 = vst [vmem:[%s9591_s27 + $0x20] sm:$0xff] %v5242_v62 }
 0xb0c   : > { %5253 = vst.msk [vmem:[%s9591_s27 + $0x28] sm:$0xff] %vm9710_vm8, %v5243_v52 }
 0xb0d   : > { %5237 = vst.msk [vmem:[#allocation3 + $0x68] sm:$0xf] %vm1614_vm7, %v5222_v18 }
 0xb11   : > { %v5246_v12 = vld [vmem:[#allocation3 + $0x60] sm:$0xf] }
 0xb12   : > { %5256 = vst [vmem:[%s9591_s27 + $0x40] sm:$0xf] %v5246_v12 }
 0xb14   : > { %v5247_v38 = vld [vmem:[#allocation3 + $0x68] sm:$0xf] }
 0xb15   : > { %5257 = vst.msk [vmem:[%s9591_s27 + $0x48] sm:$0xf] %vm1614_vm7, %v5247_v38 }
 0xb16 PF: > { %s23_s25 = sadd.s32 1, %s6640_s25  }
 0xb17   : > { %p20_p4 = scmp.ge.s32.totalorder %s23_s25, 4  }
 0xb19   :  { %22 = sbr.rel (!%p20_p4) target bundleno = 1 (0x1), region = 102 }

</bundles_post_ra>
